<compile_context>
chip_gen: v5e
topology: v5e:2x2
jax: 0.10.0
libtpu: 0.0.40
codegen_flags: <defaults>
</compile_context>

<pallas_src>
import functools
import numpy as np
import jax
import jax.numpy as jnp
from jax import lax
from jax.experimental import pallas as pl
from jax.experimental.pallas import tpu as pltpu


# ----------------------------------------------------------------------------
# host-side helpers (static interpolation tables, byte counting)
# ----------------------------------------------------------------------------

def _interp_src(out_size, in_size):
    """PyTorch F.interpolate(mode='bilinear', align_corners=True) src coords."""
    scale = (in_size - 1) / (out_size - 1) if out_size > 1 else 0.0
    src = np.arange(out_size, dtype=np.float64) * scale
    src = np.clip(src, 0.0, in_size - 1)
    lo = np.floor(src).astype(np.int64)
    frac = (src - lo).astype(np.float64)
    return lo, frac


def _interp_matrix(out_size, in_size):
    lo, frac = _interp_src(out_size, in_size)
    hi = np.minimum(lo + 1, in_size - 1)
    m = np.zeros((out_size, in_size), np.float32)
    m[np.arange(out_size), lo] += (1.0 - frac)
    m[np.arange(out_size), hi] += frac
    return m


def _nbytes(shape, dtype):
    return int(np.prod(shape)) * np.dtype(dtype).itemsize


# ----------------------------------------------------------------------------
# in-kernel building blocks
# ----------------------------------------------------------------------------

def _pad_merge(t, kh, kw, pad):
    """Zero-pad an (H, W, C) tile spatially (inside VMEM) and merge (H, W) into
    one row axis so every conv tap becomes a contiguous-row slice.  A few extra
    zero rows are appended so the last taps never slice out of bounds."""
    h, w, c = t.shape
    dt = t.dtype
    if pad:
        zc = jnp.zeros((h, pad, c), dt)
        t = jnp.concatenate([zc, t, zc], axis=1)
        zr = jnp.zeros((pad, w + 2 * pad, c), dt)
        t = jnp.concatenate([zr, t, zr], axis=0)
    hp, wp = h + 2 * pad, w + 2 * pad
    t2 = t.reshape(hp * wp, c)
    if kw > 1:
        t2 = jnp.concatenate([t2, jnp.zeros((kw - 1, c), dt)], axis=0)
    return t2, hp, wp


def _conv_taps(parts, bias, kh, kw, ho, wo, wp, neg_slope):
    """Direct KHxKW stride-1 conv over pre-padded, row-merged bf16 inputs.

    parts: list of (x2d_bf16 (rows, Cin_i), w_bf16 (kh, kw, Cin_i, Cout))
    sharing one f32 accumulator (this is how the channel-concat of the
    upsample block is expressed without materialising the concat).
    The W-shift of each tap is absorbed into the slice start along the merged
    (H*W) row axis; bias is folded into the accumulator init; LeakyReLU runs
    on the f32 accumulator.  Returns (ho, wo, Cout) f32."""
    cout = parts[0][1].shape[-1]
    m = ho * wp
    acc = jnp.broadcast_to(bias.astype(jnp.float32), (m, cout))
    for x2d, w in parts:
        for ky in range(kh):
            for kx in range(kw):
                off = ky * wp + kx
                acc = acc + jnp.dot(x2d[off:off + m], w[ky, kx],
                                    preferred_element_type=jnp.float32)
    if neg_slope is not None:
        acc = jnp.where(acc >= 0, acc, acc * neg_slope)
    return acc.reshape(ho, wp, cout)[:, :wo, :]


# ----------------------------------------------------------------------------
# fused upsample-block kernel
#   optional pre-conv  = convol2 (1x1, padding=1, no activation)   [level 1]
#   resize (separable) + convA(+LReLU) + convB(+LReLU)
#   optional post-conv = convol3 (3x3 -> 1 channel, no activation) [level 4]
# ----------------------------------------------------------------------------

def _block_kernel(x_ref, skip_ref, rwb_ref, *rest,
                  has_pre, has_post, h_lo, h_frac, neg_slope):
    rest = list(rest)
    w_pre = b_pre = w_post = b_post = None
    if has_pre:
        w_pre, b_pre = rest.pop(0), rest.pop(0)
    wa_y_r, wa_s_r, ba_r, wb_r, bb_r = (rest.pop(0), rest.pop(0), rest.pop(0),
                                        rest.pop(0), rest.pop(0))
    if has_post:
        w_post, b_post = rest.pop(0), rest.pop(0)
    o_ref = rest.pop(0)
    assert not rest

    x = x_ref[0]                       # (Hx, Wx, Cx) f32
    skip = skip_ref[0]                 # (Ho, Wo, Cs) f32
    ho, wo, _ = skip.shape

    # --- convol2: 1x1, stride 1, padding 1, no activation (level 1 only) ----
    if has_pre:
        xp2d, hp, wp = _pad_merge(x.astype(jnp.bfloat16), 1, 1, 1)
        x = _conv_taps([(xp2d, w_pre[...])], b_pre[...], 1, 1, hp, wp, wp, None)

    # --- separable bilinear resize (align_corners=True) to the skip size ----
    # W pass: batched MXU matmul over rows.  H pass: static 2-tap lerp (VPU).
    s = lax.dot_general(rwb_ref[...], x.astype(jnp.bfloat16),
                        dimension_numbers=(((2,), (1,)), ((0,), (0,))),
                        preferred_element_type=jnp.float32)   # (Hr, Wo, C0)
    rows = []
    for oh in range(ho):
        lo, f = h_lo[oh], h_frac[oh]
        r = s[lo] if f == 0.0 else (1.0 - f) * s[lo] + f * s[lo + 1]
        rows.append(r[None])
    y = jnp.concatenate(rows, axis=0)                          # (Ho, Wo, C0) f32

    # --- convA over the virtual concat([y, skip]): K-split shared accumulator
    y2d, _, wp = _pad_merge(y.astype(jnp.bfloat16), 3, 3, 1)
    s2d, _, _ = _pad_merge(skip.astype(jnp.bfloat16), 3, 3, 1)
    a = _conv_taps([(y2d, wa_y_r[...]), (s2d, wa_s_r[...])], ba_r[...],
                   3, 3, ho, wo, wp, neg_slope)

    # --- convB ---------------------------------------------------------------
    a2d, _, wp = _pad_merge(a.astype(jnp.bfloat16), 3, 3, 1)
    out = _conv_taps([(a2d, wb_r[...])], bb_r[...], 3, 3, ho, wo, wp, neg_slope)

    # --- convol3: 3x3 -> 1 channel, no activation (level 4 only) -------------
    if has_post:
        o2d, _, wp = _pad_merge(out.astype(jnp.bfloat16), 3, 3, 1)
        out = _conv_taps([(o2d, w_post[...])], b_post[...], 3, 3, ho, wo, wp, None)

    o_ref[0] = out.astype(o_ref.dtype)


def _fused_upsample_block(x, skip, *, conv_a, conv_b, pre=None, post=None,
                          neg_slope=0.2):
    """One pallas_call per decoder level. x, skip, output are NHWC f32."""
    n, hx, wx, cx = x.shape
    _, ho, wo, cs = skip.shape
    ca = int(conv_a["w"].shape[-1])
    c0 = int(pre["w"].shape[-1]) if pre is not None else cx
    hr, wr = (hx + 2, wx + 2) if pre is not None else (hx, wx)   # resize source
    cout = int(post["w"].shape[-1]) if post is not None else ca

    # static interpolation data (separable, align_corners=True)
    rw = _interp_matrix(wo, wr)                                   # (Wo, Wr)
    rwb = jnp.asarray(np.tile(rw[None], (hr, 1, 1)), dtype=jnp.bfloat16)
    h_lo, h_frac = _interp_src(ho, hr)

    # split convA weight along Cin instead of materialising the concat
    wa = conv_a["w"]
    wa_y, wa_s = wa[:, :, :c0, :], wa[:, :, c0:, :]

    inputs = [x, skip, rwb]
    if pre is not None:
        inputs += [pre["w"], pre["b"]]
    inputs += [wa_y, wa_s, conv_a["b"], conv_b["w"], conv_b["b"]]
    if post is not None:
        inputs += [post["w"], post["b"]]

    def batch_spec(a):
        nd = a.ndim
        return pl.BlockSpec((1,) + tuple(a.shape[1:]),
                            lambda i, nd=nd: (i,) + (0,) * (nd - 1))

    def full_spec(a):
        nd = a.ndim
        return pl.BlockSpec(tuple(a.shape), lambda i, nd=nd: (0,) * nd)

    in_specs = [batch_spec(x), batch_spec(skip)] + [full_spec(a) for a in inputs[2:]]

    kern = functools.partial(
        _block_kernel,
        has_pre=pre is not None,
        has_post=post is not None,
        h_lo=tuple(int(v) for v in h_lo),
        h_frac=tuple(float(v) for v in h_frac),
        neg_slope=neg_slope,
    )

    # cost / VMEM hints
    wp_ = wo + 2
    flops = 2 * hr * wo * wr * c0 + 2 * ho * wo * c0
    flops += 2 * 9 * ho * wp_ * (c0 + cs) * ca + 2 * 9 * ho * wp_ * ca * ca
    if pre is not None:
        flops += 2 * hr * wr * cx * c0
    if post is not None:
        flops += 2 * 9 * ho * wp_ * ca * cout
    flops *= n

    act_bytes = (_nbytes(x.shape[1:], x.dtype) + _nbytes(skip.shape[1:], skip.dtype)
                 + ho * wo * cout * 4)
    const_bytes = sum(_nbytes(a.shape, a.dtype) for a in inputs[2:])
    bytes_accessed = n * act_bytes + const_bytes
    vmem_limit = int(min(48 * 2**20, max(8 * 2**20, 8 * (act_bytes + const_bytes))))

    return pl.pallas_call(
        kern,
        out_shape=jax.ShapeDtypeStruct((n, ho, wo, cout), jnp.float32),
        grid=(n,),
        in_specs=in_specs,
        out_specs=pl.BlockSpec((1, ho, wo, cout), lambda i: (i, 0, 0, 0)),
        compiler_params=pltpu.CompilerParams(
            dimension_semantics=("parallel",),
            vmem_limit_bytes=vmem_limit),
        cost_estimate=pl.CostEstimate(flops=int(flops), transcendentals=0,
                                      bytes_accessed=int(bytes_accessed)),
    )(*inputs)


# ----------------------------------------------------------------------------
# Decoder parameters + forward (mirrors the PyTorch module)
# ----------------------------------------------------------------------------

def _conv_params(key, cin, cout, k):
    kw_, kb_ = jax.random.split(key)
    bound = 1.0 / np.sqrt(cin * k * k)
    w = jax.random.uniform(kw_, (k, k, cin, cout), jnp.float32, -bound, bound)
    b = jax.random.uniform(kb_, (1, cout), jnp.float32, -bound, bound)
    return {"w": w.astype(jnp.bfloat16), "b": b}          # weights stored bf16


def init_decoder_params(key, featurescnt=1280, dw=0.6):
    pms = int(featurescnt * dw)
    ks = jax.random.split(key, 10)
    return {
        "convol2":  _conv_params(ks[0], featurescnt,        pms,       1),
        "upspl1_A": _conv_params(ks[1], pms // 1 + 320,     pms // 2,  3),
        "upspl1_B": _conv_params(ks[2], pms // 2,           pms // 2,  3),
        "upspl2_A": _conv_params(ks[3], pms // 2 + 160,     pms // 4,  3),
        "upspl2_B": _conv_params(ks[4], pms // 4,           pms // 4,  3),
        "upspl3_A": _conv_params(ks[5], pms // 2 + 64,      pms // 8,  3),
        "upspl3_B": _conv_params(ks[6], pms // 8,           pms // 8,  3),
        "upspl4_A": _conv_params(ks[7], pms // 4 + 32,      pms // 16, 3),
        "upspl4_B": _conv_params(ks[8], pms // 16,          pms // 16, 3),
        "convol3":  _conv_params(ks[9], pms // 16,          1,         3),
    }


def decoder_forward(params, pms_list):
    """pms_list: sequence of NCHW feature maps; uses indices 2, 4, 6, 9, 15."""
    to_nhwc = lambda t: jnp.transpose(t, (0, 2, 3, 1))
    l0 = to_nhwc(pms_list[2])
    l1 = to_nhwc(pms_list[4])
    l2 = to_nhwc(pms_list[6])
    l3 = to_nhwc(pms_list[9])
    l4 = to_nhwc(pms_list[15])

    # convol2 fused into level 1; convol3 fused into level 4.
    y1 = _fused_upsample_block(l4, l3, conv_a=params["upspl1_A"],
                               conv_b=params["upspl1_B"], pre=params["convol2"])
    y2 = _fused_upsample_block(y1, l2, conv_a=params["upspl2_A"],
                               conv_b=params["upspl2_B"])
    y3 = _fused_upsample_block(y2, l1, conv_a=params["upspl3_A"],
                               conv_b=params["upspl3_B"])
    out = _fused_upsample_block(y3, l0, conv_a=params["upspl4_A"],
                                conv_b=params["upspl4_B"], post=params["convol3"])
    # (N, H, W, 1) NHWC -> (N, 1, H, W) NCHW is a free reshape for C == 1.
    n, ho, wo, _ = out.shape
    return out.reshape(n, 1, ho, wo)


# ----------------------------------------------------------------------------
# Demo
# ----------------------------------------------------------------------------

if __name__ == "__main__":
    key = jax.random.PRNGKey(0)
    featurescnt, dw = 80, 0.6                  # small but structure-consistent
    pms = int(featurescnt * dw)                # 48
    params = init_decoder_params(jax.random.PRNGKey(42), featurescnt, dw)

    n = 2
    # channel counts implied by the hard-coded skip widths in __init__
    chans = {2: pms // 8 + 32,   # l0 = 38
             4: pms // 4 + 64,   # l1 = 76
             6: 160,             # l2
             9: 320,             # l3
             15: featurescnt}    # l4 = 80
    spatial = {2: 32, 4: 16, 6: 8, 9: 4, 15: 2}

    ks = jax.random.split(key, 16)
    pms_list = []
    for i in range(16):
        if i in chans:
            pms_list.append(jax.random.normal(
                ks[i], (n, chans[i], spatial[i], spatial[i]), jnp.float32))
        else:
            # unused pyramid slots (never read by the forward pass)
            pms_list.append(jnp.zeros((1, 1, 1, 1), jnp.float32))

    out = decoder_forward(params, pms_list)
    jax.block_until_ready(out)
    assert out.shape == (n, 1, spatial[2], spatial[2]), out.shape
    print("KERNEL_OK")
</pallas_src>

<mosaic_0001>
module attributes {stable_mosaic.version = 11 : i64} {
  func.func @_block_kernel(%arg0: i32, %arg1: memref<1x2x2x80xf32, #tpu.memory_space<vmem>>, %arg2: memref<1x4x4x320xf32, #tpu.memory_space<vmem>>, %arg3: memref<4x4x4xbf16, #tpu.memory_space<vmem>>, %arg4: memref<1x1x80x48xbf16, #tpu.memory_space<vmem>>, %arg5: memref<1x48xf32, #tpu.memory_space<vmem>>, %arg6: memref<3x3x48x24xbf16, #tpu.memory_space<vmem>>, %arg7: memref<3x3x320x24xbf16, #tpu.memory_space<vmem>>, %arg8: memref<1x24xf32, #tpu.memory_space<vmem>>, %arg9: memref<3x3x24x24xbf16, #tpu.memory_space<vmem>>, %arg10: memref<1x24xf32, #tpu.memory_space<vmem>>, %arg11: memref<1x4x4x24xf32, #tpu.memory_space<vmem>>) attributes {dimension_semantics = [#tpu.dimension_semantics<parallel>], iteration_bounds = array<i64: 2>, scalar_prefetch = 0 : i64, scratch_operands = 0 : i64, tpu.core_type = #tpu.core_type<tc>, window_params = [{transform_indices = @transform_0, window_bounds = array<i64: 1, 2, 2, 80>}, {transform_indices = @transform_1, window_bounds = array<i64: 1, 4, 4, 320>}, {pipeline_mode = #tpu.pipeline_mode<synchronous>, transform_indices = @transform_2, window_bounds = array<i64: 4, 4, 4>}, {pipeline_mode = #tpu.pipeline_mode<synchronous>, transform_indices = @transform_3, window_bounds = array<i64: 1, 1, 80, 48>}, {pipeline_mode = #tpu.pipeline_mode<synchronous>, transform_indices = @transform_4, window_bounds = array<i64: 1, 48>}, {pipeline_mode = #tpu.pipeline_mode<synchronous>, transform_indices = @transform_5, window_bounds = array<i64: 3, 3, 48, 24>}, {pipeline_mode = #tpu.pipeline_mode<synchronous>, transform_indices = @transform_6, window_bounds = array<i64: 3, 3, 320, 24>}, {pipeline_mode = #tpu.pipeline_mode<synchronous>, transform_indices = @transform_7, window_bounds = array<i64: 1, 24>}, {pipeline_mode = #tpu.pipeline_mode<synchronous>, transform_indices = @transform_8, window_bounds = array<i64: 3, 3, 24, 24>}, {pipeline_mode = #tpu.pipeline_mode<synchronous>, transform_indices = @transform_9, window_bounds = array<i64: 1, 24>}, {transform_indices = @transform_10, window_bounds = array<i64: 1, 4, 4, 24>}]} {
    %c0 = arith.constant 0 : index
    %c0_0 = arith.constant 0 : index
    %c0_1 = arith.constant 0 : index
    %c0_2 = arith.constant 0 : index
    %0 = vector.load %arg1[%c0, %c0_0, %c0_1, %c0_2] : memref<1x2x2x80xf32, #tpu.memory_space<vmem>>, vector<1x2x2x80xf32>
    %1 = vector.shape_cast %0 : vector<1x2x2x80xf32> to vector<2x2x80xf32>
    %c0_3 = arith.constant 0 : index
    %c0_4 = arith.constant 0 : index
    %c0_5 = arith.constant 0 : index
    %c0_6 = arith.constant 0 : index
    %2 = vector.load %arg2[%c0_3, %c0_4, %c0_5, %c0_6] : memref<1x4x4x320xf32, #tpu.memory_space<vmem>>, vector<1x4x4x320xf32>
    %3 = vector.shape_cast %2 : vector<1x4x4x320xf32> to vector<4x4x320xf32>
    %4 = arith.truncf %1 : vector<2x2x80xf32> to vector<2x2x80xbf16>
    %cst = arith.constant 0.000000e+00 : bf16
    %5 = vector.broadcast %cst : bf16 to vector<2x1x80xbf16>
    %6 = tpu.concatenate %5, %4, %5 in 1 : vector<2x1x80xbf16>, vector<2x2x80xbf16>, vector<2x1x80xbf16> -> vector<2x4x80xbf16>
    %cst_7 = arith.constant 0.000000e+00 : bf16
    %7 = vector.broadcast %cst_7 : bf16 to vector<1x4x80xbf16>
    %8 = tpu.concatenate %7, %6, %7 in 0 : vector<1x4x80xbf16>, vector<2x4x80xbf16>, vector<1x4x80xbf16> -> vector<4x4x80xbf16>
    %9 = vector.shape_cast %8 : vector<4x4x80xbf16> to vector<16x80xbf16>
    %c0_8 = arith.constant 0 : index
    %c0_9 = arith.constant 0 : index
    %c0_10 = arith.constant 0 : index
    %c0_11 = arith.constant 0 : index
    %10 = vector.load %arg4[%c0_8, %c0_9, %c0_10, %c0_11] : memref<1x1x80x48xbf16, #tpu.memory_space<vmem>>, vector<1x1x80x48xbf16>
    %c0_12 = arith.constant 0 : index
    %c0_13 = arith.constant 0 : index
    %11 = vector.load %arg5[%c0_12, %c0_13] : memref<1x48xf32, #tpu.memory_space<vmem>>, vector<1x48xf32>
    %12 = vector.shape_cast %11 : vector<1x48xf32> to vector<1x48xf32>
    %13 = vector.broadcast %12 : vector<1x48xf32> to vector<16x48xf32>
    %14 = vector.shape_cast %10 : vector<1x1x80x48xbf16> to vector<80x48xbf16>
    %cst_14 = arith.constant dense<0.000000e+00> : vector<16x48xf32>
    %15 = tpu.matmul %9, %14, %cst_14 {dimension_numbers = #tpu.dot_dimension_numbers<[1], [0], [0], [1], [0, 0, 1, 1], [], []>} : vector<16x80xbf16>, vector<80x48xbf16>, vector<16x48xf32> -> vector<16x48xf32>
    %16 = arith.addf %13, %15 : vector<16x48xf32>
    %17 = vector.shape_cast %16 : vector<16x48xf32> to vector<4x4x48xf32>
    %c0_15 = arith.constant 0 : index
    %c0_16 = arith.constant 0 : index
    %c0_17 = arith.constant 0 : index
    %18 = vector.load %arg3[%c0_15, %c0_16, %c0_17] : memref<4x4x4xbf16, #tpu.memory_space<vmem>>, vector<4x4x4xbf16>
    %19 = arith.truncf %17 : vector<4x4x48xf32> to vector<4x4x48xbf16>
    %cst_18 = arith.constant dense<0.000000e+00> : vector<4x4x48xf32>
    %20 = tpu.matmul %18, %19, %cst_18 {dimension_numbers = #tpu.dot_dimension_numbers<[2], [1], [1], [2], [0, 0, 0, 1, 1, 2], [0], [0]>} : vector<4x4x4xbf16>, vector<4x4x48xbf16>, vector<4x4x48xf32> -> vector<4x4x48xf32>
    %21 = vector.extract_strided_slice %20 {offsets = [0, 0, 0], sizes = [1, 4, 48], strides = [1, 1, 1]} : vector<4x4x48xf32> to vector<1x4x48xf32>
    %22 = vector.shape_cast %21 : vector<1x4x48xf32> to vector<4x48xf32>
    %23 = vector.shape_cast %22 : vector<4x48xf32> to vector<1x4x48xf32>
    %24 = vector.extract_strided_slice %20 {offsets = [1, 0, 0], sizes = [1, 4, 48], strides = [1, 1, 1]} : vector<4x4x48xf32> to vector<1x4x48xf32>
    %25 = vector.shape_cast %24 : vector<1x4x48xf32> to vector<4x48xf32>
    %26 = vector.shape_cast %25 : vector<4x48xf32> to vector<1x4x48xf32>
    %27 = vector.extract_strided_slice %20 {offsets = [2, 0, 0], sizes = [1, 4, 48], strides = [1, 1, 1]} : vector<4x4x48xf32> to vector<1x4x48xf32>
    %28 = vector.shape_cast %27 : vector<1x4x48xf32> to vector<4x48xf32>
    %29 = vector.shape_cast %28 : vector<4x48xf32> to vector<1x4x48xf32>
    %30 = vector.extract_strided_slice %20 {offsets = [3, 0, 0], sizes = [1, 4, 48], strides = [1, 1, 1]} : vector<4x4x48xf32> to vector<1x4x48xf32>
    %31 = vector.shape_cast %30 : vector<1x4x48xf32> to vector<4x48xf32>
    %32 = vector.shape_cast %31 : vector<4x48xf32> to vector<1x4x48xf32>
    %33 = tpu.concatenate %23, %26, %29, %32 in 0 : vector<1x4x48xf32>, vector<1x4x48xf32>, vector<1x4x48xf32>, vector<1x4x48xf32> -> vector<4x4x48xf32>
    %34 = arith.truncf %33 : vector<4x4x48xf32> to vector<4x4x48xbf16>
    %cst_19 = arith.constant 0.000000e+00 : bf16
    %35 = vector.broadcast %cst_19 : bf16 to vector<4x1x48xbf16>
    %36 = tpu.concatenate %35, %34, %35 in 1 : vector<4x1x48xbf16>, vector<4x4x48xbf16>, vector<4x1x48xbf16> -> vector<4x6x48xbf16>
    %cst_20 = arith.constant 0.000000e+00 : bf16
    %37 = vector.broadcast %cst_20 : bf16 to vector<1x6x48xbf16>
    %38 = tpu.concatenate %37, %36, %37 in 0 : vector<1x6x48xbf16>, vector<4x6x48xbf16>, vector<1x6x48xbf16> -> vector<6x6x48xbf16>
    %39 = vector.shape_cast %38 : vector<6x6x48xbf16> to vector<36x48xbf16>
    %cst_21 = arith.constant 0.000000e+00 : bf16
    %40 = vector.broadcast %cst_21 : bf16 to vector<2x48xbf16>
    %41 = tpu.concatenate %39, %40 in 0 : vector<36x48xbf16>, vector<2x48xbf16> -> vector<38x48xbf16>
    %42 = arith.truncf %3 : vector<4x4x320xf32> to vector<4x4x320xbf16>
    %cst_22 = arith.constant 0.000000e+00 : bf16
    %43 = vector.broadcast %cst_22 : bf16 to vector<4x1x320xbf16>
    %44 = tpu.concatenate %43, %42, %43 in 1 : vector<4x1x320xbf16>, vector<4x4x320xbf16>, vector<4x1x320xbf16> -> vector<4x6x320xbf16>
    %cst_23 = arith.constant 0.000000e+00 : bf16
    %45 = vector.broadcast %cst_23 : bf16 to vector<1x6x320xbf16>
    %46 = tpu.concatenate %45, %44, %45 in 0 : vector<1x6x320xbf16>, vector<4x6x320xbf16>, vector<1x6x320xbf16> -> vector<6x6x320xbf16>
    %47 = vector.shape_cast %46 : vector<6x6x320xbf16> to vector<36x320xbf16>
    %cst_24 = arith.constant 0.000000e+00 : bf16
    %48 = vector.broadcast %cst_24 : bf16 to vector<2x320xbf16>
    %49 = tpu.concatenate %47, %48 in 0 : vector<36x320xbf16>, vector<2x320xbf16> -> vector<38x320xbf16>
    %c0_25 = arith.constant 0 : index
    %c0_26 = arith.constant 0 : index
    %c0_27 = arith.constant 0 : index
    %c0_28 = arith.constant 0 : index
    %50 = vector.load %arg6[%c0_25, %c0_26, %c0_27, %c0_28] : memref<3x3x48x24xbf16, #tpu.memory_space<vmem>>, vector<3x3x48x24xbf16>
    %c0_29 = arith.constant 0 : index
    %c0_30 = arith.constant 0 : index
    %c0_31 = arith.constant 0 : index
    %c0_32 = arith.constant 0 : index
    %51 = vector.load %arg7[%c0_29, %c0_30, %c0_31, %c0_32] : memref<3x3x320x24xbf16, #tpu.memory_space<vmem>>, vector<3x3x320x24xbf16>
    %c0_33 = arith.constant 0 : index
    %c0_34 = arith.constant 0 : index
    %52 = vector.load %arg8[%c0_33, %c0_34] : memref<1x24xf32, #tpu.memory_space<vmem>>, vector<1x24xf32>
    %53 = vector.shape_cast %52 : vector<1x24xf32> to vector<1x24xf32>
    %54 = vector.broadcast %53 : vector<1x24xf32> to vector<24x24xf32>
    %55 = vector.extract_strided_slice %41 {offsets = [0, 0], sizes = [24, 48], strides = [1, 1]} : vector<38x48xbf16> to vector<24x48xbf16>
    %56 = vector.extract_strided_slice %50 {offsets = [0, 0, 0, 0], sizes = [1, 1, 48, 24], strides = [1, 1, 1, 1]} : vector<3x3x48x24xbf16> to vector<1x1x48x24xbf16>
    %57 = vector.shape_cast %56 : vector<1x1x48x24xbf16> to vector<48x24xbf16>
    %cst_35 = arith.constant dense<0.000000e+00> : vector<24x24xf32>
    %58 = tpu.matmul %55, %57, %cst_35 {dimension_numbers = #tpu.dot_dimension_numbers<[1], [0], [0], [1], [0, 0, 1, 1], [], []>} : vector<24x48xbf16>, vector<48x24xbf16>, vector<24x24xf32> -> vector<24x24xf32>
    %59 = arith.addf %54, %58 : vector<24x24xf32>
    %60 = vector.extract_strided_slice %41 {offsets = [1, 0], sizes = [24, 48], strides = [1, 1]} : vector<38x48xbf16> to vector<24x48xbf16>
    %61 = vector.extract_strided_slice %50 {offsets = [0, 1, 0, 0], sizes = [1, 1, 48, 24], strides = [1, 1, 1, 1]} : vector<3x3x48x24xbf16> to vector<1x1x48x24xbf16>
    %62 = vector.shape_cast %61 : vector<1x1x48x24xbf16> to vector<48x24xbf16>
    %cst_36 = arith.constant dense<0.000000e+00> : vector<24x24xf32>
    %63 = tpu.matmul %60, %62, %cst_36 {dimension_numbers = #tpu.dot_dimension_numbers<[1], [0], [0], [1], [0, 0, 1, 1], [], []>} : vector<24x48xbf16>, vector<48x24xbf16>, vector<24x24xf32> -> vector<24x24xf32>
    %64 = arith.addf %59, %63 : vector<24x24xf32>
    %65 = vector.extract_strided_slice %41 {offsets = [2, 0], sizes = [24, 48], strides = [1, 1]} : vector<38x48xbf16> to vector<24x48xbf16>
    %66 = vector.extract_strided_slice %50 {offsets = [0, 2, 0, 0], sizes = [1, 1, 48, 24], strides = [1, 1, 1, 1]} : vector<3x3x48x24xbf16> to vector<1x1x48x24xbf16>
    %67 = vector.shape_cast %66 : vector<1x1x48x24xbf16> to vector<48x24xbf16>
    %cst_37 = arith.constant dense<0.000000e+00> : vector<24x24xf32>
    %68 = tpu.matmul %65, %67, %cst_37 {dimension_numbers = #tpu.dot_dimension_numbers<[1], [0], [0], [1], [0, 0, 1, 1], [], []>} : vector<24x48xbf16>, vector<48x24xbf16>, vector<24x24xf32> -> vector<24x24xf32>
    %69 = arith.addf %64, %68 : vector<24x24xf32>
    %70 = vector.extract_strided_slice %41 {offsets = [6, 0], sizes = [24, 48], strides = [1, 1]} : vector<38x48xbf16> to vector<24x48xbf16>
    %71 = vector.extract_strided_slice %50 {offsets = [1, 0, 0, 0], sizes = [1, 1, 48, 24], strides = [1, 1, 1, 1]} : vector<3x3x48x24xbf16> to vector<1x1x48x24xbf16>
    %72 = vector.shape_cast %71 : vector<1x1x48x24xbf16> to vector<48x24xbf16>
    %cst_38 = arith.constant dense<0.000000e+00> : vector<24x24xf32>
    %73 = tpu.matmul %70, %72, %cst_38 {dimension_numbers = #tpu.dot_dimension_numbers<[1], [0], [0], [1], [0, 0, 1, 1], [], []>} : vector<24x48xbf16>, vector<48x24xbf16>, vector<24x24xf32> -> vector<24x24xf32>
    %74 = arith.addf %69, %73 : vector<24x24xf32>
    %75 = vector.extract_strided_slice %41 {offsets = [7, 0], sizes = [24, 48], strides = [1, 1]} : vector<38x48xbf16> to vector<24x48xbf16>
    %76 = vector.extract_strided_slice %50 {offsets = [1, 1, 0, 0], sizes = [1, 1, 48, 24], strides = [1, 1, 1, 1]} : vector<3x3x48x24xbf16> to vector<1x1x48x24xbf16>
    %77 = vector.shape_cast %76 : vector<1x1x48x24xbf16> to vector<48x24xbf16>
    %cst_39 = arith.constant dense<0.000000e+00> : vector<24x24xf32>
    %78 = tpu.matmul %75, %77, %cst_39 {dimension_numbers = #tpu.dot_dimension_numbers<[1], [0], [0], [1], [0, 0, 1, 1], [], []>} : vector<24x48xbf16>, vector<48x24xbf16>, vector<24x24xf32> -> vector<24x24xf32>
    %79 = arith.addf %74, %78 : vector<24x24xf32>
    %80 = vector.extract_strided_slice %41 {offsets = [8, 0], sizes = [24, 48], strides = [1, 1]} : vector<38x48xbf16> to vector<24x48xbf16>
    %81 = vector.extract_strided_slice %50 {offsets = [1, 2, 0, 0], sizes = [1, 1, 48, 24], strides = [1, 1, 1, 1]} : vector<3x3x48x24xbf16> to vector<1x1x48x24xbf16>
    %82 = vector.shape_cast %81 : vector<1x1x48x24xbf16> to vector<48x24xbf16>
    %cst_40 = arith.constant dense<0.000000e+00> : vector<24x24xf32>
    %83 = tpu.matmul %80, %82, %cst_40 {dimension_numbers = #tpu.dot_dimension_numbers<[1], [0], [0], [1], [0, 0, 1, 1], [], []>} : vector<24x48xbf16>, vector<48x24xbf16>, vector<24x24xf32> -> vector<24x24xf32>
    %84 = arith.addf %79, %83 : vector<24x24xf32>
    %85 = vector.extract_strided_slice %41 {offsets = [12, 0], sizes = [24, 48], strides = [1, 1]} : vector<38x48xbf16> to vector<24x48xbf16>
    %86 = vector.extract_strided_slice %50 {offsets = [2, 0, 0, 0], sizes = [1, 1, 48, 24], strides = [1, 1, 1, 1]} : vector<3x3x48x24xbf16> to vector<1x1x48x24xbf16>
    %87 = vector.shape_cast %86 : vector<1x1x48x24xbf16> to vector<48x24xbf16>
    %cst_41 = arith.constant dense<0.000000e+00> : vector<24x24xf32>
    %88 = tpu.matmul %85, %87, %cst_41 {dimension_numbers = #tpu.dot_dimension_numbers<[1], [0], [0], [1], [0, 0, 1, 1], [], []>} : vector<24x48xbf16>, vector<48x24xbf16>, vector<24x24xf32> -> vector<24x24xf32>
    %89 = arith.addf %84, %88 : vector<24x24xf32>
    %90 = vector.extract_strided_slice %41 {offsets = [13, 0], sizes = [24, 48], strides = [1, 1]} : vector<38x48xbf16> to vector<24x48xbf16>
    %91 = vector.extract_strided_slice %50 {offsets = [2, 1, 0, 0], sizes = [1, 1, 48, 24], strides = [1, 1, 1, 1]} : vector<3x3x48x24xbf16> to vector<1x1x48x24xbf16>
    %92 = vector.shape_cast %91 : vector<1x1x48x24xbf16> to vector<48x24xbf16>
    %cst_42 = arith.constant dense<0.000000e+00> : vector<24x24xf32>
    %93 = tpu.matmul %90, %92, %cst_42 {dimension_numbers = #tpu.dot_dimension_numbers<[1], [0], [0], [1], [0, 0, 1, 1], [], []>} : vector<24x48xbf16>, vector<48x24xbf16>, vector<24x24xf32> -> vector<24x24xf32>
    %94 = arith.addf %89, %93 : vector<24x24xf32>
    %95 = vector.extract_strided_slice %41 {offsets = [14, 0], sizes = [24, 48], strides = [1, 1]} : vector<38x48xbf16> to vector<24x48xbf16>
    %96 = vector.extract_strided_slice %50 {offsets = [2, 2, 0, 0], sizes = [1, 1, 48, 24], strides = [1, 1, 1, 1]} : vector<3x3x48x24xbf16> to vector<1x1x48x24xbf16>
    %97 = vector.shape_cast %96 : vector<1x1x48x24xbf16> to vector<48x24xbf16>
    %cst_43 = arith.constant dense<0.000000e+00> : vector<24x24xf32>
    %98 = tpu.matmul %95, %97, %cst_43 {dimension_numbers = #tpu.dot_dimension_numbers<[1], [0], [0], [1], [0, 0, 1, 1], [], []>} : vector<24x48xbf16>, vector<48x24xbf16>, vector<24x24xf32> -> vector<24x24xf32>
    %99 = arith.addf %94, %98 : vector<24x24xf32>
    %100 = vector.extract_strided_slice %49 {offsets = [0, 0], sizes = [24, 320], strides = [1, 1]} : vector<38x320xbf16> to vector<24x320xbf16>
    %101 = vector.extract_strided_slice %51 {offsets = [0, 0, 0, 0], sizes = [1, 1, 320, 24], strides = [1, 1, 1, 1]} : vector<3x3x320x24xbf16> to vector<1x1x320x24xbf16>
    %102 = vector.shape_cast %101 : vector<1x1x320x24xbf16> to vector<320x24xbf16>
    %cst_44 = arith.constant dense<0.000000e+00> : vector<24x24xf32>
    %103 = tpu.matmul %100, %102, %cst_44 {dimension_numbers = #tpu.dot_dimension_numbers<[1], [0], [0], [1], [0, 0, 1, 1], [], []>} : vector<24x320xbf16>, vector<320x24xbf16>, vector<24x24xf32> -> vector<24x24xf32>
    %104 = arith.addf %99, %103 : vector<24x24xf32>
    %105 = vector.extract_strided_slice %49 {offsets = [1, 0], sizes = [24, 320], strides = [1, 1]} : vector<38x320xbf16> to vector<24x320xbf16>
    %106 = vector.extract_strided_slice %51 {offsets = [0, 1, 0, 0], sizes = [1, 1, 320, 24], strides = [1, 1, 1, 1]} : vector<3x3x320x24xbf16> to vector<1x1x320x24xbf16>
    %107 = vector.shape_cast %106 : vector<1x1x320x24xbf16> to vector<320x24xbf16>
    %cst_45 = arith.constant dense<0.000000e+00> : vector<24x24xf32>
    %108 = tpu.matmul %105, %107, %cst_45 {dimension_numbers = #tpu.dot_dimension_numbers<[1], [0], [0], [1], [0, 0, 1, 1], [], []>} : vector<24x320xbf16>, vector<320x24xbf16>, vector<24x24xf32> -> vector<24x24xf32>
    %109 = arith.addf %104, %108 : vector<24x24xf32>
    %110 = vector.extract_strided_slice %49 {offsets = [2, 0], sizes = [24, 320], strides = [1, 1]} : vector<38x320xbf16> to vector<24x320xbf16>
    %111 = vector.extract_strided_slice %51 {offsets = [0, 2, 0, 0], sizes = [1, 1, 320, 24], strides = [1, 1, 1, 1]} : vector<3x3x320x24xbf16> to vector<1x1x320x24xbf16>
    %112 = vector.shape_cast %111 : vector<1x1x320x24xbf16> to vector<320x24xbf16>
    %cst_46 = arith.constant dense<0.000000e+00> : vector<24x24xf32>
    %113 = tpu.matmul %110, %112, %cst_46 {dimension_numbers = #tpu.dot_dimension_numbers<[1], [0], [0], [1], [0, 0, 1, 1], [], []>} : vector<24x320xbf16>, vector<320x24xbf16>, vector<24x24xf32> -> vector<24x24xf32>
    %114 = arith.addf %109, %113 : vector<24x24xf32>
    %115 = vector.extract_strided_slice %49 {offsets = [6, 0], sizes = [24, 320], strides = [1, 1]} : vector<38x320xbf16> to vector<24x320xbf16>
    %116 = vector.extract_strided_slice %51 {offsets = [1, 0, 0, 0], sizes = [1, 1, 320, 24], strides = [1, 1, 1, 1]} : vector<3x3x320x24xbf16> to vector<1x1x320x24xbf16>
    %117 = vector.shape_cast %116 : vector<1x1x320x24xbf16> to vector<320x24xbf16>
    %cst_47 = arith.constant dense<0.000000e+00> : vector<24x24xf32>
    %118 = tpu.matmul %115, %117, %cst_47 {dimension_numbers = #tpu.dot_dimension_numbers<[1], [0], [0], [1], [0, 0, 1, 1], [], []>} : vector<24x320xbf16>, vector<320x24xbf16>, vector<24x24xf32> -> vector<24x24xf32>
    %119 = arith.addf %114, %118 : vector<24x24xf32>
    %120 = vector.extract_strided_slice %49 {offsets = [7, 0], sizes = [24, 320], strides = [1, 1]} : vector<38x320xbf16> to vector<24x320xbf16>
    %121 = vector.extract_strided_slice %51 {offsets = [1, 1, 0, 0], sizes = [1, 1, 320, 24], strides = [1, 1, 1, 1]} : vector<3x3x320x24xbf16> to vector<1x1x320x24xbf16>
    %122 = vector.shape_cast %121 : vector<1x1x320x24xbf16> to vector<320x24xbf16>
    %cst_48 = arith.constant dense<0.000000e+00> : vector<24x24xf32>
    %123 = tpu.matmul %120, %122, %cst_48 {dimension_numbers = #tpu.dot_dimension_numbers<[1], [0], [0], [1], [0, 0, 1, 1], [], []>} : vector<24x320xbf16>, vector<320x24xbf16>, vector<24x24xf32> -> vector<24x24xf32>
    %124 = arith.addf %119, %123 : vector<24x24xf32>
    %125 = vector.extract_strided_slice %49 {offsets = [8, 0], sizes = [24, 320], strides = [1, 1]} : vector<38x320xbf16> to vector<24x320xbf16>
    %126 = vector.extract_strided_slice %51 {offsets = [1, 2, 0, 0], sizes = [1, 1, 320, 24], strides = [1, 1, 1, 1]} : vector<3x3x320x24xbf16> to vector<1x1x320x24xbf16>
    %127 = vector.shape_cast %126 : vector<1x1x320x24xbf16> to vector<320x24xbf16>
    %cst_49 = arith.constant dense<0.000000e+00> : vector<24x24xf32>
    %128 = tpu.matmul %125, %127, %cst_49 {dimension_numbers = #tpu.dot_dimension_numbers<[1], [0], [0], [1], [0, 0, 1, 1], [], []>} : vector<24x320xbf16>, vector<320x24xbf16>, vector<24x24xf32> -> vector<24x24xf32>
    %129 = arith.addf %124, %128 : vector<24x24xf32>
    %130 = vector.extract_strided_slice %49 {offsets = [12, 0], sizes = [24, 320], strides = [1, 1]} : vector<38x320xbf16> to vector<24x320xbf16>
    %131 = vector.extract_strided_slice %51 {offsets = [2, 0, 0, 0], sizes = [1, 1, 320, 24], strides = [1, 1, 1, 1]} : vector<3x3x320x24xbf16> to vector<1x1x320x24xbf16>
    %132 = vector.shape_cast %131 : vector<1x1x320x24xbf16> to vector<320x24xbf16>
    %cst_50 = arith.constant dense<0.000000e+00> : vector<24x24xf32>
    %133 = tpu.matmul %130, %132, %cst_50 {dimension_numbers = #tpu.dot_dimension_numbers<[1], [0], [0], [1], [0, 0, 1, 1], [], []>} : vector<24x320xbf16>, vector<320x24xbf16>, vector<24x24xf32> -> vector<24x24xf32>
    %134 = arith.addf %129, %133 : vector<24x24xf32>
    %135 = vector.extract_strided_slice %49 {offsets = [13, 0], sizes = [24, 320], strides = [1, 1]} : vector<38x320xbf16> to vector<24x320xbf16>
    %136 = vector.extract_strided_slice %51 {offsets = [2, 1, 0, 0], sizes = [1, 1, 320, 24], strides = [1, 1, 1, 1]} : vector<3x3x320x24xbf16> to vector<1x1x320x24xbf16>
    %137 = vector.shape_cast %136 : vector<1x1x320x24xbf16> to vector<320x24xbf16>
    %cst_51 = arith.constant dense<0.000000e+00> : vector<24x24xf32>
    %138 = tpu.matmul %135, %137, %cst_51 {dimension_numbers = #tpu.dot_dimension_numbers<[1], [0], [0], [1], [0, 0, 1, 1], [], []>} : vector<24x320xbf16>, vector<320x24xbf16>, vector<24x24xf32> -> vector<24x24xf32>
    %139 = arith.addf %134, %138 : vector<24x24xf32>
    %140 = vector.extract_strided_slice %49 {offsets = [14, 0], sizes = [24, 320], strides = [1, 1]} : vector<38x320xbf16> to vector<24x320xbf16>
    %141 = vector.extract_strided_slice %51 {offsets = [2, 2, 0, 0], sizes = [1, 1, 320, 24], strides = [1, 1, 1, 1]} : vector<3x3x320x24xbf16> to vector<1x1x320x24xbf16>
    %142 = vector.shape_cast %141 : vector<1x1x320x24xbf16> to vector<320x24xbf16>
    %cst_52 = arith.constant dense<0.000000e+00> : vector<24x24xf32>
    %143 = tpu.matmul %140, %142, %cst_52 {dimension_numbers = #tpu.dot_dimension_numbers<[1], [0], [0], [1], [0, 0, 1, 1], [], []>} : vector<24x320xbf16>, vector<320x24xbf16>, vector<24x24xf32> -> vector<24x24xf32>
    %144 = arith.addf %139, %143 : vector<24x24xf32>
    %cst_53 = arith.constant 0.000000e+00 : f32
    %145 = vector.broadcast %cst_53 : f32 to vector<24x24xf32>
    %146 = arith.cmpf oge, %144, %145 : vector<24x24xf32>
    %cst_54 = arith.constant 2.000000e-01 : f32
    %147 = vector.broadcast %cst_54 : f32 to vector<24x24xf32>
    %148 = arith.mulf %144, %147 : vector<24x24xf32>
    %149 = arith.select %146, %144, %148 : vector<24x24xi1>, vector<24x24xf32>
    %150 = vector.shape_cast %149 : vector<24x24xf32> to vector<4x6x24xf32>
    %151 = vector.extract_strided_slice %150 {offsets = [0, 0, 0], sizes = [4, 4, 24], strides = [1, 1, 1]} : vector<4x6x24xf32> to vector<4x4x24xf32>
    %152 = arith.truncf %151 : vector<4x4x24xf32> to vector<4x4x24xbf16>
    %cst_55 = arith.constant 0.000000e+00 : bf16
    %153 = vector.broadcast %cst_55 : bf16 to vector<4x1x24xbf16>
    %154 = tpu.concatenate %153, %152, %153 in 1 : vector<4x1x24xbf16>, vector<4x4x24xbf16>, vector<4x1x24xbf16> -> vector<4x6x24xbf16>
    %cst_56 = arith.constant 0.000000e+00 : bf16
    %155 = vector.broadcast %cst_56 : bf16 to vector<1x6x24xbf16>
    %156 = tpu.concatenate %155, %154, %155 in 0 : vector<1x6x24xbf16>, vector<4x6x24xbf16>, vector<1x6x24xbf16> -> vector<6x6x24xbf16>
    %157 = vector.shape_cast %156 : vector<6x6x24xbf16> to vector<36x24xbf16>
    %cst_57 = arith.constant 0.000000e+00 : bf16
    %158 = vector.broadcast %cst_57 : bf16 to vector<2x24xbf16>
    %159 = tpu.concatenate %157, %158 in 0 : vector<36x24xbf16>, vector<2x24xbf16> -> vector<38x24xbf16>
    %c0_58 = arith.constant 0 : index
    %c0_59 = arith.constant 0 : index
    %c0_60 = arith.constant 0 : index
    %c0_61 = arith.constant 0 : index
    %160 = vector.load %arg9[%c0_58, %c0_59, %c0_60, %c0_61] : memref<3x3x24x24xbf16, #tpu.memory_space<vmem>>, vector<3x3x24x24xbf16>
    %c0_62 = arith.constant 0 : index
    %c0_63 = arith.constant 0 : index
    %161 = vector.load %arg10[%c0_62, %c0_63] : memref<1x24xf32, #tpu.memory_space<vmem>>, vector<1x24xf32>
    %162 = vector.shape_cast %161 : vector<1x24xf32> to vector<1x24xf32>
    %163 = vector.broadcast %162 : vector<1x24xf32> to vector<24x24xf32>
    %164 = vector.extract_strided_slice %159 {offsets = [0, 0], sizes = [24, 24], strides = [1, 1]} : vector<38x24xbf16> to vector<24x24xbf16>
    %165 = vector.extract_strided_slice %160 {offsets = [0, 0, 0, 0], sizes = [1, 1, 24, 24], strides = [1, 1, 1, 1]} : vector<3x3x24x24xbf16> to vector<1x1x24x24xbf16>
    %166 = vector.shape_cast %165 : vector<1x1x24x24xbf16> to vector<24x24xbf16>
    %cst_64 = arith.constant dense<0.000000e+00> : vector<24x24xf32>
    %167 = tpu.matmul %164, %166, %cst_64 {dimension_numbers = #tpu.dot_dimension_numbers<[1], [0], [0], [1], [0, 0, 1, 1], [], []>} : vector<24x24xbf16>, vector<24x24xbf16>, vector<24x24xf32> -> vector<24x24xf32>
    %168 = arith.addf %163, %167 : vector<24x24xf32>
    %169 = vector.extract_strided_slice %159 {offsets = [1, 0], sizes = [24, 24], strides = [1, 1]} : vector<38x24xbf16> to vector<24x24xbf16>
    %170 = vector.extract_strided_slice %160 {offsets = [0, 1, 0, 0], sizes = [1, 1, 24, 24], strides = [1, 1, 1, 1]} : vector<3x3x24x24xbf16> to vector<1x1x24x24xbf16>
    %171 = vector.shape_cast %170 : vector<1x1x24x24xbf16> to vector<24x24xbf16>
    %cst_65 = arith.constant dense<0.000000e+00> : vector<24x24xf32>
    %172 = tpu.matmul %169, %171, %cst_65 {dimension_numbers = #tpu.dot_dimension_numbers<[1], [0], [0], [1], [0, 0, 1, 1], [], []>} : vector<24x24xbf16>, vector<24x24xbf16>, vector<24x24xf32> -> vector<24x24xf32>
    %173 = arith.addf %168, %172 : vector<24x24xf32>
    %174 = vector.extract_strided_slice %159 {offsets = [2, 0], sizes = [24, 24], strides = [1, 1]} : vector<38x24xbf16> to vector<24x24xbf16>
    %175 = vector.extract_strided_slice %160 {offsets = [0, 2, 0, 0], sizes = [1, 1, 24, 24], strides = [1, 1, 1, 1]} : vector<3x3x24x24xbf16> to vector<1x1x24x24xbf16>
    %176 = vector.shape_cast %175 : vector<1x1x24x24xbf16> to vector<24x24xbf16>
    %cst_66 = arith.constant dense<0.000000e+00> : vector<24x24xf32>
    %177 = tpu.matmul %174, %176, %cst_66 {dimension_numbers = #tpu.dot_dimension_numbers<[1], [0], [0], [1], [0, 0, 1, 1], [], []>} : vector<24x24xbf16>, vector<24x24xbf16>, vector<24x24xf32> -> vector<24x24xf32>
    %178 = arith.addf %173, %177 : vector<24x24xf32>
    %179 = vector.extract_strided_slice %159 {offsets = [6, 0], sizes = [24, 24], strides = [1, 1]} : vector<38x24xbf16> to vector<24x24xbf16>
    %180 = vector.extract_strided_slice %160 {offsets = [1, 0, 0, 0], sizes = [1, 1, 24, 24], strides = [1, 1, 1, 1]} : vector<3x3x24x24xbf16> to vector<1x1x24x24xbf16>
    %181 = vector.shape_cast %180 : vector<1x1x24x24xbf16> to vector<24x24xbf16>
    %cst_67 = arith.constant dense<0.000000e+00> : vector<24x24xf32>
    %182 = tpu.matmul %179, %181, %cst_67 {dimension_numbers = #tpu.dot_dimension_numbers<[1], [0], [0], [1], [0, 0, 1, 1], [], []>} : vector<24x24xbf16>, vector<24x24xbf16>, vector<24x24xf32> -> vector<24x24xf32>
    %183 = arith.addf %178, %182 : vector<24x24xf32>
    %184 = vector.extract_strided_slice %159 {offsets = [7, 0], sizes = [24, 24], strides = [1, 1]} : vector<38x24xbf16> to vector<24x24xbf16>
    %185 = vector.extract_strided_slice %160 {offsets = [1, 1, 0, 0], sizes = [1, 1, 24, 24], strides = [1, 1, 1, 1]} : vector<3x3x24x24xbf16> to vector<1x1x24x24xbf16>
    %186 = vector.shape_cast %185 : vector<1x1x24x24xbf16> to vector<24x24xbf16>
    %cst_68 = arith.constant dense<0.000000e+00> : vector<24x24xf32>
    %187 = tpu.matmul %184, %186, %cst_68 {dimension_numbers = #tpu.dot_dimension_numbers<[1], [0], [0], [1], [0, 0, 1, 1], [], []>} : vector<24x24xbf16>, vector<24x24xbf16>, vector<24x24xf32> -> vector<24x24xf32>
    %188 = arith.addf %183, %187 : vector<24x24xf32>
    %189 = vector.extract_strided_slice %159 {offsets = [8, 0], sizes = [24, 24], strides = [1, 1]} : vector<38x24xbf16> to vector<24x24xbf16>
    %190 = vector.extract_strided_slice %160 {offsets = [1, 2, 0, 0], sizes = [1, 1, 24, 24], strides = [1, 1, 1, 1]} : vector<3x3x24x24xbf16> to vector<1x1x24x24xbf16>
    %191 = vector.shape_cast %190 : vector<1x1x24x24xbf16> to vector<24x24xbf16>
    %cst_69 = arith.constant dense<0.000000e+00> : vector<24x24xf32>
    %192 = tpu.matmul %189, %191, %cst_69 {dimension_numbers = #tpu.dot_dimension_numbers<[1], [0], [0], [1], [0, 0, 1, 1], [], []>} : vector<24x24xbf16>, vector<24x24xbf16>, vector<24x24xf32> -> vector<24x24xf32>
    %193 = arith.addf %188, %192 : vector<24x24xf32>
    %194 = vector.extract_strided_slice %159 {offsets = [12, 0], sizes = [24, 24], strides = [1, 1]} : vector<38x24xbf16> to vector<24x24xbf16>
    %195 = vector.extract_strided_slice %160 {offsets = [2, 0, 0, 0], sizes = [1, 1, 24, 24], strides = [1, 1, 1, 1]} : vector<3x3x24x24xbf16> to vector<1x1x24x24xbf16>
    %196 = vector.shape_cast %195 : vector<1x1x24x24xbf16> to vector<24x24xbf16>
    %cst_70 = arith.constant dense<0.000000e+00> : vector<24x24xf32>
    %197 = tpu.matmul %194, %196, %cst_70 {dimension_numbers = #tpu.dot_dimension_numbers<[1], [0], [0], [1], [0, 0, 1, 1], [], []>} : vector<24x24xbf16>, vector<24x24xbf16>, vector<24x24xf32> -> vector<24x24xf32>
    %198 = arith.addf %193, %197 : vector<24x24xf32>
    %199 = vector.extract_strided_slice %159 {offsets = [13, 0], sizes = [24, 24], strides = [1, 1]} : vector<38x24xbf16> to vector<24x24xbf16>
    %200 = vector.extract_strided_slice %160 {offsets = [2, 1, 0, 0], sizes = [1, 1, 24, 24], strides = [1, 1, 1, 1]} : vector<3x3x24x24xbf16> to vector<1x1x24x24xbf16>
    %201 = vector.shape_cast %200 : vector<1x1x24x24xbf16> to vector<24x24xbf16>
    %cst_71 = arith.constant dense<0.000000e+00> : vector<24x24xf32>
    %202 = tpu.matmul %199, %201, %cst_71 {dimension_numbers = #tpu.dot_dimension_numbers<[1], [0], [0], [1], [0, 0, 1, 1], [], []>} : vector<24x24xbf16>, vector<24x24xbf16>, vector<24x24xf32> -> vector<24x24xf32>
    %203 = arith.addf %198, %202 : vector<24x24xf32>
    %204 = vector.extract_strided_slice %159 {offsets = [14, 0], sizes = [24, 24], strides = [1, 1]} : vector<38x24xbf16> to vector<24x24xbf16>
    %205 = vector.extract_strided_slice %160 {offsets = [2, 2, 0, 0], sizes = [1, 1, 24, 24], strides = [1, 1, 1, 1]} : vector<3x3x24x24xbf16> to vector<1x1x24x24xbf16>
    %206 = vector.shape_cast %205 : vector<1x1x24x24xbf16> to vector<24x24xbf16>
    %cst_72 = arith.constant dense<0.000000e+00> : vector<24x24xf32>
    %207 = tpu.matmul %204, %206, %cst_72 {dimension_numbers = #tpu.dot_dimension_numbers<[1], [0], [0], [1], [0, 0, 1, 1], [], []>} : vector<24x24xbf16>, vector<24x24xbf16>, vector<24x24xf32> -> vector<24x24xf32>
    %208 = arith.addf %203, %207 : vector<24x24xf32>
    %cst_73 = arith.constant 0.000000e+00 : f32
    %209 = vector.broadcast %cst_73 : f32 to vector<24x24xf32>
    %210 = arith.cmpf oge, %208, %209 : vector<24x24xf32>
    %cst_74 = arith.constant 2.000000e-01 : f32
    %211 = vector.broadcast %cst_74 : f32 to vector<24x24xf32>
    %212 = arith.mulf %208, %211 : vector<24x24xf32>
    %213 = arith.select %210, %208, %212 : vector<24x24xi1>, vector<24x24xf32>
    %214 = vector.shape_cast %213 : vector<24x24xf32> to vector<4x6x24xf32>
    %215 = vector.extract_strided_slice %214 {offsets = [0, 0, 0], sizes = [4, 4, 24], strides = [1, 1, 1]} : vector<4x6x24xf32> to vector<4x4x24xf32>
    %c0_75 = arith.constant 0 : index
    %c0_76 = arith.constant 0 : index
    %c0_77 = arith.constant 0 : index
    %c0_78 = arith.constant 0 : index
    %216 = vector.load %arg11[%c0_75, %c0_76, %c0_77, %c0_78] : memref<1x4x4x24xf32, #tpu.memory_space<vmem>>, vector<1x4x4x24xf32>
    %217 = vector.shape_cast %216 : vector<1x4x4x24xf32> to vector<4x4x24xf32>
    %218 = vector.shape_cast %215 : vector<4x4x24xf32> to vector<1x4x4x24xf32>
    tpu.vector_store %arg11[%c0_75, %c0_76, %c0_77, %c0_78], %218 {strides = array<i32>} : memref<1x4x4x24xf32, #tpu.memory_space<vmem>>, vector<1x4x4x24xf32>,
    return
  }
  func.func @transform_0(%arg0: i32) -> (i32, i32, i32, i32) {
    %c0_i32 = arith.constant 0 : i32
    %c0_i32_0 = arith.constant 0 : i32
    %c0_i32_1 = arith.constant 0 : i32
    %c0_i32_2 = arith.constant 0 : i32
    return %arg0, %c0_i32, %c0_i32_0, %c0_i32_1 : i32, i32, i32, i32
  }
  func.func @transform_1(%arg0: i32) -> (i32, i32, i32, i32) {
    %c0_i32 = arith.constant 0 : i32
    %c0_i32_0 = arith.constant 0 : i32
    %c0_i32_1 = arith.constant 0 : i32
    %c0_i32_2 = arith.constant 0 : i32
    return %arg0, %c0_i32, %c0_i32_0, %c0_i32_1 : i32, i32, i32, i32
  }
  func.func @transform_2(%arg0: i32) -> (i32, i32, i32) {
    %c0_i32 = arith.constant 0 : i32
    %c0_i32_0 = arith.constant 0 : i32
    %c0_i32_1 = arith.constant 0 : i32
    %c0_i32_2 = arith.constant 0 : i32
    return %c0_i32, %c0_i32_0, %c0_i32_1 : i32, i32, i32
  }
  func.func @transform_3(%arg0: i32) -> (i32, i32, i32, i32) {
    %c0_i32 = arith.constant 0 : i32
    %c0_i32_0 = arith.constant 0 : i32
    %c0_i32_1 = arith.constant 0 : i32
    %c0_i32_2 = arith.constant 0 : i32
    %c0_i32_3 = arith.constant 0 : i32
    return %c0_i32, %c0_i32_0, %c0_i32_1, %c0_i32_2 : i32, i32, i32, i32
  }
  func.func @transform_4(%arg0: i32) -> (i32, i32) {
    %c0_i32 = arith.constant 0 : i32
    %c0_i32_0 = arith.constant 0 : i32
    %c0_i32_1 = arith.constant 0 : i32
    return %c0_i32, %c0_i32_0 : i32, i32
  }
  func.func @transform_5(%arg0: i32) -> (i32, i32, i32, i32) {
    %c0_i32 = arith.constant 0 : i32
    %c0_i32_0 = arith.constant 0 : i32
    %c0_i32_1 = arith.constant 0 : i32
    %c0_i32_2 = arith.constant 0 : i32
    %c0_i32_3 = arith.constant 0 : i32
    return %c0_i32, %c0_i32_0, %c0_i32_1, %c0_i32_2 : i32, i32, i32, i32
  }
  func.func @transform_6(%arg0: i32) -> (i32, i32, i32, i32) {
    %c0_i32 = arith.constant 0 : i32
    %c0_i32_0 = arith.constant 0 : i32
    %c0_i32_1 = arith.constant 0 : i32
    %c0_i32_2 = arith.constant 0 : i32
    %c0_i32_3 = arith.constant 0 : i32
    return %c0_i32, %c0_i32_0, %c0_i32_1, %c0_i32_2 : i32, i32, i32, i32
  }
  func.func @transform_7(%arg0: i32) -> (i32, i32) {
    %c0_i32 = arith.constant 0 : i32
    %c0_i32_0 = arith.constant 0 : i32
    %c0_i32_1 = arith.constant 0 : i32
    return %c0_i32, %c0_i32_0 : i32, i32
  }
  func.func @transform_8(%arg0: i32) -> (i32, i32, i32, i32) {
    %c0_i32 = arith.constant 0 : i32
    %c0_i32_0 = arith.constant 0 : i32
    %c0_i32_1 = arith.constant 0 : i32
    %c0_i32_2 = arith.constant 0 : i32
    %c0_i32_3 = arith.constant 0 : i32
    return %c0_i32, %c0_i32_0, %c0_i32_1, %c0_i32_2 : i32, i32, i32, i32
  }
  func.func @transform_9(%arg0: i32) -> (i32, i32) {
    %c0_i32 = arith.constant 0 : i32
    %c0_i32_0 = arith.constant 0 : i32
    %c0_i32_1 = arith.constant 0 : i32
    return %c0_i32, %c0_i32_0 : i32, i32
  }
  func.func @transform_10(%arg0: i32) -> (i32, i32, i32, i32) {
    %c0_i32 = arith.constant 0 : i32
    %c0_i32_0 = arith.constant 0 : i32
    %c0_i32_1 = arith.constant 0 : i32
    %c0_i32_2 = arith.constant 0 : i32
    return %arg0, %c0_i32, %c0_i32_0, %c0_i32_1 : i32, i32, i32, i32
  }
}

</mosaic_0001>

<bundles_post_ra>
// kernel: tpu_custom_call.1
= control target key start
LH: loop header
LB: loop body
LE: loop exit
PB: predicated region body
PF: predicated region fallthrough
CT: control target
= control target key end

     0   :  { %15 = vsyncpa [#allocation3], 0  ;;  %s7459_s0 = inlined_call_operand.vmem [shape: f32[2,2,2,80], index: 0, kind: input, shape index: {}]   ;;  %s7460_s1 = inlined_call_operand.vmem [shape: f32[2,4,4,320], index: 1, kind: input, shape index: {}]   ;;  %s7461_s2 = inlined_call_operand.vmem [shape: bf16[4,4,4], index: 2, kind: input, shape index: {}]   ;;  %s7462_s3 = inlined_call_operand.vmem [shape: bf16[1,1,80,48], index: 3, kind: input, shape index: {}]   ;;  %s7463_s4 = inlined_call_operand.vmem [shape: f32[1,48], index: 4, kind: input, shape index: {}]   ;;  %s7464_s5 = inlined_call_operand.vmem [shape: bf16[3,3,48,24], index: 5, kind: input, shape index: {}]   ;;  %s7465_s6 = inlined_call_operand.vmem [shape: bf16[3,3,320,24], index: 6, kind: input, shape index: {}]   ;;  %s7466_s7 = inlined_call_operand.vmem [shape: f32[1,24], index: 7, kind: input, shape index: {}]   ;;  %s7467_s8 = inlined_call_operand.vmem [shape: bf16[3,3,24,24], index: 8, kind: input, shape index: {}]   ;;  %s7468_s9 = inlined_call_operand.vmem [shape: f32[1,24], index: 9, kind: input, shape index: {}]   ;;  %s7469_s10 = inlined_call_operand.hbm [shape: f32[2,4,4,24], index: 10, kind: output, shape index: {}]  }
   0x1   :  { %17 = vsyncpa [#allocation3 + $0x1], 0  ;;  %s5847_s13 = smov 0   ;;  %s5849_s14 = smov 0  }
   0x2   :  { %s5851_s15 = smov 0   ;;  %s5853_s16 = smov 0  }
   0x3 LB: > { %s5868_s17 = sadd.s32 4294967295, %s5787_s16   ;;  %s4497_s18 = sadd.s32 4294967294, %s5787_s16   ;;  %s5787_s16 = sphi %s5853_s16, %s7479_s16   ;;  %s5783_s15 = sphi %s5851_s15, %s7478_s15   ;;  %s5779_s14 = sphi %s5849_s14, %s7477_s14   ;;  %s5775_s13 = sphi %s5847_s13, %s7476_s13  }
   0x4   : > { %s5872_s19 = sadd.s32 1, %s5787_s16   ;;  %s250_s20 = sadd.s32 1, %s5783_s15 }
   0x5   : > { %s247_s21 = ssub.s32 %s5787_s16, %s5872_s19  ;;  %p260_p0 = scmp.ne.s32.totalorder %s5783_s15, %s5779_s14 }
   0x6   : > { %p248_p1 = scmp.eq.s32.totalorder %s247_s21, 0  ;;  %p261_p2 = scmp.eq.s32.totalorder %s5868_s17, 1 }
   0x7   : > { %p266_p3 = scmp.ne.s32.totalorder %s5779_s14, %s5775_s13  ;;  %p267_p4 = scmp.eq.s32.totalorder %s4497_s18, 1 }
   0x8   : > { %s5883_s22 = scalar_select %p248_p1, %s5783_s15, %s250_s20  }
   0x9   : > { %p5885_p5 = por %p261_p2, %p260_p0  ;;  %p5889_p6 = por %p267_p4, %p266_p3 }
   0xa   : > { %p4500_p7 = scmp.ge.s32.totalorder %s5787_s16, 1  ;;  %p325_p8 = scmp.lt.s32.totalorder %s5787_s16, 3 }
   0xc   : > { %p326_p9 = pnand %p4500_p7, %p325_p8 }
   0xd   : > { %p368_p10 = scmp.lt.s32.totalorder (!%p326_p9), %s5868_s17, 1  ;;  %s5675_s11 = sshll.u32 (!%p326_p9), %s5868_s17, 4 }
   0xe   : > { %329 = sbr.rel (%p326_p9) target bundleno = 1040 (0x410), region = 60  ;;  %s4419_s20 = scalar_lea.hbm (!%p326_p9), %s7469_s10, %s5675_s11 }
   0xf   : > { %s4422_s25 = sshll.u32 (!%p326_p9), %s4419_s20, 4  ;;  %s4423_s25 = int_to_ptr.hbm [resolvable:$true] %s4422_s25 }
  0x10   : > { %s5739_s26 = sshra.s32 (!%p326_p9), %s4423_s25, 4  ;;  %s5740_s26 = int_to_ptr.hbm [resolvable:$true] %s5739_s26 }
  0x11   : > { %s5741_s27 = scalar_lea.hbm (!%p326_p9), %s5740_s26, 16  ;;  %p5746_p0 = scmp.lt.s32.totalorder (!%p326_p9), %s5740_s26, %s7469_s10 }
  0x12   : > { %p5742_p11 = scmp.ne.s32.totalorder (!%p326_p9), %s5740_s26, %s5741_s27 }
  0x13   : > { %v5458_v0 = vld [vmem:[%s7462_s3 + $0x20] sm:$0xff]  ;;  %v5457_v1 = vld [vmem:[%s7462_s3 + $0x18] sm:$0xff]  ;;  %s5903_s29 = scalar_select %p368_p10, %s5868_s17, 1  ;;  %v5789_v2 = vmov 0   ;;  %v5456_v3 = vld [vmem:[%s7462_s3 + $0x10] sm:$0xff]  ;;  %vm413_vm0 = vcmask 1040384  }
  0x14   : > { %484 = vmatpush.bf16.msra.mxu0 %v5458_v0  ;;  %438 = vst [vmem:[#allocation1] ss:$4 sm:$0xff] %v5789_v2  ;;  %v5455_v10 = vld [vmem:[%s7462_s3 + $0x8] sm:$0xff]  ;;  %vm414_vm1 = vsmask.f32 256  ;;  %v5454_v17 = vld [vmem:[%s7462_s3] sm:$0xff]  ;;  %p5743_p12 = pnand %p5742_p11, %p5885_p5 }
  0x15   : > { %s5453_s30 = sshll.u32 %s5903_s29, 2  ;;  %446 = vst [vmem:[#allocation1 + $0x3] ss:$4 sm:$0xff] %v5789_v2  ;;  %vm418_vm2 = vcmask 1041408   ;;  %vm419_vm3 = vsmask.f32 1280  ;;  %vm5921_vm4 = vmand %vm413_vm0, %vm414_vm1 }
  0x16   : > { %s372_s18 = scalar_lea.vmem %s7459_s0, %s5453_s30  ;;  %vm420_vm5 = vmand %vm418_vm2, %vm419_vm3  ;;  %vm478_vm6 = vcmask 654336   ;;  %v5722_v28 = vld [vmem:[%s7463_s4] ss:$0 sm:$0xff]  ;;  %vm511_vm7 = vcmask 31744   ;;  %v504_v38 = vld [vmem:[%s7461_s2 + $0x2] sm:$0x3]  ;;  %p5744_p13 = pneg %p5743_p12 }
  0x17   : > { %v379_v4 = vld [vmem:[%s372_s18] sm:$0x3]  ;;  %v380_v5 = vld [vmem:[%s372_s18 + $0x2] sm:$0x3]  ;;  %v505_v44 = vld [vmem:[%s7461_s2 + $0x4] sm:$0x3] }
  0x18   : > { %485 = vmatpush.bf16.msra.mxu0 %v5457_v1  ;;  %v389_v6 = vpack.c.bf16 %v379_v4, %v379_v4  ;;  %v390_v7 = vpack.c.bf16 %v380_v5, %v380_v5  ;;  %v503_v35 = vld [vmem:[%s7461_s2] sm:$0x3]  ;;  %v506_v46 = vld [vmem:[%s7461_s2 + $0x6] sm:$0x3]  ;;  %v5956_v47 = vrot.slane %v5789_v2, 1  ;;  %v5959_v48 = vrot.slane %v5789_v2, 2 }
  0x19   : > { %vm641_vm8 = vcmask 1042432   ;;  %vm642_vm9 = vsmask.f32 2304  ;;  %vm1491_vm11 = vcmask 392192   ;;  %s5679_s12 = smul.u32 48, %s5903_s29  ;;  %vm934_vm12 = vcmask 1041409  }
  0x1a   : > { %v393_v8 = vunpack.c.l.b16 %v389_v6  ;;  %v394_v9 = vunpack.c.l.b16 %v390_v7  ;;  %vm5963_vm10 = vmand %vm641_vm8, %vm642_vm9  ;;  %vm936_vm13 = vcmask 1042433   ;;  %vm940_vm14 = vcmask 1042434   ;;  %v3951_v60 = vld [vmem:[%s7467_s8 + $0x5c] sm:$0xf] }
  0x1b   : > { %s6032_s28 = scalar_lea.vmem %s7460_s1, %s5679_s12  ;;  %vm1576_vm15 = vcmask 1046528   ;;  %vm1625_vm1 = vcmask 1044480   ;;  %vm1727_vm8 = vcmask 1043456   ;;  %vm2057_vm9 = vcmask 523264   ;;  %s5745_s12 = scalar_lea.hbm %s7469_s10, 32 }
  0x1c   : > { %486 = vmatpush.bf16.msra.mxu0 %v5456_v3  ;;  %v395_v11 = vpack.c.b16 %v393_v8, %v393_v8  ;;  %v396_v12 = vpack.c.b16 %v394_v9, %v394_v9  ;;  %v5461_v9 = vld [vmem:[%s7464_s5 + $0x10] sm:$0xff]  ;;  %p5747_p1 = scmp.lt.s32.totalorder %s5745_s12, %s5741_s27 }
  0x1e   : > { %v398_v13 = vshrl.u32 %v395_v11, 16  ;;  %v401_v14 = vshll.u32 %v395_v11, 16  ;;  %v405_v15 = vshrl.u32 %v396_v12, 16  ;;  %v408_v16 = vshll.u32 %v396_v12, 16  ;;  %p5748_p2 = por %p5747_p1, %p5746_p0 }
  0x20   : > { %487 = vmatpush.bf16.msra.mxu0 %v5455_v10  ;;  %v400_v18 = vrot.slane %v398_v13, 7  ;;  %v407_v19 = vrot.slane %v405_v15, 7  ;;  %p5749_p3 = pnand %p5748_p2, %p5744_p13 }
  0x22   : > { %v403_v21 = vor.u32 %v401_v14, %v400_v18  ;;  %v410_v22 = vor.u32 %v408_v16, %v407_v19 }
  0x24   : > { %488 = vmatpush.bf16.msra.mxu0 %v5454_v17  ;;  %v416_v23 = vsel %vm5921_vm4, 0, %v403_v21  ;;  %v417_v24 = vsel %vm5921_vm4, 0, %v410_v22  ;;  %v5460_v17 = vld [vmem:[%s7464_s5 + $0x8] sm:$0xff] }
  0x25   : > { %v421_v25 = vsel %vm420_vm5, %v416_v23, 0  ;;  %v422_v26 = vsel %vm420_vm5, %v417_v24, 0  ;;  %vm942_vm5 = vcmask 1043458  }
  0x26   : > { %441 = vst [vmem:[#allocation1 + $0x1] ss:$4 sm:$0xff] %v421_v25 }
  0x27   : > { %444 = vst [vmem:[#allocation1 + $0x2] ss:$4 sm:$0xff] %v422_v26 }
  0x2e   : > { %v447_v27 = vld.sshfl [vmem:[#allocation1] sm:$0xff pattern:$0x73625140] }
  0x2f   : > { %4525 = vmatmul.msk.bf16.vlgmr.msra.gmra.mxu0 %vm478_vm6, %v447_v27  ;;  %663 = vst [vmem:[#allocation1] ss:$9 sm:$0xff] %v5789_v2  ;;  %vm1674_vm6 = vsmask.f32 4352 }
  0x30   : > { %666 = vst [vmem:[#allocation1 + $0x1] ss:$9 sm:$0xff] %v5956_v47 }
  0x31   : > { %669 = vst [vmem:[#allocation1 + $0x2] ss:$9 sm:$0xff] %v5959_v48 }
  0xac   : > { %v490_v29 = vpop.f32.mrf.mxu0 }
  0xad   : > { %v495_v30 = vadd.f32 %v5722_v28, %v490_v29  ;;  %v5459_v29 = vld [vmem:[%s7464_s5] sm:$0xff] }
  0xaf   : > { %v507_v31 = vpack.c.bf16 %v495_v30, %v495_v30  ;;  %v499_v32 = vrot.slane %v495_v30, 4 }
  0xb1   : > { %v517_v33 = vsel %vm418_vm2, %v507_v31, 0  ;;  %v508_v34 = vpack.c.bf16 %v499_v32, %v499_v32 }
  0xb2   : > { %526 = vmatpush.bf16.msra.mxu1 %v517_v33 }
  0xb3   : > { %v536_v36 = vsel %vm418_vm2, %v508_v34, 0  ;;  %v5467_v34 = vld [vmem:[%s7464_s5 + $0x40] sm:$0xff] }
  0xb4   : > { %v492_v37 = vpop.f32.mrf.mxu0  ;;  %545 = vmatpush.bf16.msra.mxu2 %v536_v36  ;;  %1609 = vmatpush.bf16.msrb.mxu0 %v5467_v34 }
  0xb5   : > { %v496_v39 = vadd.f32 %v5722_v28, %v492_v37  ;;  %4526 = vmatmul.msk.bf16.vlgmr.msra.gmra.mxu1 %vm511_vm7, %v503_v35  ;;  %v5470_v35 = vld [vmem:[%s7464_s5 + $0x58] sm:$0xff] }
  0xb7   : > { %4527 = vmatmul.msk.bf16.vlgmr.msra.gmra.mxu2 %vm511_vm7, %v504_v38  ;;  %v509_v40 = vpack.c.bf16 %v496_v39, %v496_v39  ;;  %v500_v41 = vrot.slane %v496_v39, 4 }
  0xb8   : > { %1501 = vmatpush.bf16.msrb.mxu2 %v5461_v9 }
  0xb9   : > { %v555_v42 = vsel %vm418_vm2, %v509_v40, 0  ;;  %v510_v43 = vpack.c.bf16 %v500_v41, %v500_v41  ;;  %v5466_v40 = vld [vmem:[%s7464_s5 + $0x38] sm:$0xff]  ;;  %v5469_v41 = vld [vmem:[%s7464_s5 + $0x50] sm:$0xff] }
  0xba   : > { %564 = vmatpush.bf16.msra.mxu3 %v555_v42  ;;  %1610 = vmatpush.bf16.msrb.mxu0 %v5466_v40 }
  0xbb   : > { %v574_v45 = vsel %vm418_vm2, %v510_v43, 0 }
  0xbc   : > { %583 = vmatpush.bf16.msrb.mxu1 %v574_v45  ;;  %1502 = vmatpush.bf16.msrb.mxu2 %v5460_v17 }
  0xbd   : > { %4528 = vmatmul.msk.bf16.vlgmr.msra.gmra.mxu3 %vm511_vm7, %v505_v44  ;;  %v5473_v44 = vld [vmem:[%s7464_s5 + $0x70] sm:$0xff] }
  0xbe   : > { %5676 = vmatpush.bf16.msrb.mxu3 %v5461_v9 }
  0xc0   : > { %1503 = vmatpush.bf16.msrb.mxu2 %v5459_v29  ;;  %1658 = vmatpush.bf16.msra.mxu1 %v5470_v35 }
  0xc2   : > { %5677 = vmatpush.bf16.msrb.mxu3 %v5460_v17 }
  0xc4   : > { %1659 = vmatpush.bf16.msra.mxu1 %v5469_v41  ;;  %1711 = vmatpush.bf16.msra.mxu2 %v5473_v44 }
  0xc5   : > { %4529 = vmatmul.msk.bf16.vlgmr.msrb.gmra.mxu1 %vm511_vm7, %v506_v46  ;;  %vm1517_vm7 = vsmask.f32 7424 }
  0xc6   : > { %5678 = vmatpush.bf16.msrb.mxu3 %v5459_v29  ;;  %v387_v29 = vld [vmem:[%s6032_s28 + $0x24] sm:$0xff] }
 0x132   : > { %v528_v49 = vpop.f32.mrf.mxu1 }
 0x133   : > { %v589_v50 = vpack.c.bf16 %v528_v49, %v528_v49 }
 0x135   : > { %v597_v51 = vunpack.c.l.b16 %v589_v50  ;;  %v5465_v50 = vld [vmem:[%s7464_s5 + $0x30] sm:$0xff] }
 0x136   : > { %1611 = vmatpush.bf16.msrb.mxu0 %v5465_v50 }
 0x137   : > { %v601_v52 = vpack.c.b16 %v597_v51, %v597_v51  ;;  %v5468_v51 = vld [vmem:[%s7464_s5 + $0x48] sm:$0xff] }
 0x138   : > { %1660 = vmatpush.bf16.msra.mxu1 %v5468_v51 }
 0x139   : > { %v606_v53 = vshrl.u32 %v601_v52, 16  ;;  %v609_v57 = vshll.u32 %v601_v52, 16 }
 0x13a   : > { %v530_v54 = vpop.f32.mrf.mxu1  ;;  %v547_v55 = vpop.f32.mrf.mxu2 }
 0x13b   : > { %v608_v56 = vrot.slane %v606_v53, 7  ;;  %v590_v58 = vpack.c.bf16 %v547_v55, %v547_v55  ;;  %v5472_v53 = vld [vmem:[%s7464_s5 + $0x68] sm:$0xff]  ;;  %v5471_v55 = vld [vmem:[%s7464_s5 + $0x60] sm:$0xff] }
 0x13c   : > { %1712 = vmatpush.bf16.msra.mxu2 %v5472_v53  ;;  %v5464_v54 = vld [vmem:[%s7464_s5 + $0x28] sm:$0xff] }
 0x13d   : > { %v611_v59 = vor.u32 %v609_v57, %v608_v56  ;;  %v598_v61 = vunpack.c.l.b16 %v590_v58  ;;  %v919_v56 = vrot.slane %v5789_v2, 7  ;;  %1560 = vmatpush.bf16.msra.mxu3 %v5464_v54  ;;  %v385_v54 = vld [vmem:[%s6032_s28 + $0x18] sm:$0xff] }
 0x13f   : > { %v637_v62 = vsel %vm5921_vm4, 0, %v611_v59  ;;  %v602_v63 = vpack.c.b16 %v598_v61, %v598_v61  ;;  %v5463_v59 = vld [vmem:[%s7464_s5 + $0x20] sm:$0xff]  ;;  %v6044_v61 = vrot.slane %v5789_v2, 6 }
 0x140   : > { %v644_v0 = vsel %vm5963_vm10, %v637_v62, 0  ;;  %v566_v1 = vpop.f32.mrf.mxu3  ;;  %1713 = vmatpush.bf16.msra.mxu2 %v5471_v55  ;;  %v935_v62 = vsel %vm934_vm12, 0, %v919_v56 }
 0x141   : > { %v655_v3 = vrot.slane %v644_v0, 1  ;;  %v656_v4 = vrot.slane %v644_v0, 2  ;;  %672 = vst [vmem:[#allocation1 + $0x3] ss:$9 sm:$0xff] %v644_v0  ;;  %v613_v5 = vshrl.u32 %v602_v63, 16  ;;  %v591_v6 = vpack.c.bf16 %v566_v1, %v566_v1  ;;  %1561 = vmatpush.bf16.msra.mxu3 %v5463_v59 }
 0x142   : > { %v549_v7 = vpop.f32.mrf.mxu2  ;;  %v585_v8 = vpop.f32.mrf.mxu1  ;;  %v616_v11 = vshll.u32 %v602_v63, 16  ;;  %v382_v63 = vld [vmem:[%s6032_s28 + $0x8] sm:$0xf] }
 0x143   : > { %675 = vst [vmem:[#allocation1 + $0x4] ss:$9 sm:$0xff] %v655_v3  ;;  %v615_v10 = vrot.slane %v613_v5, 7  ;;  %v592_v12 = vpack.c.bf16 %v585_v8, %v585_v8  ;;  %v599_v13 = vunpack.c.l.b16 %v591_v6  ;;  %v383_v3 = vld [vmem:[%s6032_s28 + $0xc] sm:$0xff] }
 0x144   : > { %678 = vst [vmem:[#allocation1 + $0x5] ss:$9 sm:$0xff] %v656_v4 }
 0x145   : > { %v618_v14 = vor.u32 %v616_v11, %v615_v10  ;;  %v600_v15 = vunpack.c.l.b16 %v592_v12  ;;  %v603_v16 = vpack.c.b16 %v599_v13, %v599_v13  ;;  %v941_v11 = vsel %vm940_vm14, 0, %v919_v56  ;;  %v384_v12 = vld [vmem:[%s6032_s28 + $0x14] sm:$0xf]  ;;  %v5462_v13 = vld [vmem:[%s7464_s5 + $0x18] sm:$0xff] }
 0x146   : > { %1562 = vmatpush.bf16.msra.mxu3 %v5462_v13 }
 0x147   : > { %v638_v18 = vsel %vm5921_vm4, 0, %v618_v14  ;;  %v604_v19 = vpack.c.b16 %v600_v15, %v600_v15  ;;  %v620_v22 = vshrl.u32 %v603_v16, 16  ;;  %v623_v23 = vshll.u32 %v603_v16, 16 }
 0x148   : > { %v645_v21 = vsel %vm5963_vm10, %v638_v18, 0  ;;  %v568_v24 = vpop.f32.mrf.mxu3  ;;  %v6082_v18 = vsel %vm936_vm13, %v935_v62, %v6044_v61 }
 0x149   : > { %v657_v25 = vrot.slane %v645_v21, 1  ;;  %681 = vst [vmem:[#allocation1 + $0x6] ss:$9 sm:$0xff] %v645_v21  ;;  %v627_v26 = vshrl.u32 %v604_v19, 16  ;;  %v622_v27 = vrot.slane %v620_v22, 7  ;;  %v630_v31 = vshll.u32 %v604_v19, 16 }
 0x14a   : > { %v587_v28 = vpop.f32.mrf.mxu1  ;;  %v658_v38 = vrot.slane %v645_v21, 2  ;;  %v6088_v19 = vsel %vm942_vm5, %v941_v11, %v6044_v61 }
 0x14b   : > { %684 = vst [vmem:[#allocation1 + $0x7] ss:$9 sm:$0xff] %v657_v25  ;;  %v629_v30 = vrot.slane %v627_v26, 7  ;;  %v625_v32 = vor.u32 %v623_v23, %v622_v27  ;;  %v381_v23 = vld [vmem:[%s6032_s28] sm:$0xff]  ;;  %v931_v25 = vsel %vm413_vm0, 0, %v919_v56  ;;  %v939_v26 = vrot.slane %v6082_v18, 1 }
 0x14c   : > { %v945_v27 = vrot.slane %v6088_v19, 2  ;;  %v386_v28 = vld [vmem:[%s6032_s28 + $0x20] sm:$0xf] }
 0x14d   : > { %v632_v33 = vor.u32 %v630_v31, %v629_v30  ;;  %v639_v36 = vsel %vm5921_vm4, 0, %v625_v32  ;;  %v388_v30 = vld [vmem:[%s6032_s28 + $0x2c] sm:$0xf]  ;;  %v5538_v18 = vld [vmem:[%s7465_s6 + $0x1a0] sm:$0xff]  ;;  %s365_s28 = sand.u32 1, %s5779_s14  }
 0x14e   : > { %v646_v39 = vsel %vm5963_vm10, %v639_v36, 0  ;;  %s4501_s29 = sshll.u32 %s365_s28, 4  ;;  %s4408_s17 = scalar_lea.sflag [#allocation3], %s365_s28 }
 0x14f   : > { %v640_v37 = vsel %vm5921_vm4, 0, %v632_v33  ;;  %v659_v45 = vrot.slane %v646_v39, 1  ;;  %v660_v46 = vrot.slane %v646_v39, 2  ;;  %s367_s30 = scalar_lea.vmem [#allocation2], %s4501_s29 }
 0x150   : > { %v647_v43 = vsel %vm5963_vm10, %v640_v37, 0  ;;  %s4420_s21 = sshll.u32 %s367_s30, 4  ;;  %s4421_s21 = int_to_ptr.vmem [resolvable:$true] %s4420_s21 }
 0x151   : > { %v661_v49 = vrot.slane %v647_v43, 1  ;;  %v662_v52 = vrot.slane %v647_v43, 2 }
 0x152   : > { %v6002_v42 = vld [vmem:[#allocation1] sm:$0xff] }
 0x153   : > { %688 = vst [vmem:[#allocation1] ss:$9 sm:$0xff] %v658_v38  ;;  %4542 = vmatmul.msk.bf16.vlgmr.msrb.gmra.mxu2 %vm1491_vm11, %v6002_v42  ;;  %v6035_v57 = vshrl.u32 %v6002_v42, 16  ;;  %v6038_v58 = vshll.u32 %v6002_v42, 16  ;;  %v1577_v0 = vrot.slane %v6002_v42, 1  ;;  %v1626_v1 = vrot.slane %v6002_v42, 3 }
 0x154   : > { %701 = vst [vmem:[#allocation1 + $0x7] ss:$9 sm:$0xff] %v5789_v2  ;;  %v1777_v33 = vrot.slane %v6002_v42, 6  ;;  %v1728_v53 = vrot.slane %v6002_v42, 4 }
 0x155   : > { %690 = vst [vmem:[#allocation1 + $0x1] ss:$9 sm:$0xff] %v646_v39  ;;  %v1675_v5 = vrot.slane %v6035_v57, 3  ;;  %v1676_v6 = vrot.slane %v6038_v58, 4  ;;  %v1522_v32 = vrot.slane %v6038_v58, 1  ;;  %v1827_v34 = vrot.slane %v6035_v57, 6 }
 0x156   : > { %692 = vst [vmem:[#allocation1 + $0x2] ss:$9 sm:$0xff] %v659_v45 }
 0x157   : > { %694 = vst [vmem:[#allocation1 + $0x3] ss:$9 sm:$0xff] %v660_v46  ;;  %v1677_v21 = vor.u32 %v1676_v6, %v1675_v5  ;;  %v5482_v46 = vld [vmem:[%s7464_s5 + $0xb8] sm:$0xff]  ;;  %v1523_v51 = vor.u32 %v1522_v32, %v6035_v57  ;;  %v6138_v5 = vsel %vm418_vm2, %v931_v25, %v6044_v61 }
 0x158   : > { %696 = vst [vmem:[#allocation1 + $0x4] ss:$9 sm:$0xff] %v647_v43  ;;  %v5479_v43 = vld [vmem:[%s7464_s5 + $0xa0] sm:$0xff]  ;;  %1871 = vmatpush.bf16.msrb.mxu1 %v5482_v46  ;;  %v5480_v46 = vld [vmem:[%s7464_s5 + $0xa8] sm:$0xff] }
 0x159   : > { %698 = vst [vmem:[#allocation1 + $0x5] ss:$9 sm:$0xff] %v661_v49  ;;  %v1828_v49 = vrot.slane %v6038_v58, 7  ;;  %1811 = vmatpush.bf16.msra.mxu0 %v5479_v43 }
 0x15a   : > { %700 = vst [vmem:[#allocation1 + $0x6] ss:$9 sm:$0xff] %v662_v52  ;;  %v1887_v52 = vrot.slane %v6002_v42, 7  ;;  %v5509_v42 = vld [vmem:[%s7465_s6 + $0xb8] sm:$0xff] }
 0x15b   : > { %v1829_v13 = vor.u32 %v1828_v49, %v1827_v34  ;;  %v5484_v49 = vld [vmem:[%s7464_s5 + $0xc8] sm:$0xff] }
 0x161   : > { %v6051_v4 = vld [vmem:[#allocation1] sm:$0xff] }
 0x162   : > { %704 = vst [vmem:[#allocation1] ss:$9 sm:$0xff] %v5956_v47  ;;  %4543 = vmatmul.msk.bf16.vlgmr.msrb.gmra.mxu3 %vm1491_vm11, %v6051_v4  ;;  %v1578_v7 = vrot.slane %v6051_v4, 1  ;;  %v1627_v8 = vrot.slane %v6051_v4, 3  ;;  %v6061_v9 = vshll.u32 %v6051_v4, 16  ;;  %v6064_v10 = vshrl.u32 %v6051_v4, 16 }
 0x163   : > { %705 = vst [vmem:[#allocation1 + $0x1] ss:$9 sm:$0xff] %v5959_v48  ;;  %v1778_v59 = vrot.slane %v6051_v4, 6 }
 0x164   : > { %718 = vst [vmem:[#allocation1 + $0x10] ss:$2 sm:$0xff] %v382_v63  ;;  %v1579_v14 = vsel %vm1576_vm15, %v1577_v0, %v1578_v7  ;;  %v1628_v15 = vsel %vm1625_vm1, %v1626_v1, %v1627_v8  ;;  %v1678_v16 = vrot.slane %v6064_v10, 3  ;;  %v1679_v17 = vrot.slane %v6061_v9, 4  ;;  %v5478_v63 = vld [vmem:[%s7464_s5 + $0x98] sm:$0xff]  ;;  %v5481_v0 = vld [vmem:[%s7464_s5 + $0xb0] sm:$0xff] }
 0x165   : > { %723 = vst [vmem:[#allocation1 + $0x20] ss:$2 sm:$0xff] %v383_v3  ;;  %4570 = vmatmul.msk.bf16.vlgmr.msrb.gmra.mxu0 %vm1491_vm11, %v1579_v14  ;;  %4584 = vmatmul.msk.bf16.vlgmr.msra.gmra.mxu1 %vm1491_vm11, %v1628_v15  ;;  %v1526_v36 = vrot.slane %v6061_v9, 1  ;;  %v1830_v1 = vrot.slane %v6064_v10, 6  ;;  %v1831_v3 = vrot.slane %v6061_v9, 7  ;;  %v5485_v15 = vld [vmem:[%s7464_s5 + $0xd0] sm:$0xff] }
 0x166   : > { %725 = vst [vmem:[#allocation1 + $0x30] ss:$2 sm:$0xff] %v384_v12  ;;  %v6090_v22 = vor.u32 %v1679_v17, %v1678_v16  ;;  %1812 = vmatpush.bf16.msra.mxu0 %v5478_v63  ;;  %v1888_v16 = vrot.slane %v6051_v4, 7  ;;  %v1729_v17 = vrot.slane %v6051_v4, 4  ;;  %1872 = vmatpush.bf16.msrb.mxu1 %v5481_v0  ;;  %v5486_v4 = vld [vmem:[%s7465_s6] sm:$0xff] }
 0x167   : > { %v1527_v57 = vsel %vm1517_vm7, %v1523_v51, %v1526_v36  ;;  %1921 = vmatpush.bf16.msrb.mxu2 %v5485_v15  ;;  %v5483_v15 = vld [vmem:[%s7464_s5 + $0xc0] sm:$0xff] }
 0x168   : > { %v1681_v24 = vsel %vm1674_vm6, %v1677_v21, %v6090_v22 }
 0x169   : > { %4598 = vmatmul.msk.bf16.vlgmr.msra.gmra.mxu2 %vm1491_vm11, %v1681_v24 }
 0x16a   : > { %v706_v31 = vld [vmem:[#allocation1] sm:$0xff]  ;;  %1873 = vmatpush.bf16.msrb.mxu1 %v5480_v46 }
 0x16b   : > { %716 = vst [vmem:[#allocation1] ss:$2 sm:$0xff] %v381_v23  ;;  %v721_v35 = vld.sshfl [vmem:[#allocation1 + $0x10] sm:$0xff pattern:$0x75316420]  ;;  %v6121_v62 = vsel %vm418_vm2, %v706_v31, 0  ;;  %1922 = vmatpush.bf16.msrb.mxu2 %v5484_v49 }
 0x16c   : > { %v726_v37 = vld.sshfl [vmem:[#allocation1 + $0x20] sm:$0xff pattern:$0x75316420]  ;;  %v727_v38 = vld.sshfl [vmem:[#allocation1 + $0x28] sm:$0xff pattern:$0x75316420]  ;;  %v752_v39 = vpack.c.bf16 %v721_v35, %v721_v35  ;;  %v6158_v35 = vor.u32 %v1831_v3, %v1830_v1 }
 0x16d   : > { %v728_v40 = vld.sshfl [vmem:[#allocation1 + $0x30] sm:$0xff pattern:$0x75316420]  ;;  %730 = vst [vmem:[#allocation1 + $0x10] ss:$2 sm:$0xff] %v386_v28  ;;  %v753_v41 = vpack.c.bf16 %v727_v38, %v726_v37  ;;  %v1780_v61 = vrot.slane %v6121_v62, 6 }
 0x16e   : > { %734 = vst [vmem:[#allocation1 + $0x20] ss:$2 sm:$0xff] %v387_v29  ;;  %v754_v44 = vpack.c.bf16 %v728_v40, %v728_v40  ;;  %v769_v45 = vunpack.c.l.b16 %v752_v39  ;;  %v1834_v28 = vshrl.u32 %v6121_v62, 16  ;;  %v5501_v1 = vld [vmem:[%s7465_s6 + $0x78] sm:$0xff] }
 0x16f   : > { %735 = vst [vmem:[#allocation1 + $0x30] ss:$2 sm:$0xff] %v388_v30  ;;  %v770_v50 = vunpack.c.l.b16 %v753_v41  ;;  %v771_v55 = vunpack.c.h.b16 %v753_v41  ;;  %v1837_v41 = vshll.u32 %v6121_v62, 16  ;;  %1923 = vmatpush.bf16.msrb.mxu2 %v5483_v15 }
 0x170   : > { %v6117_v56 = vpack.c.b16 %v769_v45, %v769_v45  ;;  %v772_v12 = vunpack.c.l.b16 %v754_v44 }
 0x171   : > { %v6123_v58 = vpack.c.b16 %v770_v50, %v770_v50  ;;  %v6147_v23 = vpack.c.b16 %v771_v55, %v771_v55 }
 0x172   : > { %v719_v6 = vld.sshfl [vmem:[#allocation1] sm:$0xff pattern:$0x75316420]  ;;  %v720_v11 = vld.sshfl [vmem:[#allocation1 + $0x8] sm:$0xff pattern:$0x75316420]  ;;  %4556 = vmatmul.msk.bf16.vlgmr.msra.gmra.mxu3 %vm1491_vm11, %v1527_v57  ;;  %v6160_v39 = vpack.c.b16 %v772_v12, %v772_v12  ;;  %v6200_v12 = vsel %vm413_vm0, %v1887_v52, %v1888_v16 }
 0x173   : > { %729 = vst [vmem:[#allocation1] ss:$2 sm:$0xff] %v385_v54  ;;  %v751_v14 = vpack.c.bf16 %v720_v11, %v719_v6  ;;  %v806_v24 = vshrl.u32 %v6117_v56, 16  ;;  %v813_v25 = vshrl.u32 %v6123_v58, 16  ;;  %v809_v40 = vshll.u32 %v6117_v56, 16 }
 0x174   : > { %v733_v21 = vld.sshfl [vmem:[#allocation1 + $0x10] sm:$0xff pattern:$0x75316420]  ;;  %v816_v54 = vshll.u32 %v6123_v58, 16  ;;  %v820_v55 = vshrl.u32 %v6147_v23, 16  ;;  %v823_v0 = vshll.u32 %v6147_v23, 16  ;;  %v1530_v58 = vor.u32 %v6064_v10, %v1526_v36 }
 0x175   : > { %v736_v29 = vld.sshfl [vmem:[#allocation1 + $0x20] sm:$0xff pattern:$0x75316420]  ;;  %v737_v30 = vld.sshfl [vmem:[#allocation1 + $0x28] sm:$0xff pattern:$0x75316420]  ;;  %v756_v31 = vpack.c.bf16 %v733_v21, %v733_v21  ;;  %v767_v32 = vunpack.c.l.b16 %v751_v14  ;;  %v768_v34 = vunpack.c.h.b16 %v751_v14  ;;  %4571 = vmatmul.msk.bf16.gmra.mxu0 %vm1491_vm11, %v1578_v7  ;;  %4585 = vmatmul.msk.bf16.gmra.mxu1 %vm1491_vm11, %v1627_v8 }
 0x176   : > { %v738_v37 = vld.sshfl [vmem:[#allocation1 + $0x30] sm:$0xff pattern:$0x75316420]  ;;  %v757_v38 = vpack.c.bf16 %v737_v30, %v736_v29  ;;  %v808_v57 = vrot.slane %v806_v24, 7  ;;  %v815_v63 = vrot.slane %v813_v25, 7  ;;  %v5476_v36 = vld [vmem:[%s7464_s5 + $0x88] sm:$0xff] }
 0x177   : > { %v758_v43 = vpack.c.bf16 %v738_v37, %v738_v37  ;;  %v775_v44 = vunpack.c.l.b16 %v756_v31  ;;  %v6164_v45 = vpack.c.b16 %v767_v32, %v767_v32  ;;  %v780_v7 = vpack.c.b16 %v768_v34, %v768_v34  ;;  %v5477_v8 = vld [vmem:[%s7464_s5 + $0x90] sm:$0xff]  ;;  %1760 = vmatpush.bf16.msrb.mxu3 %v5476_v36 }
 0x178   : > { %v776_v50 = vunpack.c.l.b16 %v757_v38  ;;  %v777_v51 = vunpack.c.h.b16 %v757_v38  ;;  %1813 = vmatpush.bf16.msra.mxu0 %v5477_v8  ;;  %v827_v23 = vshrl.u32 %v6160_v39, 16  ;;  %v5500_v31 = vld [vmem:[%s7465_s6 + $0x70] sm:$0xff]  ;;  %v6227_v34 = vor.u32 %v809_v40, %v808_v57 }
 0x179   : > { %v6177_v56 = vpack.c.b16 %v775_v44, %v775_v44  ;;  %4599 = vmatmul.msk.bf16.gmra.mxu2 %vm1491_vm11, %v6090_v22  ;;  %v778_v11 = vunpack.c.l.b16 %v758_v43  ;;  %v6193_v22 = vsel %vm418_vm2, %v1777_v33, %v1778_v59  ;;  %v792_v9 = vshrl.u32 %v6164_v45, 16  ;;  %v5475_v43 = vld [vmem:[%s7464_s5 + $0x80] sm:$0xff]  ;;  %v5513_v44 = vld [vmem:[%s7465_s6 + $0xd8] sm:$0xff] }
 0x17a   : > { %v731_v3 = vld.sshfl [vmem:[#allocation1] sm:$0xff pattern:$0x75316420]  ;;  %v732_v6 = vld.sshfl [vmem:[#allocation1 + $0x8] sm:$0xff pattern:$0x75316420]  ;;  %v1833_v33 = vsel %vm419_vm3, %v1829_v13, %v6158_v35  ;;  %v6212_v52 = vpack.c.b16 %v776_v50, %v776_v50  ;;  %v6214_v21 = vpack.c.b16 %v777_v51, %v777_v51  ;;  %v6229_v37 = vor.u32 %v816_v54, %v815_v63  ;;  %2288 = vmatpush.bf16.msra.mxu2 %v5513_v44 }
 0x17b   : > { %v755_v14 = vpack.c.bf16 %v732_v6, %v731_v3  ;;  %v799_v10 = vshrl.u32 %v780_v7, 16  ;;  %998 = vst [vmem:[#allocation1] ss:$9 sm:$0xff] %v6138_v5  ;;  %v848_v24 = vshrl.u32 %v6177_v56, 16  ;;  %v822_v13 = vrot.slane %v820_v55, 7  ;;  %1761 = vmatpush.bf16.msrb.mxu3 %v5475_v43  ;;  %v5499_v6 = vld [vmem:[%s7465_s6 + $0x68] sm:$0xff] }
 0x17c   : > { %2080 = vmatpush.bf16.msrb.mxu0 %v5501_v1  ;;  %1001 = vst [vmem:[#allocation1 + $0x1] ss:$9 sm:$0xff] %v939_v26  ;;  %v6225_v32 = vpack.c.b16 %v778_v11, %v778_v11  ;;  %v829_v38 = vrot.slane %v827_v23, 7  ;;  %v794_v49 = vrot.slane %v792_v9, 7  ;;  %v802_v50 = vshll.u32 %v780_v7, 16  ;;  %v5512_v9 = vld [vmem:[%s7465_s6 + $0xd0] sm:$0xff] }
 0x17d   : > { %v773_v25 = vunpack.c.l.b16 %v755_v14  ;;  %v774_v29 = vunpack.c.h.b16 %v755_v14  ;;  %v801_v30 = vrot.slane %v799_v10, 7  ;;  %1004 = vst [vmem:[#allocation1 + $0x2] ss:$9 sm:$0xff] %v945_v27  ;;  %v830_v40 = vshll.u32 %v6160_v39, 16 }
 0x17e   : > { %v850_v51 = vrot.slane %v848_v24, 7  ;;  %v855_v54 = vshrl.u32 %v6212_v52, 16  ;;  %v862_v55 = vshrl.u32 %v6214_v21, 16  ;;  %v795_v57 = vshll.u32 %v6164_v45, 16  ;;  %v5474_v45 = vld [vmem:[%s7464_s5 + $0x78] sm:$0xff]  ;;  %2289 = vmatpush.bf16.msra.mxu2 %v5512_v9 }
 0x17f   : > { %v785_v8 = vpack.c.b16 %v773_v25, %v773_v25  ;;  %v786_v46 = vpack.c.b16 %v774_v29, %v774_v29  ;;  %v804_v63 = vor.u32 %v802_v50, %v801_v30  ;;  %v825_v7 = vor.u32 %v823_v0, %v822_v13  ;;  %1762 = vmatpush.bf16.msrb.mxu3 %v5474_v45 }
 0x180   : > { %2081 = vmatpush.bf16.msrb.mxu0 %v5500_v31  ;;  %v832_v11 = vor.u32 %v830_v40, %v829_v38  ;;  %v851_v39 = vshll.u32 %v6177_v56, 16  ;;  %v869_v14 = vshrl.u32 %v6225_v32, 16  ;;  %v864_v23 = vrot.slane %v862_v55, 7  ;;  %v5498_v31 = vld [vmem:[%s7465_s6 + $0x60] sm:$0xff] }
 0x181   : > { %v834_v1 = vshrl.u32 %v785_v8, 16  ;;  %v841_v3 = vshrl.u32 %v786_v46, 16  ;;  %v844_v15 = vshll.u32 %v786_v46, 16  ;;  %v797_v0 = vor.u32 %v795_v57, %v794_v49 }
 0x182   : > { %4557 = vmatmul.msk.bf16.gmra.mxu3 %vm1491_vm11, %v1530_v58  ;;  %v837_v24 = vshll.u32 %v785_v8, 16  ;;  %v6253_v56 = vor.u32 %v851_v39, %v850_v51  ;;  %v857_v25 = vrot.slane %v855_v54, 7  ;;  %v865_v29 = vshll.u32 %v6214_v21, 16 }
 0x183   : > { %v836_v10 = vrot.slane %v834_v1, 7  ;;  %v843_v36 = vrot.slane %v841_v3, 7  ;;  %v871_v30 = vrot.slane %v869_v14, 7  ;;  %v888_v13 = vsel %vm5921_vm4, 0, %v804_v63 }
 0x184   : > { %2082 = vmatpush.bf16.msrb.mxu0 %v5499_v6  ;;  %v889_v43 = vsel %vm5921_vm4, 0, %v6227_v34  ;;  %v891_v21 = vsel %vm5921_vm4, 0, %v825_v7  ;;  %v892_v44 = vsel %vm5921_vm4, 0, %v832_v11  ;;  %v858_v8 = vshll.u32 %v6212_v52, 16  ;;  %v5505_v11 = vld [vmem:[%s7465_s6 + $0x98] sm:$0xff] }
 0x185   : > { %v846_v58 = vor.u32 %v844_v15, %v843_v36  ;;  %4626 = vmatmul.msk.bf16.vlgmr.msra.gmra.mxu0 %vm1491_vm11, %v6193_v22  ;;  %4640 = vmatmul.msk.bf16.vlgmr.msrb.gmra.mxu1 %vm1491_vm11, %v1833_v33  ;;  %v6264_v38 = vor.u32 %v837_v24, %v836_v10  ;;  %v5493_v22 = vld [vmem:[%s7465_s6 + $0x38] sm:$0xff]  ;;  %v5511_v33 = vld [vmem:[%s7465_s6 + $0xc8] sm:$0xff]  ;;  %v867_v46 = vor.u32 %v865_v29, %v864_v23  ;;  %v6282_v34 = vrot.slane %v1834_v28, 6  ;;  %v5492_v10 = vld [vmem:[%s7465_s6 + $0x30] sm:$0xff] }
 0x186   : > { %v6286_v49 = vrot.slane %v1837_v41, 7  ;;  %v872_v50 = vshll.u32 %v6225_v32, 16  ;;  %v887_v40 = vsel %vm5921_vm4, 0, %v797_v0  ;;  %v890_v51 = vsel %vm5921_vm4, 0, %v6229_v37  ;;  %2062 = vmatpush.bf16.msra.mxu3 %v5493_v22  ;;  %2290 = vmatpush.bf16.msra.mxu2 %v5511_v33  ;;  %v5510_v36 = vld [vmem:[%s7465_s6 + $0xc0] sm:$0xff]  ;;  %v5504_v33 = vld [vmem:[%s7465_s6 + $0x90] sm:$0xff] }
 0x187   : > { %v900_v52 = vsel %vm5963_vm10, %v888_v13, 0  ;;  %v894_v28 = vsel %vm5921_vm4, 0, %v846_v58  ;;  %v901_v41 = vsel %vm5963_vm10, %v889_v43, 0  ;;  %v903_v32 = vsel %vm5963_vm10, %v891_v21, 0  ;;  %2102 = vmatpush.bf16.msra.mxu1 %v5505_v11 }
 0x188   : > { %2083 = vmatpush.bf16.msrb.mxu0 %v5498_v31  ;;  %v904_v54 = vsel %vm5963_vm10, %v892_v44, 0  ;;  %v6306_v37 = vor.u32 %v858_v8, %v857_v25  ;;  %v874_v55 = vor.u32 %v872_v50, %v871_v30  ;;  %v893_v57 = vsel %vm5921_vm4, 0, %v6264_v38  ;;  %v5491_v8 = vld [vmem:[%s7465_s6 + $0x28] sm:$0xff] }
 0x189   : > { %4654 = vmatmul.msk.bf16.vlgmr.msrb.gmra.mxu2 %vm1491_vm11, %v6200_v12  ;;  %v895_v63 = vsel %vm5921_vm4, 0, %v6253_v56  ;;  %v897_v1 = vsel %vm5921_vm4, 0, %v867_v46  ;;  %v921_v3 = vrot.slane %v900_v52, 7  ;;  %v923_v6 = vrot.slane %v903_v32, 7  ;;  %v5497_v12 = vld [vmem:[%s7465_s6 + $0x58] sm:$0xff]  ;;  %v5496_v56 = vld [vmem:[%s7465_s6 + $0x50] sm:$0xff] }
 0x18a   : > { %v924_v7 = vrot.slane %v904_v54, 6  ;;  %v899_v39 = vsel %vm5963_vm10, %v887_v40, 0  ;;  %v902_v14 = vsel %vm5963_vm10, %v890_v51, 0  ;;  %v906_v45 = vsel %vm5963_vm10, %v894_v28, 0  ;;  %2063 = vmatpush.bf16.msra.mxu3 %v5492_v10  ;;  %2291 = vmatpush.bf16.msra.mxu2 %v5510_v36  ;;  %v5489_v10 = vld [vmem:[%s7465_s6 + $0x18] sm:$0xff] }
 0x18b   : > { %v922_v9 = vrot.slane %v901_v41, 6  ;;  %v948_v15 = vsel %vm413_vm0, %v899_v39, %v921_v3  ;;  %v951_v23 = vsel %vm934_vm12, %v899_v39, %v921_v3  ;;  %v955_v0 = vsel %vm940_vm14, %v899_v39, %v921_v3  ;;  %2103 = vmatpush.bf16.msra.mxu1 %v5504_v33  ;;  %v5494_v3 = vld [vmem:[%s7465_s6 + $0x40] sm:$0xff] }
 0x18c   : > { %v961_v24 = vsel %vm413_vm0, %v902_v14, %v923_v6  ;;  %2084 = vmatpush.bf16.msrb.mxu0 %v5497_v12  ;;  %v925_v13 = vrot.slane %v906_v45, 7  ;;  %v964_v43 = vsel %vm934_vm12, %v902_v14, %v923_v6  ;;  %v898_v21 = vsel %vm5921_vm4, 0, %v874_v55 }
 0x18d   : > { %v950_v25 = vsel %vm418_vm2, %v948_v15, %v922_v9  ;;  %v952_v58 = vsel %vm936_vm13, %v951_v23, %v922_v9  ;;  %v956_v29 = vsel %vm942_vm5, %v955_v0, %v922_v9  ;;  %v963_v30 = vsel %vm418_vm2, %v961_v24, %v924_v7  ;;  %v5502_v9 = vld [vmem:[%s7465_s6 + $0x80] sm:$0xff]  ;;  %v5533_v0 = vld [vmem:[%s7465_s6 + $0x178] sm:$0xff] }
 0x18e   : > { %v954_v31 = vrot.slane %v952_v58, 1  ;;  %v958_v38 = vrot.slane %v956_v29, 2  ;;  %1006 = vst [vmem:[#allocation1 + $0x3] ss:$9 sm:$0xff] %v950_v25  ;;  %v965_v44 = vsel %vm936_vm13, %v964_v43, %v924_v7  ;;  %v1840_v22 = vor.u32 %v6286_v49, %v6282_v34  ;;  %2064 = vmatpush.bf16.msra.mxu3 %v5491_v8  ;;  %2292 = vmatpush.bf16.msra.mxu2 %v5509_v42  ;;  %v5532_v43 = vld [vmem:[%s7465_s6 + $0x170] sm:$0xff] }
 0x18f   : > { %1014 = vst [vmem:[#allocation1 + $0x6] ss:$9 sm:$0xff] %v963_v30  ;;  %v907_v46 = vsel %vm5963_vm10, %v895_v63, 0  ;;  %v909_v50 = vsel %vm5963_vm10, %v897_v1, 0  ;;  %v967_v40 = vrot.slane %v965_v44, 1  ;;  %v1730_v34 = vsel %vm1727_vm8, %v1728_v53, %v1729_v17  ;;  %v5495_v53 = vld [vmem:[%s7465_s6 + $0x48] sm:$0xff] }
 0x190   : > { %1009 = vst [vmem:[#allocation1 + $0x4] ss:$9 sm:$0xff] %v954_v31  ;;  %2085 = vmatpush.bf16.msrb.mxu0 %v5496_v56  ;;  %v905_v49 = vsel %vm5963_vm10, %v893_v57, 0  ;;  %v1781_v51 = vsel %vm418_vm2, %v1778_v59, %v1780_v61  ;;  %v1890_v52 = vrot.slane %v6121_v62, 7  ;;  %v896_v28 = vsel %vm5921_vm4, 0, %v6306_v37  ;;  %v5503_v37 = vld [vmem:[%s7465_s6 + $0x88] sm:$0xff] }
 0x191   : > { %1012 = vst [vmem:[#allocation1 + $0x5] ss:$9 sm:$0xff] %v958_v38  ;;  %v910_v41 = vsel %vm5963_vm10, %v898_v21, 0  ;;  %v968_v32 = vsel %vm940_vm14, %v902_v14, %v923_v6  ;;  %v977_v59 = vsel %vm934_vm12, %v905_v49, %v925_v13  ;;  %v926_v62 = vrot.slane %v907_v46, 6  ;;  %v5490_v57 = vld [vmem:[%s7465_s6 + $0x20] sm:$0xff]  ;;  %2104 = vmatpush.bf16.msra.mxu1 %v5503_v37  ;;  %v5488_v38 = vld [vmem:[%s7465_s6 + $0x10] sm:$0xff] }
 0x192   : > { %4612 = vmatmul.msk.bf16.vlgmr.msrb.gmra.mxu3 %vm1491_vm11, %v1730_v34  ;;  %1017 = vst [vmem:[#allocation1 + $0x7] ss:$9 sm:$0xff] %v967_v40  ;;  %v927_v61 = vrot.slane %v909_v50, 7  ;;  %v981_v54 = vsel %vm940_vm14, %v905_v49, %v925_v13  ;;  %v1841_v55 = vsel %vm419_vm3, %v6158_v35, %v1840_v22  ;;  %v969_v63 = vsel %vm942_vm5, %v968_v32, %v924_v7  ;;  %v5508_v35 = vld [vmem:[%s7465_s6 + $0xb0] sm:$0xff]  ;;  %v5525_v7 = vld [vmem:[%s7465_s6 + $0x138] sm:$0xff]  ;;  %v5506_v22 = vld [vmem:[%s7465_s6 + $0xa0] sm:$0xff] }
 0x193   : > { %v978_v1 = vsel %vm936_vm13, %v977_v59, %v926_v62  ;;  %v908_v6 = vsel %vm5963_vm10, %v896_v28, 0  ;;  %v928_v12 = vrot.slane %v910_v41, 6  ;;  %v982_v11 = vsel %vm942_vm5, %v981_v54, %v926_v62  ;;  %2065 = vmatpush.bf16.msra.mxu3 %v5490_v57  ;;  %2293 = vmatpush.bf16.msra.mxu2 %v5508_v35  ;;  %v5541_v50 = vld [vmem:[%s7465_s6 + $0x1b8] sm:$0xff]  ;;  %v5524_v40 = vld [vmem:[%s7465_s6 + $0x130] sm:$0xff]  ;;  %v5487_v34 = vld [vmem:[%s7465_s6 + $0x8] sm:$0xff] }
 0x194   : > { %2086 = vmatpush.bf16.msrb.mxu0 %v5495_v53  ;;  %v974_v39 = vsel %vm413_vm0, %v905_v49, %v925_v13  ;;  %v990_v14 = vsel %vm934_vm12, %v908_v6, %v927_v61  ;;  %v1891_v45 = vsel %vm413_vm0, %v1888_v16, %v1890_v52  ;;  %v971_v36 = vrot.slane %v969_v63, 2  ;;  %v5507_v16 = vld [vmem:[%s7465_s6 + $0xa8] sm:$0xff]  ;;  %v5530_v57 = vld [vmem:[%s7465_s6 + $0x160] sm:$0xff] }
 0x195   : > { %4627 = vmatmul.msk.bf16.gmra.mxu0 %vm1491_vm11, %v1781_v51  ;;  %4641 = vmatmul.msk.bf16.gmra.mxu1 %vm1491_vm11, %v1841_v55  ;;  %v980_v15 = vrot.slane %v978_v1, 1  ;;  %v994_v23 = vsel %vm940_vm14, %v908_v6, %v927_v61  ;;  %v984_v24 = vrot.slane %v982_v11, 2  ;;  %v976_v29 = vsel %vm418_vm2, %v974_v39, %v926_v62  ;;  %v5531_v49 = vld [vmem:[%s7465_s6 + $0x168] sm:$0xff]  ;;  %v5521_v62 = vld [vmem:[%s7465_s6 + $0x118] sm:$0xff]  ;;  %v5522_v63 = vld [vmem:[%s7465_s6 + $0x120] sm:$0xff] }
 0x196   : > { %v987_v30 = vsel %vm413_vm0, %v908_v6, %v927_v61  ;;  %v991_v13 = vsel %vm936_vm13, %v990_v14, %v928_v12  ;;  %v995_v31 = vsel %vm942_vm5, %v994_v23, %v928_v12  ;;  %2105 = vmatpush.bf16.msra.mxu1 %v5502_v9  ;;  %v5523_v53 = vld [vmem:[%s7465_s6 + $0x128] sm:$0xff]  ;;  %v5553_v6 = vld [vmem:[%s7465_s6 + $0x218] sm:$0xff]  ;;  %vm3968_vm14 = vcmask 195584  }
 0x197   : > { %2066 = vmatpush.bf16.msra.mxu3 %v5489_v10  ;;  %v989_v21 = vsel %vm418_vm2, %v987_v30, %v928_v12  ;;  %v993_v44 = vrot.slane %v991_v13, 1  ;;  %2294 = vmatpush.bf16.msra.mxu2 %v5507_v16  ;;  %v997_v8 = vrot.slane %v995_v31, 2  ;;  %v5519_v16 = vld [vmem:[%s7465_s6 + $0x108] sm:$0xff]  ;;  %v5518_v13 = vld [vmem:[%s7465_s6 + $0x100] sm:$0xff] }
 0x198   : > { %2087 = vmatpush.bf16.msrb.mxu0 %v5494_v3  ;;  %v5539_v3 = vld [vmem:[%s7465_s6 + $0x1a8] sm:$0xff] }
 0x199   : > { %4655 = vmatmul.msk.bf16.gmra.mxu2 %vm1491_vm11, %v1891_v45  ;;  %v6432_v56 = vld [vmem:[#allocation1] sm:$0xff]  ;;  %v6434_v25 = vld [vmem:[#allocation1 + $0x9] sm:$0xff]  ;;  %v6436_v58 = vld [vmem:[#allocation1 + $0x12] sm:$0xff] }
 0x19a   : > { %1025 = vst [vmem:[#allocation1] ss:$9 sm:$0xff] %v971_v36  ;;  %2484 = vmatpush.bf16.msrb.mxu1 %v5533_v0  ;;  %v6453_v33 = vshrl.u32 %v6432_v56, 16  ;;  %v2121_v46 = vshll.u32 %v6432_v56, 16  ;;  %v6469_v51 = vshrl.u32 %v6436_v58, 16  ;;  %v6472_v52 = vshrl.u32 %v6434_v25, 16 }
 0x19b   : > { %1026 = vst [vmem:[#allocation1 + $0x1] ss:$9 sm:$0xff] %v976_v29  ;;  %2067 = vmatpush.bf16.msra.mxu3 %v5488_v38  ;;  %v6475_v42 = vshll.u32 %v6434_v25, 16  ;;  %2295 = vmatpush.bf16.msra.mxu2 %v5506_v22  ;;  %v6485_v28 = vshll.u32 %v6436_v58, 16  ;;  %v5529_v36 = vld [vmem:[%s7465_s6 + $0x158] sm:$0xff]  ;;  %v5552_v0 = vld [vmem:[%s7465_s6 + $0x210] sm:$0xff] }
 0x19c   : > { %2328 = vmatpush.bf16.msra.mxu0 %v5525_v7  ;;  %1028 = vst [vmem:[#allocation1 + $0x2] ss:$9 sm:$0xff] %v980_v15  ;;  %v2737_v41 = vrot.slane %v6453_v33, 3  ;;  %v2738_v32 = vrot.slane %v2121_v46, 4  ;;  %v3347_v59 = vrot.slane %v2121_v46, 7  ;;  %v3353_v54 = vrot.slane %v6472_v52, 6 }
 0x19d   : > { %1030 = vst [vmem:[#allocation1 + $0x3] ss:$9 sm:$0xff] %v984_v24  ;;  %v3354_v55 = vrot.slane %v6475_v42, 7  ;;  %v3360_v37 = vrot.slane %v6469_v51, 6  ;;  %v3361_v35 = vrot.slane %v6485_v28, 7  ;;  %v2123_v11 = vrot.slane %v2121_v46, 1 }
 0x19e   : > { %1031 = vst [vmem:[#allocation1 + $0x4] ss:$9 sm:$0xff] %v989_v21  ;;  %2485 = vmatpush.bf16.msrb.mxu1 %v5532_v43  ;;  %v6501_v61 = vor.u32 %v2738_v32, %v2737_v41  ;;  %v5520_v7 = vld [vmem:[%s7465_s6 + $0x110] sm:$0xff]  ;;  %v5537_v24 = vld [vmem:[%s7465_s6 + $0x198] sm:$0xff]  ;;  %v5527_v30 = vld [vmem:[%s7465_s6 + $0x148] sm:$0xff] }
 0x19f   : > { %1033 = vst [vmem:[#allocation1 + $0x5] ss:$9 sm:$0xff] %v993_v44  ;;  %2502 = vmatpush.bf16.msrb.mxu2 %v5541_v50  ;;  %2068 = vmatpush.bf16.msra.mxu3 %v5487_v34  ;;  %v6521_v12 = vor.u32 %v3354_v55, %v3353_v54  ;;  %v6526_v39 = vor.u32 %v3361_v35, %v3360_v37  ;;  %v5551_v38 = vld [vmem:[%s7465_s6 + $0x208] sm:$0xff]  ;;  %v5536_v44 = vld [vmem:[%s7465_s6 + $0x190] sm:$0xff]  ;;  %v5526_v50 = vld [vmem:[%s7465_s6 + $0x140] sm:$0xff] }
 0x1a0   : > { %1035 = vst [vmem:[#allocation1 + $0x6] ss:$9 sm:$0xff] %v997_v8  ;;  %2329 = vmatpush.bf16.msra.mxu0 %v5524_v40  ;;  %v2124_v15 = vor.u32 %v2123_v11, %v6453_v33  ;;  %v5517_v40 = vld [vmem:[%s7465_s6 + $0xf8] sm:$0xff]  ;;  %v5535_v32 = vld [vmem:[%s7465_s6 + $0x188] sm:$0xff]  ;;  %v5560_v55 = vld [vmem:[%s7465_s6 + $0x250] sm:$0xff] }
 0x1a1   : > { %1036 = vst [vmem:[#allocation1 + $0x7] ss:$9 sm:$0xff] %v6138_v5  ;;  %v5540_v5 = vld [vmem:[%s7465_s6 + $0x1b0] sm:$0xff] }
 0x1a2   : > { %4613 = vmatmul.msk.bf16.gmra.mxu3 %vm1491_vm11, %v1729_v17  ;;  %v3346_v17 = vrot.slane %v6453_v33, 6  ;;  %2486 = vmatpush.bf16.msrb.mxu1 %v5531_v49  ;;  %v5561_v49 = vld [vmem:[%s7465_s6 + $0x258] sm:$0xff] }
 0x1a3   : > { %2503 = vmatpush.bf16.msrb.mxu2 %v5540_v5  ;;  %2069 = vmatpush.bf16.msra.mxu3 %v5486_v4 }
 0x1a4   : > { %2330 = vmatpush.bf16.msra.mxu0 %v5523_v53  ;;  %v6512_v1 = vor.u32 %v3347_v59, %v3346_v17  ;;  %v5550_v53 = vld [vmem:[%s7465_s6 + $0x200] sm:$0xff] }
 0x1a5   : > { %2088 = vmatmul.bf16.vlgmr.msrb.gmra.mxu0 %v6434_v25  ;;  %4736 = vmatmul.msk.bf16.vlgmr.msra.gmra.mxu1 %vm2057_vm9, %v6436_v58 }
 0x1a6   : > { %2487 = vmatpush.bf16.msrb.mxu1 %v5530_v57  ;;  %v5534_v57 = vld [vmem:[%s7465_s6 + $0x180] sm:$0xff] }
 0x1a7   : > { %2306 = vmatpush.bf16.msrb.mxu3 %v5521_v62  ;;  %2504 = vmatpush.bf16.msrb.mxu2 %v5539_v3  ;;  %v5516_v62 = vld [vmem:[%s7465_s6 + $0xf0] sm:$0xff] }
 0x1a8   : > { %v6528_v14 = vld [vmem:[#allocation1] sm:$0xff]  ;;  %v6530_v45 = vld [vmem:[#allocation1 + $0x9] sm:$0xff]  ;;  %v6532_v9 = vld [vmem:[#allocation1 + $0x12] sm:$0xff]  ;;  %2331 = vmatpush.bf16.msra.mxu0 %v5522_v63 }
 0x1a9   : > { %1043 = vst [vmem:[#allocation1] ss:$9 sm:$0xff] %v939_v26  ;;  %v6537_v10 = vshll.u32 %v6528_v14, 16  ;;  %v2149_v26 = vshrl.u32 %v6528_v14, 16  ;;  %v6571_v31 = vshrl.u32 %v6530_v45, 16  ;;  %v6577_v43 = vshrl.u32 %v6532_v9, 16 }
 0x1aa   : > { %1044 = vst [vmem:[#allocation1 + $0x1] ss:$9 sm:$0xff] %v945_v27  ;;  %2488 = vmatpush.bf16.msrb.mxu1 %v5529_v36  ;;  %v5528_v27 = vld [vmem:[%s7465_s6 + $0x150] sm:$0xff]  ;;  %v6584_v22 = vshll.u32 %v6532_v9, 16  ;;  %v6587_v33 = vshll.u32 %v6530_v45, 16  ;;  %v5549_v63 = vld [vmem:[%s7465_s6 + $0x1f8] sm:$0xff] }
 0x1ab   : > { %v2127_v23 = vrot.slane %v6537_v10, 1  ;;  %2307 = vmatpush.bf16.msrb.mxu3 %v5520_v7  ;;  %2505 = vmatpush.bf16.msrb.mxu2 %v5538_v18  ;;  %v2740_v29 = vrot.slane %v2149_v26, 3  ;;  %v2741_v21 = vrot.slane %v6537_v10, 4  ;;  %v3349_v46 = vrot.slane %v2149_v26, 6 }
 0x1ac   : > { %2680 = vmatpush.bf16.msrb.mxu0 %v5553_v6  ;;  %v3356_v34 = vrot.slane %v6571_v31, 6  ;;  %v3363_v41 = vrot.slane %v6577_v43, 6  ;;  %v3350_v4 = vrot.slane %v6537_v10, 7  ;;  %v3357_v17 = vrot.slane %v6587_v33, 7  ;;  %v5565_v10 = vld [vmem:[%s7465_s6 + $0x278] sm:$0xff] }
 0x1ad   : > { %v2128_v19 = vsel %vm1517_vm7, %v2124_v15, %v2127_v23  ;;  %v6592_v8 = vor.u32 %v2741_v21, %v2740_v29  ;;  %v3364_v59 = vrot.slane %v6584_v22, 7  ;;  %v2151_v6 = vor.u32 %v2149_v26, %v2127_v23  ;;  %v5548_v15 = vld [vmem:[%s7465_s6 + $0x1f0] sm:$0xff]  ;;  %v5547_v29 = vld [vmem:[%s7465_s6 + $0x1e8] sm:$0xff]  ;;  %v5546_v21 = vld [vmem:[%s7465_s6 + $0x1e0] sm:$0xff] }
 0x1ae   : > { %2296 = vmatmul.bf16.vlgmr.msra.gmra.mxu2 %v2128_v19  ;;  %2489 = vmatpush.bf16.msrb.mxu1 %v5528_v27  ;;  %v6622_v54 = vor.u32 %v3350_v4, %v3349_v46  ;;  %v2143_v7 = vrot.slane %v6485_v28, 1  ;;  %v2346_v36 = vrot.slane %v6528_v14, 1  ;;  %v2345_v18 = vrot.slane %v6432_v56, 1  ;;  %v5564_v26 = vld [vmem:[%s7465_s6 + $0x270] sm:$0xff]  ;;  %v5558_v19 = vld [vmem:[%s7465_s6 + $0x240] sm:$0xff] }
 0x1af   : > { %2308 = vmatpush.bf16.msrb.mxu3 %v5519_v16  ;;  %2506 = vmatpush.bf16.msrb.mxu2 %v5537_v24  ;;  %v6611_v5 = vsel %vm1674_vm6, %v6501_v61, %v6592_v8  ;;  %v6624_v61 = vor.u32 %v3357_v17, %v3356_v34  ;;  %v6629_v37 = vor.u32 %v3364_v59, %v3363_v41  ;;  %v5514_v16 = vld [vmem:[%s7465_s6 + $0xe0] sm:$0xff]  ;;  %v5545_v24 = vld [vmem:[%s7465_s6 + $0x1d8] sm:$0xff]  ;;  %v2349_v46 = vrot.slane %v6530_v45, 1  ;;  %v5556_v34 = vld [vmem:[%s7465_s6 + $0x230] sm:$0xff] }
 0x1b0   : > { %2681 = vmatpush.bf16.msrb.mxu0 %v5552_v0  ;;  %v6640_v35 = vsel %vm419_vm3, %v6512_v1, %v6622_v54  ;;  %v5515_v1 = vld [vmem:[%s7465_s6 + $0xe8] sm:$0xff]  ;;  %v2144_v23 = vor.u32 %v2143_v7, %v6469_v51  ;;  %v2347_v0 = vsel %vm1576_vm15, %v2345_v18, %v2346_v36  ;;  %v2137_v41 = vrot.slane %v6587_v33, 1  ;;  %v5580_v59 = vld [vmem:[%s7465_s6 + $0x2f0] sm:$0xff]  ;;  %v5577_v18 = vld [vmem:[%s7465_s6 + $0x2d8] sm:$0xff] }
 0x1b1   : > { %v6645_v3 = vsel %vm419_vm3, %v6521_v12, %v6624_v61  ;;  %v6650_v11 = vsel %vm419_vm3, %v6526_v39, %v6629_v37  ;;  %v5559_v12 = vld [vmem:[%s7465_s6 + $0x248] sm:$0xff]  ;;  %v2147_v39 = vrot.slane %v6584_v22, 1 }
 0x1b2   : > { %2070 = vmatmul.bf16.vlgmr.msra.gmra.mxu3 %v6432_v56  ;;  %2490 = vmatpush.bf16.msrb.mxu1 %v5527_v30  ;;  %v5563_v30 = vld [vmem:[%s7465_s6 + $0x268] sm:$0xff] }
 0x1b3   : > { %2309 = vmatpush.bf16.msrb.mxu3 %v5518_v13  ;;  %2507 = vmatpush.bf16.msrb.mxu2 %v5536_v44  ;;  %v2148_v27 = vsel %vm1517_vm7, %v2144_v23, %v2147_v39  ;;  %v5557_v13 = vld [vmem:[%s7465_s6 + $0x238] sm:$0xff]  ;;  %v5555_v17 = vld [vmem:[%s7465_s6 + $0x228] sm:$0xff]  ;;  %v2157_v7 = vor.u32 %v6577_v43, %v2147_v39 }
 0x1b4   : > { %2682 = vmatpush.bf16.msrb.mxu0 %v5551_v38  ;;  %v5544_v38 = vld [vmem:[%s7465_s6 + $0x1d0] sm:$0xff]  ;;  %v5581_v44 = vld [vmem:[%s7465_s6 + $0x2f8] sm:$0xff]  ;;  %v5591_v39 = vld [vmem:[%s7465_s6 + $0x348] sm:$0xff] }
 0x1b5   : > { %2093 = vmatmul.bf16.gmra.mxu0 %v6530_v45  ;;  %4737 = vmatmul.msk.bf16.gmra.mxu1 %vm2057_vm9, %v6532_v9  ;;  %v5585_v23 = vld [vmem:[%s7465_s6 + $0x318] sm:$0xff] }
 0x1b6   : > { %2491 = vmatpush.bf16.msrb.mxu1 %v5526_v50  ;;  %v5562_v50 = vld [vmem:[%s7465_s6 + $0x260] sm:$0xff] }
 0x1b7   : > { %2310 = vmatpush.bf16.msrb.mxu3 %v5517_v40  ;;  %2508 = vmatpush.bf16.msrb.mxu2 %v5535_v32  ;;  %v2133_v40 = vrot.slane %v6475_v42, 1 }
 0x1b8   : > { %2683 = vmatpush.bf16.msrb.mxu0 %v5550_v53  ;;  %v5543_v53 = vld [vmem:[%s7465_s6 + $0x1c8] sm:$0xff] }
 0x1b9   : > { %v2134_v4 = vor.u32 %v2133_v40, %v6472_v52  ;;  %v5583_v40 = vld [vmem:[%s7465_s6 + $0x308] sm:$0xff] }
 0x1ba   : > { %2698 = vmatpush.bf16.msra.mxu1 %v5561_v49  ;;  %v2348_v49 = vrot.slane %v6434_v25, 1 }
 0x1bb   : > { %2311 = vmatpush.bf16.msrb.mxu3 %v5516_v62  ;;  %2509 = vmatpush.bf16.msrb.mxu2 %v5534_v57  ;;  %v5593_v62 = vld [vmem:[%s7465_s6 + $0x358] sm:$0xff]  ;;  %v2138_v57 = vsel %vm1517_vm7, %v2134_v4, %v2137_v41  ;;  %v5574_v4 = vld [vmem:[%s7465_s6 + $0x2c0] sm:$0xff] }
 0x1bc   : > { %2684 = vmatpush.bf16.msrb.mxu0 %v5549_v63  ;;  %v2350_v32 = vsel %vm1576_vm15, %v2348_v49, %v2349_v46  ;;  %v5579_v63 = vld [vmem:[%s7465_s6 + $0x2e8] sm:$0xff]  ;;  %v5588_v49 = vld [vmem:[%s7465_s6 + $0x330] sm:$0xff] }
 0x1be   : > { %2301 = vmatmul.bf16.gmra.mxu2 %v2151_v6  ;;  %2699 = vmatpush.bf16.msra.mxu1 %v5560_v55  ;;  %v5542_v55 = vld [vmem:[%s7465_s6 + $0x1c0] sm:$0xff]  ;;  %v5592_v6 = vld [vmem:[%s7465_s6 + $0x350] sm:$0xff] }
 0x1bf   : > { %2720 = vmatpush.bf16.msra.mxu2 %v5565_v10  ;;  %2312 = vmatpush.bf16.msrb.mxu3 %v5515_v1  ;;  %v5554_v1 = vld [vmem:[%s7465_s6 + $0x220] sm:$0xff] }
 0x1c0   : > { %2685 = vmatpush.bf16.msrb.mxu0 %v5548_v15  ;;  %v5578_v10 = vld [vmem:[%s7465_s6 + $0x2e0] sm:$0xff] }
 0x1c2   : > { %2075 = vmatmul.bf16.gmra.mxu3 %v6528_v14  ;;  %2700 = vmatpush.bf16.msra.mxu1 %v5559_v12  ;;  %v5573_v12 = vld [vmem:[%s7465_s6 + $0x2b8] sm:$0xff] }
 0x1c3   : > { %2721 = vmatpush.bf16.msra.mxu2 %v5564_v26  ;;  %2313 = vmatpush.bf16.msrb.mxu3 %v5514_v16  ;;  %v5590_v26 = vld [vmem:[%s7465_s6 + $0x340] sm:$0xff]  ;;  %v5576_v16 = vld [vmem:[%s7465_s6 + $0x2d0] sm:$0xff] }
 0x1c4   : > { %2686 = vmatpush.bf16.msrb.mxu0 %v5547_v29  ;;  %v2545_v29 = vrot.slane %v6530_v45, 3 }
 0x1c5   : > { %4818 = vmatmul.msk.bf16.vlgmr.msra.gmra.mxu0 %vm2057_vm9, %v2148_v27  ;;  %2492 = vmatmul.bf16.vlgmr.msrb.gmra.mxu1 %v2347_v0  ;;  %v5571_v27 = vld [vmem:[%s7465_s6 + $0x2a8] sm:$0xff]  ;;  %v2154_v0 = vor.u32 %v6571_v31, %v2137_v41 }
 0x1c6   : > { %2701 = vmatpush.bf16.msra.mxu1 %v5558_v19  ;;  %v5584_v19 = vld [vmem:[%s7465_s6 + $0x310] sm:$0xff] }
 0x1c7   : > { %2524 = vmatpush.bf16.msra.mxu3 %v5545_v24  ;;  %2722 = vmatpush.bf16.msra.mxu2 %v5563_v30  ;;  %v2542_v24 = vrot.slane %v6528_v14, 3  ;;  %v5589_v30 = vld [vmem:[%s7465_s6 + $0x338] sm:$0xff] }
 0x1c8   : > { %2687 = vmatpush.bf16.msrb.mxu0 %v5546_v21 }
 0x1ca   : > { %2702 = vmatpush.bf16.msra.mxu1 %v5557_v13 }
 0x1cb   : > { %2525 = vmatpush.bf16.msra.mxu3 %v5544_v38  ;;  %2723 = vmatpush.bf16.msra.mxu2 %v5562_v50  ;;  %v5575_v50 = vld [vmem:[%s7465_s6 + $0x2c8] sm:$0xff] }
 0x1cc   : > { %2906 = vmatpush.bf16.msra.mxu0 %v5581_v44  ;;  %v2541_v44 = vrot.slane %v6432_v56, 3 }
 0x1ce   : > { %2510 = vmatmul.bf16.vlgmr.msrb.gmra.mxu2 %v2350_v32  ;;  %2703 = vmatpush.bf16.msra.mxu1 %v5556_v34  ;;  %v5570_v34 = vld [vmem:[%s7465_s6 + $0x2a0] sm:$0xff] }
 0x1cf   : > { %2526 = vmatpush.bf16.msra.mxu3 %v5543_v53  ;;  %3084 = vmatpush.bf16.msrb.mxu2 %v5593_v62  ;;  %v2543_v53 = vsel %vm1625_vm1, %v2541_v44, %v2542_v24  ;;  %v5587_v62 = vld [vmem:[%s7465_s6 + $0x328] sm:$0xff] }
 0x1d0   : > { %2907 = vmatpush.bf16.msra.mxu0 %v5580_v59  ;;  %v5569_v59 = vld [vmem:[%s7465_s6 + $0x298] sm:$0xff] }
 0x1d2   : > { %2314 = vmatmul.bf16.vlgmr.msrb.gmra.mxu3 %v2138_v57  ;;  %2704 = vmatpush.bf16.msra.mxu1 %v5555_v17  ;;  %v5582_v17 = vld [vmem:[%s7465_s6 + $0x300] sm:$0xff] }
 0x1d3   : > { %2527 = vmatpush.bf16.msra.mxu3 %v5542_v55  ;;  %3085 = vmatpush.bf16.msrb.mxu2 %v5592_v6  ;;  %v5613_v55 = vld [vmem:[%s7465_s6 + $0x3f8] sm:$0xff]  ;;  %v2548_v6 = vrot.slane %v6532_v9, 3 }
 0x1d4   : > { %2908 = vmatpush.bf16.msra.mxu0 %v5579_v63 }
 0x1d5   : > { %4819 = vmatmul.msk.bf16.gmra.mxu0 %vm2057_vm9, %v2157_v7  ;;  %2497 = vmatmul.bf16.gmra.mxu1 %v2346_v36  ;;  %v5572_v36 = vld [vmem:[%s7465_s6 + $0x2b0] sm:$0xff] }
 0x1d6   : > { %v6755_v15 = vpop.f32.mrf.mxu2  ;;  %2705 = vmatpush.bf16.msra.mxu1 %v5554_v1  ;;  %v5568_v7 = vld [vmem:[%s7465_s6 + $0x290] sm:$0xff]  ;;  %v2547_v1 = vrot.slane %v6436_v58, 3 }
 0x1d7   : > { %2888 = vmatpush.bf16.msrb.mxu3 %v5573_v12  ;;  %3086 = vmatpush.bf16.msrb.mxu2 %v5591_v39 }
 0x1d8   : > { %2909 = vmatpush.bf16.msra.mxu0 %v5578_v10  ;;  %v5586_v10 = vld [vmem:[%s7465_s6 + $0x320] sm:$0xff] }
 0x1da   : > { %2928 = vmatpush.bf16.msrb.mxu1 %v5585_v23  ;;  %v2352_v23 = vrot.slane %v6532_v9, 1 }
 0x1db   : > { %2889 = vmatpush.bf16.msrb.mxu3 %v5572_v36  ;;  %3087 = vmatpush.bf16.msrb.mxu2 %v5590_v26  ;;  %v2549_v36 = vsel %vm1625_vm1, %v2547_v1, %v2548_v6  ;;  %v5612_v26 = vld [vmem:[%s7465_s6 + $0x3f0] sm:$0xff] }
 0x1dc   : > { %2910 = vmatpush.bf16.msra.mxu0 %v5577_v18  ;;  %v2351_v18 = vrot.slane %v6436_v58, 1  ;;  %v5600_v1 = vld [vmem:[%s7465_s6 + $0x390] sm:$0xff] }
 0x1de   : > { %2515 = vmatmul.bf16.gmra.mxu2 %v2349_v46  ;;  %v6784_v13 = vpop.f32.mrf.mxu2  ;;  %2929 = vmatpush.bf16.msrb.mxu1 %v5584_v19  ;;  %v2544_v46 = vrot.slane %v6434_v25, 3  ;;  %v5621_v19 = vld [vmem:[%s7465_s6 + $0x438] sm:$0xff] }
 0x1df   : > { %2890 = vmatpush.bf16.msrb.mxu3 %v5571_v27  ;;  %3088 = vmatpush.bf16.msrb.mxu2 %v5589_v30  ;;  %v6857_v27 = vld [vmem:[%s7466_s7] ss:$0 sm:$0xff] }
 0x1e0   : > { %2911 = vmatpush.bf16.msra.mxu0 %v5576_v16  ;;  %v2546_v41 = vsel %vm1625_vm1, %v2544_v46, %v2545_v29  ;;  %v5567_v16 = vld [vmem:[%s7465_s6 + $0x288] sm:$0xff] }
 0x1e1   : > { %v5611_v46 = vld [vmem:[%s7465_s6 + $0x3e8] sm:$0xff] }
 0x1e2   : > { %v6786_v38 = vpop.f32.mrf.mxu0  ;;  %v6788_v21 = vpop.f32.mrf.mxu1  ;;  %2319 = vmatmul.bf16.gmra.mxu3 %v2154_v0  ;;  %2930 = vmatpush.bf16.msrb.mxu1 %v5583_v40  ;;  %v2353_v0 = vsel %vm1576_vm15, %v2351_v18, %v2352_v23  ;;  %v5566_v40 = vld [vmem:[%s7465_s6 + $0x280] sm:$0xff]  ;;  %v2748_v18 = vrot.slane %v6587_v33, 4 }
 0x1e3   : > { %2891 = vmatpush.bf16.msrb.mxu3 %v5570_v34  ;;  %3089 = vmatpush.bf16.msrb.mxu2 %v5588_v49  ;;  %v1514_v34 = vadd.f32 %v6857_v27, %v6755_v15  ;;  %v5610_v15 = vld [vmem:[%s7465_s6 + $0x3e0] sm:$0xff] }
 0x1e4   : > { %2912 = vmatpush.bf16.msra.mxu0 %v5575_v50  ;;  %v5620_v50 = vld [vmem:[%s7465_s6 + $0x430] sm:$0xff] }
 0x1e5   : > { %v6810_v32 = vpop.f32.mrf.mxu3  ;;  %2688 = vmatmul.bf16.vlgmr.msrb.gmra.mxu0 %v2543_v53  ;;  %2706 = vmatmul.bf16.vlgmr.msra.gmra.mxu1 %v2546_v41  ;;  %v5601_v53 = vld [vmem:[%s7465_s6 + $0x398] sm:$0xff] }
 0x1e6   : > { %2931 = vmatpush.bf16.msrb.mxu1 %v5582_v17  ;;  %v5619_v17 = vld [vmem:[%s7465_s6 + $0x428] sm:$0xff] }
 0x1e7   : > { %2892 = vmatpush.bf16.msrb.mxu3 %v5569_v59  ;;  %3090 = vmatpush.bf16.msrb.mxu2 %v5587_v62 }
 0x1e8   : > { %2913 = vmatpush.bf16.msra.mxu0 %v5574_v4 }
 0x1ea   : > { %v6827_v57 = vpop.f32.mrf.mxu0  ;;  %v6829_v63 = vpop.f32.mrf.mxu1  ;;  %3289 = vmatpush.bf16.msra.mxu1 %v5613_v55  ;;  %v5605_v55 = vld [vmem:[%s7465_s6 + $0x3b8] sm:$0xff] }
 0x1eb   : > { %2893 = vmatpush.bf16.msrb.mxu3 %v5568_v7  ;;  %3091 = vmatpush.bf16.msrb.mxu2 %v5586_v10  ;;  %v5609_v7 = vld [vmem:[%s7465_s6 + $0x3d8] sm:$0xff]  ;;  %v2747_v10 = vrot.slane %v6571_v31, 3  ;;  %v2744_v31 = vrot.slane %v6472_v52, 3  ;;  %v5608_v52 = vld [vmem:[%s7465_s6 + $0x3d0] sm:$0xff] }
 0x1ec   : > { %v1715_v12 = vpop.f32.mrf.mxu2  ;;  %3124 = vmatpush.bf16.msrb.mxu0 %v5605_v55  ;;  %v5615_v55 = vld [vmem:[%s7465_s6 + $0x408] sm:$0xff] }
 0x1ed   : > { %v1512_v39 = vpop.f32.mrf.mxu3 }
 0x1ee   : > { %4982 = vmatmul.msk.bf16.vlgmr.msra.gmra.mxu2 %vm2057_vm9, %v2549_v36  ;;  %3290 = vmatpush.bf16.msra.mxu1 %v5612_v26  ;;  %v1515_v39 = vadd.f32 %v6857_v27, %v6784_v13  ;;  %v2755_v26 = vrot.slane %v6584_v22, 4  ;;  %v2752_v13 = vrot.slane %v6485_v28, 4  ;;  %v5604_v22 = vld [vmem:[%s7465_s6 + $0x3b0] sm:$0xff]  ;;  %v6934_v28 = vor.u32 %v2748_v18, %v2747_v10  ;;  %v5641_v18 = vld [vmem:[%s7465_s6 + $0x4d8] sm:$0xff] }
 0x1ef   : > { %3307 = vmatpush.bf16.msra.mxu2 %v5621_v19  ;;  %2894 = vmatpush.bf16.msrb.mxu3 %v5567_v16  ;;  %v2946_v10 = vrot.slane %v6528_v14, 4 }
 0x1f0   : > { %3125 = vmatpush.bf16.msrb.mxu0 %v5604_v22 }
 0x1f2   : > { %v6862_v30 = vpop.f32.mrf.mxu0  ;;  %v6864_v44 = vpop.f32.mrf.mxu1  ;;  %4900 = vmatmul.msk.bf16.vlgmr.msra.gmra.mxu3 %vm2057_vm9, %v2353_v0  ;;  %3291 = vmatpush.bf16.msra.mxu1 %v5611_v46  ;;  %v2745_v0 = vrot.slane %v6475_v42, 4  ;;  %v2751_v46 = vrot.slane %v6469_v51, 3  ;;  %v5599_v51 = vld [vmem:[%s7465_s6 + $0x388] sm:$0xff] }
 0x1f3   : > { %3308 = vmatpush.bf16.msra.mxu2 %v5620_v50  ;;  %2895 = vmatpush.bf16.msrb.mxu3 %v5566_v40 }
 0x1f4   : > { %v6878_v49 = vpop.f32.mrf.mxu2  ;;  %v2746_v40 = vor.u32 %v2745_v0, %v2744_v31 }
 0x1f5   : > { %v1564_v41 = vpop.f32.mrf.mxu3  ;;  %2693 = vmatmul.bf16.gmra.mxu0 %v2542_v24  ;;  %2711 = vmatmul.bf16.gmra.mxu1 %v2545_v29 }
 0x1f6   : > { %v1573_v4 = vadd.f32 %v1564_v41, %v1514_v34  ;;  %3292 = vmatpush.bf16.msra.mxu1 %v5610_v15  ;;  %v5607_v41 = vld [vmem:[%s7465_s6 + $0x3c8] sm:$0xff] }
 0x1f7   : > { %3102 = vmatpush.bf16.msra.mxu3 %v5601_v53  ;;  %3309 = vmatpush.bf16.msra.mxu2 %v5619_v17  ;;  %v5603_v53 = vld [vmem:[%s7465_s6 + $0x3a8] sm:$0xff]  ;;  %v2750_v17 = vsel %vm1674_vm6, %v2746_v40, %v6934_v28 }
 0x1f8   : > { %v1622_v59 = vadd.f32 %v6786_v38, %v1573_v4  ;;  %v2754_v38 = vrot.slane %v6577_v43, 3  ;;  %v5598_v4 = vld [vmem:[%s7465_s6 + $0x380] sm:$0xff]  ;;  %3126 = vmatpush.bf16.msrb.mxu0 %v5603_v53 }
 0x1f9   : > { %v5638_v53 = vld [vmem:[%s7465_s6 + $0x4c0] sm:$0xff] }
 0x1fa   : > { %v1620_v62 = vpop.f32.mrf.mxu0  ;;  %v1669_v24 = vpop.f32.mrf.mxu1  ;;  %v1671_v29 = vadd.f32 %v6788_v21, %v1622_v59  ;;  %v5618_v21 = vld [vmem:[%s7465_s6 + $0x420] sm:$0xff]  ;;  %3293 = vmatpush.bf16.msra.mxu1 %v5609_v7  ;;  %v6936_v33 = vor.u32 %v2755_v26, %v2754_v38  ;;  %v2945_v26 = vrot.slane %v6432_v56, 4 }
 0x1fb   : > { %3103 = vmatpush.bf16.msra.mxu3 %v5600_v1  ;;  %3310 = vmatpush.bf16.msra.mxu2 %v5618_v21 }
 0x1fc   : > { %v6911_v36 = vpop.f32.mrf.mxu2  ;;  %v6915_v16 = vadd.f32 %v1715_v12, %v1671_v29  ;;  %v2947_v0 = vsel %vm1727_vm8, %v2945_v26, %v2946_v10 }
 0x1fd   : > { %v1566_v43 = vpop.f32.mrf.mxu3 }
 0x1fe   : > { %v1574_v19 = vadd.f32 %v1566_v43, %v1515_v39  ;;  %4983 = vmatmul.msk.bf16.gmra.mxu2 %vm2057_vm9, %v2548_v6  ;;  %v5617_v6 = vld [vmem:[%s7465_s6 + $0x418] sm:$0xff]  ;;  %3294 = vmatpush.bf16.msra.mxu1 %v5608_v52 }
 0x1ff   : > { %3104 = vmatpush.bf16.msra.mxu3 %v5599_v51  ;;  %3311 = vmatpush.bf16.msra.mxu2 %v5617_v6  ;;  %v5633_v39 = vld [vmem:[%s7465_s6 + $0x498] sm:$0xff]  ;;  %v5631_v51 = vld [vmem:[%s7465_s6 + $0x488] sm:$0xff]  ;;  %v5594_v6 = vld [vmem:[%s7465_s6 + $0x360] sm:$0xff] }
 0x200   : > { %v1623_v42 = vadd.f32 %v6827_v57, %v1574_v19  ;;  %v2753_v57 = vor.u32 %v2752_v13, %v2751_v46  ;;  %v5632_v46 = vld [vmem:[%s7465_s6 + $0x490] sm:$0xff]  ;;  %v5595_v13 = vld [vmem:[%s7465_s6 + $0x368] sm:$0xff] }
 0x202   : > { %v6941_v12 = vpop.f32.mrf.mxu0  ;;  %v6943_v50 = vpop.f32.mrf.mxu1  ;;  %4901 = vmatmul.msk.bf16.gmra.mxu3 %vm2057_vm9, %v2352_v23  ;;  %v1672_v34 = vadd.f32 %v6829_v63, %v1623_v42  ;;  %v5616_v23 = vld [vmem:[%s7465_s6 + $0x410] sm:$0xff]  ;;  %v1516_v63 = vadd.f32 %v6857_v27, %v6810_v32  ;;  %v2757_v59 = vsel %vm1674_vm6, %v2753_v57, %v6936_v33  ;;  %3295 = vmatpush.bf16.msra.mxu1 %v5607_v41  ;;  %v5602_v32 = vld [vmem:[%s7465_s6 + $0x3a0] sm:$0xff]  ;;  %v5639_v42 = vld [vmem:[%s7465_s6 + $0x4c8] sm:$0xff] }
 0x203   : > { %v5606_v27 = vld [vmem:[%s7465_s6 + $0x3c0] sm:$0xff]  ;;  %3105 = vmatpush.bf16.msra.mxu3 %v5598_v4  ;;  %3312 = vmatpush.bf16.msra.mxu2 %v5616_v23 }
 0x204   : > { %v1722_v15 = vpop.f32.mrf.mxu2  ;;  %v6968_v62 = vadd.f32 %v6878_v49, %v1672_v34  ;;  %v5597_v49 = vld [vmem:[%s7465_s6 + $0x378] sm:$0xff]  ;;  %3127 = vmatpush.bf16.msrb.mxu0 %v5602_v32  ;;  %v5630_v34 = vld [vmem:[%s7465_s6 + $0x480] sm:$0xff] }
 0x205   : > { %v1569_v24 = vpop.f32.mrf.mxu3  ;;  %2914 = vmatmul.bf16.vlgmr.msra.gmra.mxu0 %v2750_v17  ;;  %5064 = vmatmul.msk.bf16.vlgmr.msrb.gmra.mxu1 %vm2057_vm9, %v2757_v59  ;;  %v5628_v59 = vld [vmem:[%s7465_s6 + $0x470] sm:$0xff] }
 0x206   : > { %v1575_v29 = vadd.f32 %v1569_v24, %v1516_v63  ;;  %3296 = vmatpush.bf16.msra.mxu1 %v5606_v27  ;;  %v5625_v63 = vld [vmem:[%s7465_s6 + $0x458] sm:$0xff]  ;;  %v5636_v24 = vld [vmem:[%s7465_s6 + $0x4b0] sm:$0xff]  ;;  %v2952_v27 = vrot.slane %v6532_v9, 4 }
 0x207   : > { %3106 = vmatpush.bf16.msra.mxu3 %v5597_v49  ;;  %3313 = vmatpush.bf16.msra.mxu2 %v5615_v55 }
 0x208   : > { %v1624_v7 = vadd.f32 %v6862_v30, %v1575_v29  ;;  %v5596_v30 = vld [vmem:[%s7465_s6 + $0x370] sm:$0xff]  ;;  %3521 = vmatpush.bf16.msra.mxu0 %v5633_v39  ;;  %v5645_v29 = vld [vmem:[%s7465_s6 + $0x4f8] sm:$0xff] }
 0x209   : > { %v5644_v39 = vld [vmem:[%s7465_s6 + $0x4f0] sm:$0xff] }
 0x20a   : > { %v6984_v1 = vpop.f32.mrf.mxu0  ;;  %v6986_v38 = vpop.f32.mrf.mxu1  ;;  %v1673_v21 = vadd.f32 %v6864_v44, %v1624_v7  ;;  %3539 = vmatpush.bf16.msrb.mxu1 %v5641_v18  ;;  %v5614_v44 = vld [vmem:[%s7465_s6 + $0x400] sm:$0xff] }
 0x20b   : > { %3107 = vmatpush.bf16.msra.mxu3 %v5596_v30  ;;  %3314 = vmatpush.bf16.msra.mxu2 %v5614_v44 }
 0x20c   : > { %v1925_v43 = vpop.f32.mrf.mxu2  ;;  %v7001_v31 = vadd.f32 %v6911_v36, %v1673_v21  ;;  %v5640_v36 = vld [vmem:[%s7465_s6 + $0x4d0] sm:$0xff]  ;;  %3522 = vmatpush.bf16.msra.mxu0 %v5632_v46  ;;  %v3144_v21 = vrot.slane %v6432_v56, 6  ;;  %v5643_v46 = vld [vmem:[%s7465_s6 + $0x4e8] sm:$0xff] }
 0x20d   : > { %v1571_v19 = vpop.f32.mrf.mxu3 }
 0x20e   : > { %3092 = vmatmul.bf16.vlgmr.msrb.gmra.mxu2 %v2947_v0  ;;  %3540 = vmatpush.bf16.msrb.mxu1 %v5640_v36  ;;  %v5626_v0 = vld [vmem:[%s7465_s6 + $0x460] sm:$0xff] }
 0x20f   : > { %3108 = vmatpush.bf16.msra.mxu3 %v5595_v13  ;;  %3561 = vmatpush.bf16.msrb.mxu2 %v5645_v29  ;;  %v5634_v36 = vld [vmem:[%s7465_s6 + $0x4a0] sm:$0xff] }
 0x210   : > { %3523 = vmatpush.bf16.msra.mxu0 %v5631_v51  ;;  %v1045_v51 = vld [vmem:[#allocation1] sm:$0xff] }
 0x212   : > { %v7016_v22 = vpop.f32.mrf.mxu0  ;;  %v7018_v52 = vpop.f32.mrf.mxu1  ;;  %2896 = vmatmul.bf16.vlgmr.msrb.gmra.mxu3 %v6611_v5  ;;  %3541 = vmatpush.bf16.msrb.mxu1 %v5639_v42 }
 0x213   : > { %3109 = vmatpush.bf16.msra.mxu3 %v5594_v6  ;;  %3562 = vmatpush.bf16.msrb.mxu2 %v5644_v39 }
 0x214   : > { %v1927_v40 = vpop.f32.mrf.mxu2  ;;  %3524 = vmatpush.bf16.msra.mxu0 %v5630_v34 }
 0x215   : > { %v1764_v57 = vpop.f32.mrf.mxu3  ;;  %2919 = vmatmul.bf16.gmra.mxu0 %v6934_v28  ;;  %5065 = vmatmul.msk.bf16.gmra.mxu1 %vm2057_vm9, %v6936_v33  ;;  %v5637_v33 = vld [vmem:[%s7465_s6 + $0x4b8] sm:$0xff] }
 0x216   : > { %v1773_v5 = vadd.f32 %v1764_v57, %v6915_v16  ;;  %3542 = vmatpush.bf16.msrb.mxu1 %v5638_v53  ;;  %v5629_v16 = vld [vmem:[%s7465_s6 + $0x478] sm:$0xff] }
 0x217   : > { %3329 = vmatpush.bf16.msrb.mxu3 %v5625_v63  ;;  %3563 = vmatpush.bf16.msrb.mxu2 %v5643_v46  ;;  %v5661_v57 = vld [vmem:[%s7465_s6 + $0x578] sm:$0xff]  ;;  %v5664_v46 = vld [vmem:[%s7465_s6 + $0x590] sm:$0xff] }
 0x218   : > { %v1824_v41 = vadd.f32 %v6941_v12, %v1773_v5  ;;  %3525 = vmatpush.bf16.msra.mxu0 %v5629_v16  ;;  %v5642_v5 = vld [vmem:[%s7465_s6 + $0x4e0] sm:$0xff]  ;;  %v5660_v16 = vld [vmem:[%s7465_s6 + $0x570] sm:$0xff] }
 0x21a   : > { %v1884_v28 = vadd.f32 %v6943_v50, %v1824_v41  ;;  %v1822_v4 = vpop.f32.mrf.mxu0  ;;  %v1882_v23 = vpop.f32.mrf.mxu1  ;;  %3543 = vmatpush.bf16.msrb.mxu1 %v5637_v33  ;;  %v2949_v41 = vrot.slane %v6530_v45, 4 }
 0x21b   : > { %3564 = vmatpush.bf16.msrb.mxu2 %v5642_v5  ;;  %v2948_v23 = vrot.slane %v6434_v25, 4 }
 0x21c   : > { %v1930_v15 = vpop.f32.mrf.mxu2  ;;  %v7051_v12 = vadd.f32 %v1925_v43, %v1884_v28  ;;  %3526 = vmatpush.bf16.msra.mxu0 %v5628_v59  ;;  %v7122_v28 = vsel %vm418_vm2, %v1045_v51, 0  ;;  %v5659_v59 = vld [vmem:[%s7465_s6 + $0x568] sm:$0xff] }
 0x21d   : > { %v1766_v50 = vpop.f32.mrf.mxu3  ;;  %v3153_v33 = vrot.slane %v7122_v28, 6  ;;  %v2950_v63 = vsel %vm1727_vm8, %v2948_v23, %v2949_v41 }
 0x21e   : > { %v1774_v17 = vadd.f32 %v1766_v50, %v6968_v62  ;;  %3097 = vmatmul.bf16.gmra.mxu2 %v2946_v10  ;;  %v3145_v62 = vrot.slane %v6528_v14, 6  ;;  %v2951_v10 = vrot.slane %v6436_v58, 4  ;;  %3544 = vmatpush.bf16.msrb.mxu1 %v5636_v24  ;;  %v5622_v24 = vld [vmem:[%s7465_s6 + $0x440] sm:$0xff] }
 0x220   : > { %v1825_v32 = vadd.f32 %v6984_v1, %v1774_v17  ;;  %v5627_v1 = vld [vmem:[%s7465_s6 + $0x468] sm:$0xff]  ;;  %v2953_v30 = vsel %vm1727_vm8, %v2951_v10, %v2952_v27  ;;  %v3146_v26 = vsel %vm418_vm2, %v3144_v21, %v3145_v62  ;;  %v3154_v29 = vsel %vm418_vm2, %v3145_v62, %v3153_v33 }
 0x221   : > { %3527 = vmatpush.bf16.msra.mxu0 %v5627_v1  ;;  %v5658_v1 = vld [vmem:[%s7465_s6 + $0x560] sm:$0xff] }
 0x222   : > { %v1885_v49 = vadd.f32 %v6986_v38, %v1825_v32  ;;  %v7067_v55 = vpop.f32.mrf.mxu0  ;;  %v7069_v7 = vpop.f32.mrf.mxu1  ;;  %2901 = vmatmul.bf16.gmra.mxu3 %v6592_v8  ;;  %v5635_v38 = vld [vmem:[%s7465_s6 + $0x4a8] sm:$0xff]  ;;  %v5624_v8 = vld [vmem:[%s7465_s6 + $0x450] sm:$0xff] }
 0x223   : > { %3545 = vmatpush.bf16.msrb.mxu1 %v5635_v38  ;;  %3330 = vmatpush.bf16.msrb.mxu3 %v5624_v8  ;;  %v1046_v32 = vld [vmem:[#allocation1 + $0x9] sm:$0xff] }
 0x224   : > { %v1932_v18 = vpop.f32.mrf.mxu2  ;;  %v7092_v43 = vadd.f32 %v1927_v40, %v1885_v49  ;;  %v3148_v40 = vrot.slane %v6530_v45, 6  ;;  %v5653_v49 = vld [vmem:[%s7465_s6 + $0x538] sm:$0xff]  ;;  %v7153_v62 = vsel %vm418_vm2, %v1046_v32, 0 }
 0x225   : > { %v1769_v44 = vpop.f32.mrf.mxu3  ;;  %5146 = vmatmul.msk.bf16.vlgmr.msrb.gmra.mxu0 %vm2057_vm9, %v2953_v30  ;;  %3297 = vmatmul.bf16.vlgmr.msra.gmra.mxu1 %v3146_v26  ;;  %v5657_v30 = vld [vmem:[%s7465_s6 + $0x558] sm:$0xff]  ;;  %v3375_v23 = vshrl.u32 %v7153_v62, 16 }
 0x226   : > { %v1775_v19 = vadd.f32 %v1769_v44, %v7001_v31  ;;  %3528 = vmatpush.bf16.msra.mxu0 %v5626_v0  ;;  %v5665_v26 = vld [vmem:[%s7465_s6 + $0x598] sm:$0xff]  ;;  %v5656_v0 = vld [vmem:[%s7465_s6 + $0x550] sm:$0xff] }
 0x227   : > { %3546 = vmatpush.bf16.msrb.mxu1 %v5634_v36  ;;  %v5651_v36 = vld [vmem:[%s7465_s6 + $0x528] sm:$0xff]  ;;  %v3377_v32 = vrot.slane %v3375_v23, 6 }
 0x228   : > { %v1826_v13 = vadd.f32 %v7016_v22, %v1775_v19  ;;  %v5623_v22 = vld [vmem:[%s7465_s6 + $0x448] sm:$0xff] }
 0x229   : > { %3331 = vmatpush.bf16.msrb.mxu3 %v5623_v22 }
 0x22a   : > { %v1886_v31 = vadd.f32 %v7018_v52, %v1826_v13  ;;  %v2091_v42 = vpop.f32.mrf.mxu0  ;;  %v2109_v6 = vpop.f32.mrf.mxu1  ;;  %v3147_v52 = vrot.slane %v6434_v25, 6  ;;  %3741 = vmatpush.bf16.msrb.mxu0 %v5661_v57  ;;  %v5655_v57 = vld [vmem:[%s7465_s6 + $0x548] sm:$0xff] }
 0x22b   : > { %3763 = vmatpush.bf16.msra.mxu1 %v5665_v26 }
 0x22c   : > { %v7118_v34 = vadd.f32 %v1930_v15, %v1886_v31  ;;  %v3149_v4 = vsel %vm418_vm2, %v3147_v52, %v3148_v40  ;;  %v5654_v52 = vld [vmem:[%s7465_s6 + $0x540] sm:$0xff] }
 0x22d   : > { %v1771_v53 = vpop.f32.mrf.mxu3  ;;  %3332 = vmatpush.bf16.msrb.mxu3 %v5622_v24 }
 0x22e   : > { %3315 = vmatmul.bf16.vlgmr.msra.gmra.mxu2 %v3149_v4  ;;  %3742 = vmatpush.bf16.msrb.mxu0 %v5660_v16  ;;  %v5662_v53 = vld [vmem:[%s7465_s6 + $0x580] sm:$0xff]  ;;  %v3378_v16 = vshll.u32 %v7153_v62, 16 }
 0x22f   : > { %3764 = vmatpush.bf16.msra.mxu1 %v5664_v46 }
 0x231   : > { %v7131_v15 = vpop.f32.mrf.mxu2 }
 0x232   : > { %v2094_v50 = vpop.f32.mrf.mxu0  ;;  %3110 = vmatmul.bf16.vlgmr.msra.gmra.mxu3 %v2950_v63  ;;  %v2112_v17 = vpop.f32.mrf.mxu1  ;;  %3743 = vmatpush.bf16.msrb.mxu0 %v5659_v59 }
 0x233   : > { %3723 = vmatpush.bf16.msra.mxu3 %v5653_v49  ;;  %v3380_v49 = vrot.slane %v3378_v16, 7  ;;  %v3584_v16 = vrot.slane %v6436_v58, 7 }
 0x235   : > { %v2071_v10 = vpop.f32.mrf.mxu3  ;;  %5147 = vmatmul.msk.bf16.gmra.mxu0 %vm2057_vm9, %v2952_v27  ;;  %3302 = vmatmul.bf16.gmra.mxu1 %v3154_v29 }
 0x236   : > { %v2090_v21 = vadd.f32 %v7067_v55, %v2071_v10  ;;  %v3155_v55 = vrot.slane %v7153_v62, 6  ;;  %3744 = vmatpush.bf16.msrb.mxu0 %v5658_v1  ;;  %v1047_v10 = vld [vmem:[#allocation1 + $0x12] sm:$0xff]  ;;  %v3150_v1 = vrot.slane %v6436_v58, 6 }
 0x238   : > { %v2108_v39 = vadd.f32 %v7069_v7, %v2090_v21  ;;  %v3156_v44 = vsel %vm418_vm2, %v3148_v40, %v3155_v55 }
 0x239   : > { %v7159_v8 = vpop.f32.mrf.mxu2 }
 0x23a   : > { %v7157_v38 = vadd.f32 %v2108_v39, %v7051_v12  ;;  %v2096_v27 = vpop.f32.mrf.mxu0  ;;  %v2114_v18 = vpop.f32.mrf.mxu1  ;;  %v5652_v12 = vld [vmem:[%s7465_s6 + $0x530] sm:$0xff]  ;;  %3745 = vmatpush.bf16.msrb.mxu0 %v5657_v30  ;;  %v7227_v39 = vsel %vm418_vm2, %v1047_v10, 0 }
 0x23b   : > { %3724 = vmatpush.bf16.msra.mxu3 %v5652_v12  ;;  %v5647_v27 = vld [vmem:[%s7465_s6 + $0x508] sm:$0xff]  ;;  %v3381_v18 = vor.u32 %v3380_v49, %v3377_v32 }
 0x23d   : > { %v2073_v7 = vpop.f32.mrf.mxu3 }
 0x23e   : > { %v2092_v19 = vadd.f32 %v2091_v42, %v2073_v7  ;;  %3320 = vmatmul.bf16.gmra.mxu2 %v3156_v44  ;;  %3746 = vmatpush.bf16.msrb.mxu0 %v5656_v0  ;;  %v3386_v7 = vshll.u32 %v7227_v39, 16  ;;  %v5646_v0 = vld [vmem:[%s7465_s6 + $0x500] sm:$0xff] }
 0x23f   : > { %3725 = vmatpush.bf16.msra.mxu3 %v5651_v36  ;;  %v3382_v36 = vsel %vm419_vm3, %v6624_v61, %v3381_v18  ;;  %v3157_v61 = vrot.slane %v7227_v39, 6 }
 0x240   : > { %v2110_v13 = vadd.f32 %v2109_v6, %v2092_v19  ;;  %v5663_v6 = vld [vmem:[%s7465_s6 + $0x588] sm:$0xff] }
 0x241   : > { %v7184_v31 = vpop.f32.mrf.mxu2  ;;  %3765 = vmatpush.bf16.msra.mxu1 %v5663_v6 }
 0x242   : > { %v7182_v51 = vadd.f32 %v2110_v13, %v7092_v43  ;;  %v7186_v42 = vpop.f32.mrf.mxu0  ;;  %3115 = vmatmul.bf16.gmra.mxu3 %v2949_v41  ;;  %v2493_v40 = vpop.f32.mrf.mxu1  ;;  %v5650_v43 = vld [vmem:[%s7465_s6 + $0x520] sm:$0xff]  ;;  %3747 = vmatpush.bf16.msrb.mxu0 %v5655_v57  ;;  %v3367_v41 = vshrl.u32 %v7122_v28, 16 }
 0x243   : > { %3726 = vmatpush.bf16.msra.mxu3 %v5650_v43  ;;  %v3388_v43 = vrot.slane %v3386_v7, 7 }
 0x244   : > { %v3369_v24 = vrot.slane %v3367_v41, 6 }
 0x245   : > { %v2076_v5 = vpop.f32.mrf.mxu3  ;;  %3529 = vmatmul.bf16.vlgmr.msra.gmra.mxu0 %v6640_v35  ;;  %3547 = vmatmul.bf16.vlgmr.msrb.gmra.mxu1 %v6645_v3  ;;  %v5649_v35 = vld [vmem:[%s7465_s6 + $0x518] sm:$0xff]  ;;  %v3370_v3 = vshll.u32 %v7122_v28, 16 }
 0x246   : > { %v2095_v22 = vadd.f32 %v2094_v50, %v2076_v5  ;;  %3748 = vmatpush.bf16.msrb.mxu0 %v5654_v52  ;;  %3766 = vmatpush.bf16.msra.mxu1 %v5662_v53 }
 0x247   : > { %3727 = vmatpush.bf16.msra.mxu3 %v5649_v35  ;;  %v3372_v29 = vrot.slane %v3370_v3, 7 }
 0x248   : > { %v2113_v4 = vadd.f32 %v2112_v17, %v2095_v22  ;;  %v5648_v17 = vld [vmem:[%s7465_s6 + $0x510] sm:$0xff] }
 0x249   : > { %v2304_v63 = vpop.f32.mrf.mxu2  ;;  %v3373_v55 = vor.u32 %v3372_v29, %v3369_v24 }
 0x24a   : > { %v7213_v33 = vadd.f32 %v2113_v4, %v7118_v34  ;;  %v7215_v50 = vpop.f32.mrf.mxu0  ;;  %v7217_v59 = vpop.f32.mrf.mxu1  ;;  %v3151_v34 = vrot.slane %v6532_v9, 6 }
 0x24b   : > { %3728 = vmatpush.bf16.msra.mxu3 %v5648_v17  ;;  %v3374_v46 = vsel %vm419_vm3, %v6622_v54, %v3373_v55  ;;  %v3591_v55 = vrot.slane %v7227_v39, 7 }
 0x24c   : > { %v3152_v30 = vsel %vm418_vm2, %v3150_v1, %v3151_v34  ;;  %v3158_v4 = vsel %vm418_vm2, %v3151_v34, %v3157_v61  ;;  %v3579_v34 = vrot.slane %v6528_v14, 7  ;;  %v3578_v1 = vrot.slane %v6432_v56, 7 }
 0x24d   : > { %v2078_v21 = vpop.f32.mrf.mxu3 }
 0x24e   : > { %5310 = vmatmul.msk.bf16.vlgmr.msrb.gmra.mxu2 %vm2057_vm9, %v6650_v11  ;;  %v3383_v11 = vshrl.u32 %v7227_v39, 16  ;;  %v3580_v18 = vsel %vm413_vm0, %v3578_v1, %v3579_v34 }
 0x24f   : > { %3729 = vmatpush.bf16.msra.mxu3 %v5647_v27  ;;  %v3589_v27 = vrot.slane %v7153_v62, 7 }
 0x250   : > { %v3385_v6 = vrot.slane %v3383_v11, 6 }
 0x251   : > { %v2511_v26 = vpop.f32.mrf.mxu2 }
 0x252   : > { %v2338_v12 = vpop.f32.mrf.mxu0  ;;  %5228 = vmatmul.msk.bf16.vlgmr.msrb.gmra.mxu3 %vm2057_vm9, %v3152_v30  ;;  %v2512_v44 = vadd.f32 %v2511_v26, %v2493_v40  ;;  %v2498_v19 = vpop.f32.mrf.mxu1  ;;  %v3389_v52 = vor.u32 %v3388_v43, %v3385_v6 }
 0x253   : > { %3730 = vmatpush.bf16.msra.mxu3 %v5646_v0 }
 0x254   : > { %v3390_v35 = vsel %vm419_vm3, %v6629_v37, %v3389_v52 }
 0x255   : > { %v2315_v13 = vpop.f32.mrf.mxu3  ;;  %3534 = vmatmul.bf16.gmra.mxu0 %v3374_v46  ;;  %3552 = vmatmul.bf16.gmra.mxu1 %v3382_v36 }
 0x256   : > { %v2316_v57 = vadd.f32 %v2315_v13, %v7131_v15  ;;  %v3582_v15 = vrot.slane %v6530_v45, 7  ;;  %v3587_v13 = vrot.slane %v7122_v28, 7 }
 0x258   : > { %v2334_v40 = vadd.f32 %v7186_v42, %v2316_v57  ;;  %v3585_v42 = vrot.slane %v6532_v9, 7  ;;  %v3588_v57 = vsel %vm413_vm0, %v3579_v34, %v3587_v13 }
 0x259   : > { %v7245_v5 = vpop.f32.mrf.mxu2 }
 0x25a   : > { %v2340_v22 = vpop.f32.mrf.mxu0  ;;  %v2342_v53 = vadd.f32 %v2334_v40, %v7157_v38  ;;  %v2500_v54 = vpop.f32.mrf.mxu1  ;;  %v3581_v38 = vrot.slane %v6434_v25, 7  ;;  %v3586_v29 = vsel %vm413_vm0, %v3584_v16, %v3585_v42  ;;  %v3592_v7 = vsel %vm413_vm0, %v3585_v42, %v3591_v55 }
 0x25b   : > { %v2514_v16 = vadd.f32 %v7245_v5, %v7217_v59 }
 0x25c   : > { %v3583_v37 = vsel %vm413_vm0, %v3581_v38, %v3582_v15 }
 0x25d   : > { %v7248_v41 = vpop.f32.mrf.mxu3 }
 0x25e   : > { %5311 = vmatmul.msk.bf16.gmra.mxu2 %vm2057_vm9, %v3390_v35 }
 0x261   : > { %v2516_v3 = vpop.f32.mrf.mxu2 }
 0x262   : > { %v2689_v23 = vpop.f32.mrf.mxu0  ;;  %5229 = vmatmul.msk.bf16.gmra.mxu3 %vm2057_vm9, %v3158_v4  ;;  %v2517_v63 = vadd.f32 %v2516_v3, %v2498_v19  ;;  %v2707_v17 = vpop.f32.mrf.mxu1  ;;  %v2318_v4 = vadd.f32 %v7248_v41, %v7159_v8 }
 0x263   : > { %v2708_v24 = vadd.f32 %v2707_v17, %v2689_v23 }
 0x264   : > { %v2336_v17 = vadd.f32 %v7215_v50, %v2318_v4 }
 0x265   : > { %v2320_v45 = vpop.f32.mrf.mxu3  ;;  %3749 = vmatmul.bf16.vlgmr.msrb.gmra.mxu0 %v3583_v37  ;;  %5392 = vmatmul.msk.bf16.vlgmr.msra.gmra.mxu1 %vm2057_vm9, %v3586_v29 }
 0x266   : > { %v2321_v9 = vadd.f32 %v2320_v45, %v7184_v31  ;;  %v2343_v29 = vadd.f32 %v2336_v17, %v7182_v51 }
 0x268   : > { %v2339_v32 = vadd.f32 %v2338_v12, %v2321_v9 }
 0x269   : > { %v2518_v49 = vpop.f32.mrf.mxu2 }
 0x26a   : > { %v2691_v10 = vpop.f32.mrf.mxu0  ;;  %v2344_v25 = vadd.f32 %v2339_v32, %v7213_v33  ;;  %v2709_v21 = vpop.f32.mrf.mxu1  ;;  %v3590_v33 = vsel %vm413_vm0, %v3582_v15, %v3589_v27 }
 0x26d   : > { %v2322_v58 = vpop.f32.mrf.mxu3 }
 0x271   : > { %v2725_v30 = vpop.f32.mrf.mxu2 }
 0x272   : > { %v2694_v26 = vpop.f32.mrf.mxu0  ;;  %3731 = vmatmul.bf16.vlgmr.msra.gmra.mxu3 %v3580_v18  ;;  %v2726_v31 = vadd.f32 %v2725_v30, %v2708_v24  ;;  %v2712_v12 = vpop.f32.mrf.mxu1 }
 0x273   : > { %v2713_v11 = vadd.f32 %v2712_v12, %v2694_v26 }
 0x275   : > { %v2529_v19 = vpop.f32.mrf.mxu3  ;;  %3754 = vmatmul.bf16.gmra.mxu0 %v3590_v33  ;;  %5393 = vmatmul.msk.bf16.gmra.mxu1 %vm2057_vm9, %v3592_v7 }
 0x276   : > { %v2530_v56 = vadd.f32 %v2529_v19, %v2512_v44 }
 0x278   : > { %v2538_v14 = vadd.f32 %v2530_v56, %v2342_v53 }
 0x279   : > { %v2727_v39 = vpop.f32.mrf.mxu2 }
 0x27a   : > { %v2734_v62 = vadd.f32 %v2726_v31, %v2538_v14  ;;  %v2696_v0 = vpop.f32.mrf.mxu0  ;;  %v2714_v46 = vpop.f32.mrf.mxu1 }
 0x27d   : > { %v2531_v36 = vpop.f32.mrf.mxu3 }
 0x281   : > { %v2730_v6 = vpop.f32.mrf.mxu2 }
 0x282   : > { %v2915_v43 = vpop.f32.mrf.mxu0  ;;  %3736 = vmatmul.bf16.gmra.mxu3 %v3588_v57  ;;  %v2731_v40 = vadd.f32 %v2730_v6, %v2713_v11  ;;  %v2933_v22 = vpop.f32.mrf.mxu1 }
 0x285   : > { %v2534_v52 = vpop.f32.mrf.mxu3 }
 0x286   : > { %v2535_v54 = vadd.f32 %v2534_v52, %v2517_v63  ;;  %v2532_v63 = vadd.f32 %v2531_v36, %v2514_v16 }
 0x288   : > { %v2540_v61 = vadd.f32 %v2535_v54, %v2344_v25  ;;  %v2710_v25 = vadd.f32 %v2709_v21, %v2691_v10  ;;  %v2539_v8 = vadd.f32 %v2532_v63, %v2343_v29 }
 0x289   : > { %v2732_v44 = vpop.f32.mrf.mxu2 }
 0x28a   : > { %v2736_v35 = vadd.f32 %v2731_v40, %v2540_v61  ;;  %v2917_v53 = vpop.f32.mrf.mxu0  ;;  %v2935_v15 = vpop.f32.mrf.mxu1  ;;  %v2728_v58 = vadd.f32 %v2727_v39, %v2710_v25 }
 0x28c   : > { %v2735_v1 = vadd.f32 %v2728_v58, %v2539_v8 }
 0x28d   : > { %v2536_v42 = vpop.f32.mrf.mxu3 }
 0x291   : > { %v3093_v3 = vpop.f32.mrf.mxu2 }
 0x292   : > { %v2920_v28 = vpop.f32.mrf.mxu0  ;;  %v2938_v23 = vpop.f32.mrf.mxu1 }
 0x295   : > { %v2897_v38 = vpop.f32.mrf.mxu3 }
 0x296   : > { %v2916_v24 = vadd.f32 %v2915_v43, %v2897_v38 }
 0x298   : > { %v2934_v37 = vadd.f32 %v2933_v22, %v2916_v24 }
 0x299   : > { %v3095_v9 = vpop.f32.mrf.mxu2 }
 0x29a   : > { %v2942_v45 = vadd.f32 %v2934_v37, %v2734_v62  ;;  %v2922_v32 = vpop.f32.mrf.mxu0  ;;  %v2940_v49 = vpop.f32.mrf.mxu1 }
 0x29d   : > { %v2899_v41 = vpop.f32.mrf.mxu3 }
 0x29e   : > { %v2918_v34 = vadd.f32 %v2917_v53, %v2899_v41 }
 0x2a0   : > { %v2936_v27 = vadd.f32 %v2935_v15, %v2918_v34 }
 0x2a1   : > { %v3098_v59 = vpop.f32.mrf.mxu2 }
 0x2a2   : > { %v2943_v55 = vadd.f32 %v2936_v27, %v2735_v1  ;;  %v3129_v5 = vpop.f32.mrf.mxu0  ;;  %v3298_v50 = vpop.f32.mrf.mxu1 }
 0x2a5   : > { %v2902_v18 = vpop.f32.mrf.mxu3 }
 0x2a6   : > { %v2921_v30 = vadd.f32 %v2920_v28, %v2902_v18 }
 0x2a8   : > { %v2939_v26 = vadd.f32 %v2938_v23, %v2921_v30 }
 0x2a9   : > { %v3100_v51 = vpop.f32.mrf.mxu2 }
 0x2aa   : > { %v2944_v31 = vadd.f32 %v2939_v26, %v2736_v35  ;;  %v3131_v12 = vpop.f32.mrf.mxu0  ;;  %v3300_v11 = vpop.f32.mrf.mxu1 }
 0x2ad   : > { %v2904_v33 = vpop.f32.mrf.mxu3 }
 0x2b1   : > { %v3316_v7 = vpop.f32.mrf.mxu2 }
 0x2b2   : > { %v3134_v10 = vpop.f32.mrf.mxu0  ;;  %v3303_v21 = vpop.f32.mrf.mxu1  ;;  %v3317_v23 = vadd.f32 %v3316_v7, %v3298_v50 }
 0x2b5   : > { %v3111_v19 = vpop.f32.mrf.mxu3 }
 0x2b6   : > { %v3112_v56 = vadd.f32 %v3111_v19, %v3093_v3 }
 0x2b8   : > { %v3130_v14 = vadd.f32 %v3129_v5, %v3112_v56 }
 0x2b9   : > { %v3318_v62 = vpop.f32.mrf.mxu2 }
 0x2ba   : > { %v3136_v39 = vpop.f32.mrf.mxu0  ;;  %v3138_v0 = vadd.f32 %v3130_v14, %v2942_v45  ;;  %v3305_v46 = vpop.f32.mrf.mxu1  ;;  %v3319_v29 = vadd.f32 %v3318_v62, %v3300_v11 }
 0x2bd   : > { %v3113_v36 = vpop.f32.mrf.mxu3 }
 0x2be   : > { %v3114_v13 = vadd.f32 %v3113_v36, %v3095_v9 }
 0x2c0   : > { %v3132_v57 = vadd.f32 %v3131_v12, %v3114_v13 }
 0x2c1   : > { %v3321_v6 = vpop.f32.mrf.mxu2 }
 0x2c2   : > { %v3530_v43 = vpop.f32.mrf.mxu0  ;;  %v3139_v40 = vadd.f32 %v3132_v57, %v2943_v55  ;;  %v3548_v22 = vpop.f32.mrf.mxu1  ;;  %v3322_v41 = vadd.f32 %v3321_v6, %v3303_v21 }
 0x2c3   : > { %v3549_v30 = vadd.f32 %v3548_v22, %v3530_v43 }
 0x2c5   : > { %v3116_v52 = vpop.f32.mrf.mxu3 }
 0x2c6   : > { %v3117_v54 = vadd.f32 %v3116_v52, %v3098_v59 }
 0x2c8   : > { %v3135_v61 = vadd.f32 %v3134_v10, %v3117_v54 }
 0x2c9   : > { %v3323_v35 = vpop.f32.mrf.mxu2 }
 0x2ca   : > { %v3532_v44 = vpop.f32.mrf.mxu0  ;;  %v3140_v53 = vadd.f32 %v3135_v61, %v2944_v31  ;;  %v3550_v15 = vpop.f32.mrf.mxu1 }
 0x2cb   : > { %v3551_v19 = vadd.f32 %v3550_v15, %v3532_v44 }
 0x2cd   : > { %v3118_v42 = vpop.f32.mrf.mxu3 }
 0x2ce   : > { %v3930_v42 = vld [vmem:[%s7467_s8 + $0x8] sm:$0xf] }
 0x2d1   : > { %v3566_v4 = vpop.f32.mrf.mxu2 }
 0x2d2   : > { %v3535_v3 = vpop.f32.mrf.mxu0  ;;  %v3553_v28 = vpop.f32.mrf.mxu1  ;;  %v3567_v31 = vadd.f32 %v3566_v4, %v3549_v30 }
 0x2d3   : > { %v3554_v6 = vadd.f32 %v3553_v28, %v3535_v3 }
 0x2d5   : > { %v3334_v38 = vpop.f32.mrf.mxu3 }
 0x2d6   : > { %v3335_v16 = vadd.f32 %v3334_v38, %v3317_v23  ;;  %v3964_v23 = vunpack.c.l.b16 %v3930_v42  ;;  %v5670_v42 = vld [vmem:[%s7467_s8 + $0x30] sm:$0xff] }
 0x2d8   : > { %v3343_v17 = vadd.f32 %v3335_v16, %v3138_v0  ;;  %v3966_v38 = vpack.c.b16 %v3964_v23, %v3964_v23 }
 0x2d9   : > { %v3568_v24 = vpop.f32.mrf.mxu2 }
 0x2da   : > { %v3537_v63 = vpop.f32.mrf.mxu0  ;;  %v3555_v37 = vpop.f32.mrf.mxu1  ;;  %v3575_v12 = vadd.f32 %v3567_v31, %v3343_v17  ;;  %v3569_v14 = vadd.f32 %v3568_v24, %v3551_v19  ;;  %v3933_v17 = vld [vmem:[%s7467_s8 + $0x14] sm:$0xf] }
 0x2db   : > { %v3975_v37 = vsel %vm1727_vm8, %v3966_v38, 0 }
 0x2dc   : > { %3983 = vmatpush.bf16.msra.mxu2 %v3975_v37 }
 0x2dd   : > { %v3336_v45 = vpop.f32.mrf.mxu3 }
 0x2de   : > { %v3337_v9 = vadd.f32 %v3336_v45, %v3319_v29  ;;  %v4016_v29 = vunpack.c.l.b16 %v3933_v17  ;;  %v3936_v45 = vld [vmem:[%s7467_s8 + $0x20] sm:$0xf] }
 0x2e0   : > { %v3344_v32 = vadd.f32 %v3337_v9, %v3139_v40  ;;  %v3939_v9 = vld [vmem:[%s7467_s8 + $0x2c] sm:$0xf] }
 0x2e1   : > { %v3571_v49 = vpop.f32.mrf.mxu2 }
 0x2e2   : > { %v3750_v25 = vpop.f32.mrf.mxu0  ;;  %v3768_v8 = vpop.f32.mrf.mxu1  ;;  %v3576_v36 = vadd.f32 %v3569_v14, %v3344_v32  ;;  %v3572_v22 = vadd.f32 %v3571_v49, %v3554_v6  ;;  %v5667_v14 = vld [vmem:[%s7467_s8 + $0xc] sm:$0xff] }
 0x2e5   : > { %v3339_v58 = vpop.f32.mrf.mxu3 }
 0x2e6   : > { %v3340_v34 = vadd.f32 %v3339_v58, %v3322_v41  ;;  %v4100_v41 = vunpack.c.l.b16 %v3939_v9  ;;  %v3942_v58 = vld [vmem:[%s7467_s8 + $0x38] sm:$0xf] }
 0x2e8   : > { %v3345_v1 = vadd.f32 %v3340_v34, %v3140_v53 }
 0x2e9   : > { %v3573_v27 = vpop.f32.mrf.mxu2 }
 0x2ea   : > { %v3752_v55 = vpop.f32.mrf.mxu0  ;;  %v3770_v59 = vpop.f32.mrf.mxu1  ;;  %v3577_v44 = vadd.f32 %v3572_v22, %v3345_v1 }
 0x2ed   : > { %v3341_v5 = vpop.f32.mrf.mxu3 }
 0x2ee   : > { %v4018_v5 = vpack.c.b16 %v4016_v29, %v4016_v29 }
 0x2f2   : > { %v3755_v50 = vpop.f32.mrf.mxu0  ;;  %v3773_v18 = vpop.f32.mrf.mxu1 }
 0x2f5   : > { %v3732_v26 = vpop.f32.mrf.mxu3 }
 0x2f6   : > { %v3751_v51 = vadd.f32 %v3750_v25, %v3732_v26  ;;  %v5666_v25 = vld [vmem:[%s7467_s8] sm:$0xff] }
 0x2f7   : > { %3984 = vmatpush.bf16.msra.mxu2 %v5666_v25 }
 0x2f8   : > { %v3769_v11 = vadd.f32 %v3768_v8, %v3751_v51  ;;  %v4058_v8 = vunpack.c.l.b16 %v3936_v45  ;;  %v4146_v51 = vunpack.c.l.b16 %v3942_v58  ;;  %v3945_v58 = vld [vmem:[%s7467_s8 + $0x44] sm:$0xf] }
 0x2fa   : > { %v3777_v33 = vadd.f32 %v3769_v11, %v3575_v12  ;;  %v3757_v7 = vpop.f32.mrf.mxu0  ;;  %v3775_v10 = vpop.f32.mrf.mxu1  ;;  %v4027_v12 = vsel %vm1727_vm8, %v4018_v5, 0 }
 0x2fb   : > { %4035 = vmatpush.bf16.msrb.mxu3 %v4027_v12 }
 0x2fc   : > { %vm3780_vm11 = vcmp.ge.f32.partialorder %v3777_v33, 0.0  ;;  %v3783_v21 = vmul.f32 0.2, %v3777_v33 }
 0x2fd   : > { %v3734_v56 = vpop.f32.mrf.mxu3 }
 0x2fe   : > { %v3786_v62 = vsel %vm3780_vm11, %v3777_v33, %v3783_v21  ;;  %v3753_v39 = vadd.f32 %v3752_v55, %v3734_v56  ;;  %v4148_v21 = vpack.c.b16 %v4146_v51, %v4146_v51  ;;  %v5668_v56 = vld [vmem:[%s7467_s8 + $0x18] sm:$0xff] }
 0x2ff   : > { %v3792_v0 = vrot.slane %v3786_v62, 2  ;;  %v3793_v46 = vrot.slane %v3786_v62, 6  ;;  %3798 = vst [vmem:[#allocation1] ss:$4 sm:$0xff] %v3786_v62  ;;  %v5669_v62 = vld [vmem:[%s7467_s8 + $0x24] sm:$0xff]  ;;  %4036 = vmatpush.bf16.msrb.mxu3 %v5667_v14 }
 0x300   : > { %v3771_v13 = vadd.f32 %v3770_v59, %v3753_v39 }
 0x301   : > { %3800 = vst [vmem:[#allocation1 + $0x1] ss:$4 sm:$0xff] %v3792_v0 }
 0x302   : > { %3803 = vst [vmem:[#allocation1 + $0x20] ss:$4 sm:$0xff] %v3793_v46  ;;  %v3778_v57 = vadd.f32 %v3771_v13, %v3576_v36  ;;  %v4157_v36 = vsel %vm1727_vm8, %v4148_v21, 0 }
 0x303   : > { %4165 = vmatpush.bf16.msrb.mxu2 %v4157_v36 }
 0x304   : > { %vm3781_vm12 = vcmp.ge.f32.partialorder %v3778_v57, 0.0  ;;  %v3784_v43 = vmul.f32 0.2, %v3778_v57 }
 0x305   : > { %v3737_v40 = vpop.f32.mrf.mxu3 }
 0x306   : > { %v3787_v52 = vsel %vm3781_vm12, %v3778_v57, %v3784_v43  ;;  %v3756_v54 = vadd.f32 %v3755_v50, %v3737_v40  ;;  %v4060_v50 = vpack.c.b16 %v4058_v8, %v4058_v8 }
 0x307   : > { %v3794_v61 = vrot.slane %v3787_v52, 4  ;;  %v3795_v35 = vrot.slane %v3787_v52, 6  ;;  %3805 = vst [vmem:[#allocation1 + $0x21] ss:$4 sm:$0xff] %v3787_v52  ;;  %4166 = vmatpush.bf16.msrb.mxu2 %v5670_v42 }
 0x308   : > { %v3801_v53 = vld.sshfl [vmem:[#allocation1] sm:$0xff pattern:$0x73625140]  ;;  %v3774_v15 = vadd.f32 %v3773_v18, %v3756_v54  ;;  %v4102_v18 = vpack.c.b16 %v4100_v41, %v4100_v41  ;;  %v4069_v11 = vsel %vm1727_vm8, %v4060_v50, 0 }
 0x309   : > { %v3817_v4 = vpack.c.bf16 %v3801_v53, %v3801_v53  ;;  %3807 = vst [vmem:[#allocation1] ss:$4 sm:$0xff] %v3794_v61  ;;  %4077 = vmatpush.bf16.msra.mxu0 %v4069_v11  ;;  %v5671_v11 = vld [vmem:[%s7467_s8 + $0x3c] sm:$0xff] }
 0x30a   : > { %3808 = vst [vmem:[#allocation1 + $0x1] ss:$4 sm:$0xff] %v3795_v35  ;;  %v3779_v3 = vadd.f32 %v3774_v15, %v3577_v44  ;;  %v4111_v33 = vsel %vm1727_vm8, %v4102_v18, 0 }
 0x30b   : > { %v3825_v28 = vunpack.c.l.b16 %v3817_v4  ;;  %4119 = vmatpush.bf16.msrb.mxu1 %v4111_v33 }
 0x30c   : > { %vm3782_vm13 = vcmp.ge.f32.partialorder %v3779_v3, 0.0  ;;  %v3785_v16 = vmul.f32 0.2, %v3779_v3 }
 0x30d   : > { %v3829_v24 = vpack.c.b16 %v3825_v28, %v3825_v28  ;;  %v3739_v63 = vpop.f32.mrf.mxu3  ;;  %4078 = vmatpush.bf16.msra.mxu0 %v5668_v56 }
 0x30e   : > { %v3806_v32 = vld.sshfl [vmem:[#allocation1 + $0x20] sm:$0xff pattern:$0x73625140]  ;;  %v3788_v49 = vsel %vm3782_vm13, %v3779_v3, %v3785_v16 }
 0x30f   : > { %v3834_v34 = vshrl.u32 %v3829_v24, 16  ;;  %v3837_v1 = vshll.u32 %v3829_v24, 16  ;;  %v3818_v27 = vpack.c.bf16 %v3806_v32, %v3806_v32  ;;  %v3796_v55 = vrot.slane %v3788_v49, 2  ;;  %4120 = vmatpush.bf16.msrb.mxu1 %v5669_v62 }
 0x310   : > { %v3797_v59 = vrot.slane %v3788_v49, 4 }
 0x311   : > { %v3836_v30 = vrot.slane %v3834_v34, 7  ;;  %v3809_v26 = vld.sshfl [vmem:[#allocation1] sm:$0xff pattern:$0x73625140]  ;;  %v3826_v31 = vunpack.c.l.b16 %v3818_v27  ;;  %3810 = vst [vmem:[#allocation1 + $0x20] ss:$4 sm:$0xff] %v3796_v55  ;;  %v4188_v34 = vunpack.c.l.b16 %v3945_v58  ;;  %v4287_v55 = vunpack.c.l.b16 %v3951_v60 }
 0x312   : > { %3811 = vst [vmem:[#allocation1 + $0x21] ss:$4 sm:$0xff] %v3797_v59  ;;  %v3819_v7 = vpack.c.bf16 %v3809_v26, %v3809_v26 }
 0x313   : > { %v3839_v10 = vor.u32 %v3837_v1, %v3836_v30  ;;  %v3830_v19 = vpack.c.b16 %v3826_v31, %v3826_v31  ;;  %v3948_v1 = vld [vmem:[%s7467_s8 + $0x50] sm:$0xf]  ;;  %v4190_v59 = vpack.c.b16 %v4188_v34, %v4188_v34  ;;  %v4289_v18 = vpack.c.b16 %v4287_v55, %v4287_v55 }
 0x314   : > { %v3827_v39 = vunpack.c.l.b16 %v3819_v7  ;;  %v4233_v27 = vunpack.c.l.b16 %v3948_v1  ;;  %v5672_v7 = vld [vmem:[%s7467_s8 + $0x48] sm:$0xff] }
 0x315   : > { %v3865_v0 = vsel %vm5921_vm4, 0, %v3839_v10  ;;  %v3841_v46 = vshrl.u32 %v3830_v19, 16  ;;  %v3844_v40 = vshll.u32 %v3830_v19, 16  ;;  %v4199_v26 = vsel %vm1727_vm8, %v4190_v59, 0  ;;  %v5673_v10 = vld [vmem:[%s7467_s8 + $0x54] sm:$0xff] }
 0x316   : > { %v3869_v13 = vsel %vm5963_vm10, %v3865_v0, 0  ;;  %v3831_v57 = vpack.c.b16 %v3827_v39, %v3827_v39  ;;  %v4235_v50 = vpack.c.b16 %v4233_v27, %v4233_v27  ;;  %4207 = vmatpush.bf16.msra.mxu3 %v4199_v26  ;;  %v4298_v12 = vsel %vm1727_vm8, %v4289_v18, 0 }
 0x317   : > { %v3877_v6 = vrot.slane %v3869_v13, 1  ;;  %v3843_v43 = vrot.slane %v3841_v46, 7  ;;  %v3878_v54 = vrot.slane %v3869_v13, 2  ;;  %4306 = vmatpush.bf16.msra.mxu1 %v4298_v12 }
 0x318   : > { %v3848_v35 = vshrl.u32 %v3831_v57, 16  ;;  %v3851_v38 = vshll.u32 %v3831_v57, 16  ;;  %v4244_v51 = vsel %vm1727_vm8, %v4235_v50, 0 }
 0x319   : > { %v3846_v22 = vor.u32 %v3844_v40, %v3843_v43  ;;  %v3812_v52 = vld.sshfl [vmem:[#allocation1 + $0x20] sm:$0xff pattern:$0x73625140]  ;;  %3895 = vst [vmem:[#allocation1 + $0x4] ss:$9 sm:$0xff] %v3877_v6  ;;  %4252 = vmatpush.bf16.msrb.mxu0 %v4244_v51 }
 0x31a   : > { %v3820_v61 = vpack.c.bf16 %v3812_v52, %v3812_v52  ;;  %3885 = vst [vmem:[#allocation1] ss:$9 sm:$0xff] %v5789_v2  ;;  %v3850_v3 = vrot.slane %v3848_v35, 7  ;;  %4208 = vmatpush.bf16.msra.mxu3 %v5671_v11 }
 0x31b   : > { %v3866_v44 = vsel %vm5921_vm4, 0, %v3846_v22  ;;  %3887 = vst [vmem:[#allocation1 + $0x1] ss:$9 sm:$0xff] %v5956_v47  ;;  %4307 = vmatpush.bf16.msra.mxu1 %v5673_v10 }
 0x31c   : > { %v3870_v53 = vsel %vm5963_vm10, %v3866_v44, 0  ;;  %v3828_v15 = vunpack.c.l.b16 %v3820_v61  ;;  %3889 = vst [vmem:[#allocation1 + $0x2] ss:$9 sm:$0xff] %v5959_v48  ;;  %v3853_v24 = vor.u32 %v3851_v38, %v3850_v3 }
 0x31d   : > { %v3879_v4 = vrot.slane %v3870_v53, 1  ;;  %3892 = vst [vmem:[#allocation1 + $0x3] ss:$9 sm:$0xff] %v3869_v13  ;;  %v3880_v37 = vrot.slane %v3870_v53, 2  ;;  %4253 = vmatpush.bf16.msrb.mxu0 %v5672_v7 }
 0x31e   : > { %v3832_v23 = vpack.c.b16 %v3828_v15, %v3828_v15  ;;  %3898 = vst [vmem:[#allocation1 + $0x5] ss:$9 sm:$0xff] %v3878_v54  ;;  %v3867_v45 = vsel %vm5921_vm4, 0, %v3853_v24 }
 0x31f   : > { %3901 = vst [vmem:[#allocation1 + $0x6] ss:$9 sm:$0xff] %v3870_v53  ;;  %v3871_v8 = vsel %vm5963_vm10, %v3867_v45, 0 }
 0x320   : > { %v3855_v28 = vshrl.u32 %v3832_v23, 16  ;;  %3904 = vst [vmem:[#allocation1 + $0x7] ss:$9 sm:$0xff] %v3879_v4  ;;  %v3858_v17 = vshll.u32 %v3832_v23, 16  ;;  %v3881_v20 = vrot.slane %v3871_v8, 1  ;;  %v3882_v41 = vrot.slane %v3871_v8, 2 }
 0x322   : > { %v3857_v16 = vrot.slane %v3855_v28, 7 }
 0x324   : > { %v3860_v63 = vor.u32 %v3858_v17, %v3857_v16 }
 0x326   : > { %v3868_v29 = vsel %vm5921_vm4, 0, %v3860_v63 }
 0x327   : > { %v3872_v9 = vsel %vm5963_vm10, %v3868_v29, 0  ;;  %v7333_v32 = vld [vmem:[#allocation1] sm:$0xff] }
 0x328   : > { %v3883_v49 = vrot.slane %v3872_v9, 1  ;;  %v3884_v25 = vrot.slane %v3872_v9, 2  ;;  %5398 = vmatmul.msk.bf16.vlgmr.msra.gmra.mxu2 %vm3968_vm14, %v7333_v32  ;;  %3908 = vst [vmem:[#allocation1] ss:$9 sm:$0xff] %v3880_v37  ;;  %v4000_v30 = vshll.u32 %v7333_v32, 16  ;;  %v4050_v56 = vrot.slane %v7333_v32, 1 }
 0x329   : > { %3916 = vst [vmem:[#allocation1 + $0x4] ss:$9 sm:$0xff] %v3872_v9  ;;  %v4092_v14 = vrot.slane %v7333_v32, 3  ;;  %v3998_v0 = vshrl.u32 %v7333_v32, 16  ;;  %v4223_v38 = vrot.slane %v7333_v32, 6  ;;  %v4180_v29 = vrot.slane %v7333_v32, 4 }
 0x32a   : > { %3918 = vst [vmem:[#allocation1 + $0x5] ss:$9 sm:$0xff] %v3883_v49  ;;  %v4002_v19 = vrot.slane %v4000_v30, 1  ;;  %v4135_v54 = vrot.slane %v4000_v30, 4  ;;  %v4268_v23 = vrot.slane %v4000_v30, 7  ;;  %v4321_v1 = vrot.slane %v7333_v32, 7 }
 0x32b   : > { %3920 = vst [vmem:[#allocation1 + $0x6] ss:$9 sm:$0xff] %v3884_v25  ;;  %v4134_v52 = vrot.slane %v3998_v0, 3  ;;  %v4267_v4 = vrot.slane %v3998_v0, 6 }
 0x32c   : > { %3921 = vst [vmem:[#allocation1 + $0x7] ss:$9 sm:$0xff] %v5789_v2  ;;  %v3954_v2 = vld [vmem:[%s7467_s8 + $0x68] sm:$0xf]  ;;  %v4003_v57 = vor.u32 %v4002_v19, %v3998_v0 }
 0x32d   : > { %3910 = vst [vmem:[#allocation1 + $0x1] ss:$9 sm:$0xff] %v3871_v8  ;;  %v4331_v5 = vunpack.c.l.b16 %v3954_v2  ;;  %v4136_v35 = vor.u32 %v4135_v54, %v4134_v52  ;;  %v4269_v16 = vor.u32 %v4268_v23, %v4267_v4 }
 0x32e   : > { %3912 = vst [vmem:[#allocation1 + $0x2] ss:$9 sm:$0xff] %v3881_v20 }
 0x32f   : > { %3914 = vst [vmem:[#allocation1 + $0x3] ss:$9 sm:$0xff] %v3882_v41  ;;  %v4333_v31 = vpack.c.b16 %v4331_v5, %v4331_v5 }
 0x331   : > { %v4342_v33 = vsel %vm1727_vm8, %v4333_v31, 0 }
 0x332   : > { %4350 = vmatpush.bf16.msra.mxu2 %v4342_v33 }
 0x336   : > { %v7366_v21 = vld [vmem:[#allocation1] sm:$0xff] }
 0x337   : > { %v4051_v62 = vrot.slane %v7366_v21, 1  ;;  %3924 = vst [vmem:[#allocation1] ss:$9 sm:$0xff] %v5956_v47  ;;  %v4093_v39 = vrot.slane %v7366_v21, 3  ;;  %v4004_v46 = vshll.u32 %v7366_v21, 16  ;;  %v4008_v43 = vshrl.u32 %v7366_v21, 16 }
 0x338   : > { %3925 = vst [vmem:[#allocation1 + $0x1] ss:$9 sm:$0xff] %v5959_v48  ;;  %5399 = vmatmul.msk.bf16.gmra.mxu2 %vm3968_vm14, %v7366_v21  ;;  %v5674_v48 = vld [vmem:[%s7467_s8 + $0x60] sm:$0xff]  ;;  %v4224_v3 = vrot.slane %v7366_v21, 6  ;;  %v4181_v17 = vrot.slane %v7366_v21, 4  ;;  %v4322_v41 = vrot.slane %v7366_v21, 7 }
 0x339   : > { %v4052_v36 = vsel %vm1576_vm15, %v4050_v56, %v4051_v62  ;;  %v4094_v13 = vsel %vm1625_vm1, %v4092_v14, %v4093_v39  ;;  %v4006_v6 = vrot.slane %v4004_v46, 1  ;;  %4351 = vmatpush.bf16.msra.mxu2 %v5674_v48  ;;  %v4137_v40 = vrot.slane %v4008_v43, 3  ;;  %v5724_v56 = vld [vmem:[%s7468_s9] ss:$0 sm:$0xff] }
 0x33a   : > { %5410 = vmatmul.msk.bf16.vlgmr.msra.gmra.mxu0 %vm3968_vm14, %v4052_v36  ;;  %5416 = vmatmul.msk.bf16.vlgmr.msrb.gmra.mxu1 %vm3968_vm14, %v4094_v13  ;;  %v4138_v22 = vrot.slane %v4004_v46, 4  ;;  %v4270_v15 = vrot.slane %v4008_v43, 6  ;;  %v4271_v42 = vrot.slane %v4004_v46, 7  ;;  %v4225_v63 = vsel %vm418_vm2, %v4223_v38, %v4224_v3 }
 0x33b   : > { %v4007_v47 = vsel %vm1517_vm7, %v4003_v57, %v4006_v6  ;;  %v4010_v53 = vor.u32 %v4008_v43, %v4006_v6  ;;  %v4182_v9 = vsel %vm1727_vm8, %v4180_v29, %v4181_v17  ;;  %v4323_v60 = vsel %vm413_vm0, %v4321_v1, %v4322_v41 }
 0x33c   : > { %5404 = vmatmul.msk.bf16.vlgmr.msrb.gmra.mxu3 %vm3968_vm14, %v4007_v47  ;;  %v4139_v61 = vor.u32 %v4138_v22, %v4137_v40  ;;  %v4272_v28 = vor.u32 %v4271_v42, %v4270_v15 }
 0x33e   : > { %v4140_v44 = vsel %vm1674_vm6, %v4136_v35, %v4139_v61  ;;  %v4273_v37 = vsel %vm419_vm3, %v4269_v16, %v4272_v28 }
 0x33f   : > { %v3926_v24 = vld [vmem:[#allocation1] sm:$0xff] }
 0x340   : > { %v3927_v45 = vsel %vm418_vm2, %v3926_v24, 0 }
 0x341   : > { %v4274_v49 = vshrl.u32 %v3927_v45, 16  ;;  %v4277_v25 = vshll.u32 %v3927_v45, 16  ;;  %v4226_v58 = vrot.slane %v3927_v45, 6  ;;  %v4324_v2 = vrot.slane %v3927_v45, 7 }
 0x343   : > { %v4276_v8 = vrot.slane %v4274_v49, 6  ;;  %v4279_v20 = vrot.slane %v4277_v25, 7  ;;  %v4227_v27 = vsel %vm418_vm2, %v4224_v3, %v4226_v58  ;;  %v4325_v59 = vsel %vm413_vm0, %v4322_v41, %v4324_v2 }
 0x345   : > { %v4280_v34 = vor.u32 %v4279_v20, %v4276_v8 }
 0x347   : > { %v4281_v55 = vsel %vm419_vm3, %v4272_v28, %v4280_v34  ;;  %vm4402_vm3 = vcmask 191488  }
 0x348   : > { %5422 = vmatmul.msk.bf16.vlgmr.msrb.gmra.mxu2 %vm3968_vm14, %v4140_v44 }
 0x34a   : > { %5411 = vmatmul.msk.bf16.gmra.mxu0 %vm3968_vm14, %v4051_v62  ;;  %5417 = vmatmul.msk.bf16.gmra.mxu1 %vm3968_vm14, %v4093_v39 }
 0x34c   : > { %5405 = vmatmul.msk.bf16.gmra.mxu3 %vm3968_vm14, %v4010_v53 }
 0x358   : > { %5423 = vmatmul.msk.bf16.gmra.mxu2 %vm3968_vm14, %v4139_v61 }
 0x35a   : > { %5434 = vmatmul.msk.bf16.vlgmr.msrb.gmra.mxu0 %vm3968_vm14, %v4225_v63  ;;  %5440 = vmatmul.msk.bf16.vlgmr.msra.gmra.mxu1 %vm3968_vm14, %v4273_v37 }
 0x35c   : > { %5428 = vmatmul.msk.bf16.vlgmr.msra.gmra.mxu3 %vm3968_vm14, %v4182_v9 }
 0x368   : > { %5446 = vmatmul.msk.bf16.vlgmr.msra.gmra.mxu2 %vm3968_vm14, %v4323_v60 }
 0x36a   : > { %5435 = vmatmul.msk.bf16.gmra.mxu0 %vm3968_vm14, %v4227_v27  ;;  %5441 = vmatmul.msk.bf16.gmra.mxu1 %vm3968_vm14, %v4281_v55 }
 0x36c   : > { %5429 = vmatmul.msk.bf16.gmra.mxu3 %vm3968_vm14, %v4181_v17 }
 0x378   : > { %5447 = vmatmul.msk.bf16.gmra.mxu2 %vm3968_vm14, %v4325_v59 }
 0x3ab   : > { %v3986_v32 = vpop.f32.mrf.mxu2 }
 0x3ac   : > { %v3995_v39 = vadd.f32 %v5724_v56, %v3986_v32 }
 0x3b3   : > { %v3988_v5 = vpop.f32.mrf.mxu2 }
 0x3b4   : > { %v3996_v47 = vadd.f32 %v5724_v56, %v3988_v5 }
 0x3b7   : > { %v4080_v50 = vpop.f32.mrf.mxu0  ;;  %v4122_v18 = vpop.f32.mrf.mxu1 }
 0x3bb   : > { %v3991_v30 = vpop.f32.mrf.mxu2 }
 0x3bc   : > { %v3997_v53 = vadd.f32 %v5724_v56, %v3991_v30 }
 0x3bf   : > { %v4038_v26 = vpop.f32.mrf.mxu3  ;;  %v4082_v31 = vpop.f32.mrf.mxu0 }
 0x3c0   : > { %v4124_v51 = vpop.f32.mrf.mxu1  ;;  %v4047_v0 = vadd.f32 %v4038_v26, %v3995_v39 }
 0x3c2   : > { %v4089_v57 = vadd.f32 %v4080_v50, %v4047_v0 }
 0x3c3   : > { %v3993_v12 = vpop.f32.mrf.mxu2 }
 0x3c4   : > { %v4131_v48 = vadd.f32 %v4122_v18, %v4089_v57 }
 0x3c7   : > { %v4040_v11 = vpop.f32.mrf.mxu3  ;;  %v4085_v33 = vpop.f32.mrf.mxu0 }
 0x3c8   : > { %v4127_v7 = vpop.f32.mrf.mxu1  ;;  %v4048_v43 = vadd.f32 %v4040_v11, %v3996_v47 }
 0x3ca   : > { %v4090_v61 = vadd.f32 %v4082_v31, %v4048_v43 }
 0x3cb   : > { %v4168_v10 = vpop.f32.mrf.mxu2 }
 0x3cc   : > { %v4177_v52 = vadd.f32 %v4168_v10, %v4131_v48  ;;  %v4132_v42 = vadd.f32 %v4124_v51, %v4090_v61 }
 0x3cf   : > { %v4043_v19 = vpop.f32.mrf.mxu3  ;;  %v4087_v21 = vpop.f32.mrf.mxu0 }
 0x3d0   : > { %v4129_v14 = vpop.f32.mrf.mxu1  ;;  %v4049_v15 = vadd.f32 %v4043_v19, %v3997_v53 }
 0x3d2   : > { %v4091_v16 = vadd.f32 %v4085_v33, %v4049_v15 }
 0x3d3   : > { %v4170_v62 = vpop.f32.mrf.mxu2 }
 0x3d4   : > { %v4178_v28 = vadd.f32 %v4170_v62, %v4132_v42  ;;  %v4133_v29 = vadd.f32 %v4127_v7, %v4091_v16 }
 0x3d7   : > { %v4045_v46 = vpop.f32.mrf.mxu3  ;;  %v4255_v36 = vpop.f32.mrf.mxu0 }
 0x3d8   : > { %v4309_v13 = vpop.f32.mrf.mxu1 }
 0x3db   : > { %v4173_v6 = vpop.f32.mrf.mxu2 }
 0x3dc   : > { %v4179_v8 = vadd.f32 %v4173_v6, %v4133_v29 }
 0x3df   : > { %v4210_v40 = vpop.f32.mrf.mxu3  ;;  %v4257_v22 = vpop.f32.mrf.mxu0 }
 0x3e0   : > { %v4311_v54 = vpop.f32.mrf.mxu1  ;;  %v4219_v35 = vadd.f32 %v4210_v40, %v4177_v52 }
 0x3e2   : > { %v4264_v4 = vadd.f32 %v4255_v36, %v4219_v35 }
 0x3e3   : > { %v4175_v44 = vpop.f32.mrf.mxu2 }
 0x3e4   : > { %v4318_v24 = vadd.f32 %v4309_v13, %v4264_v4 }
 0x3e7   : > { %v4212_v23 = vpop.f32.mrf.mxu3  ;;  %v4260_v3 = vpop.f32.mrf.mxu0 }
 0x3e8   : > { %v4314_v38 = vpop.f32.mrf.mxu1  ;;  %v4220_v17 = vadd.f32 %v4212_v23, %v4178_v28 }
 0x3ea   : > { %v4265_v45 = vadd.f32 %v4257_v22, %v4220_v17 }
 0x3eb   : > { %v4353_v63 = vpop.f32.mrf.mxu2 }
 0x3ec   : > { %v4362_v37 = vadd.f32 %v4353_v63, %v4318_v24  ;;  %v4319_v60 = vadd.f32 %v4311_v54, %v4265_v45 }
 0x3ee   : > { %vm4365_vm0 = vcmp.ge.f32.partialorder %v4362_v37, 0.0  ;;  %v4368_v9 = vmul.f32 0.2, %v4362_v37 }
 0x3ef   : > { %v4215_v49 = vpop.f32.mrf.mxu3  ;;  %v4262_v25 = vpop.f32.mrf.mxu0 }
 0x3f0   : > { %v4316_v20 = vpop.f32.mrf.mxu1  ;;  %v4371_v41 = vsel %vm4365_vm0, %v4362_v37, %v4368_v9  ;;  %v4221_v1 = vadd.f32 %v4215_v49, %v4179_v8 }
 0x3f1   : > { %v4377_v58 = vrot.slane %v4371_v41, 2  ;;  %v4378_v34 = vrot.slane %v4371_v41, 6  ;;  %4383 = vst [vmem:[#allocation1] ss:$4 sm:$0xff] %v4371_v41 }
 0x3f2   : > { %v4266_v2 = vadd.f32 %v4260_v3, %v4221_v1 }
 0x3f3   : > { %4385 = vst [vmem:[#allocation1 + $0x1] ss:$4 sm:$0xff] %v4377_v58  ;;  %v4355_v27 = vpop.f32.mrf.mxu2 }
 0x3f4   : > { %4388 = vst [vmem:[#allocation1 + $0x20] ss:$4 sm:$0xff] %v4378_v34  ;;  %v4363_v55 = vadd.f32 %v4355_v27, %v4319_v60  ;;  %v4320_v30 = vadd.f32 %v4314_v38, %v4266_v2 }
 0x3f6   : > { %vm4366_vm2 = vcmp.ge.f32.partialorder %v4363_v55, 0.0  ;;  %v4369_v59 = vmul.f32 0.2, %v4363_v55 }
 0x3f7   : > { %v4217_v32 = vpop.f32.mrf.mxu3 }
 0x3f8   : > { %v4372_v5 = vsel %vm4366_vm2, %v4363_v55, %v4369_v59 }
 0x3f9   : > { %v4379_v50 = vrot.slane %v4372_v5, 4  ;;  %v4380_v18 = vrot.slane %v4372_v5, 6  ;;  %4390 = vst [vmem:[#allocation1 + $0x21] ss:$4 sm:$0xff] %v4372_v5 }
 0x3fa   : > { %v4386_v26 = vld.sshfl [vmem:[#allocation1] sm:$0xff pattern:$0x73625140] }
 0x3fb   : > { %v4358_v31 = vpop.f32.mrf.mxu2  ;;  %4392 = vst [vmem:[#allocation1] ss:$4 sm:$0xff] %v4379_v50 }
 0x3fc   : > { %v4364_v51 = vadd.f32 %v4358_v31, %v4320_v30  ;;  %4393 = vst [vmem:[#allocation1 + $0x1] ss:$4 sm:$0xff] %v4380_v18 }
 0x3fd   : > { %4403 = vst.msk [vmem:[%s367_s30] sm:$0xf] %vm4402_vm3, %v4386_v26 }
 0x3fe   : > { %vm4367_vm4 = vcmp.ge.f32.partialorder %v4364_v51, 0.0  ;;  %v4370_v12 = vmul.f32 0.2, %v4364_v51 }
 0x400   : > { %v4373_v11 = vsel %vm4367_vm4, %v4364_v51, %v4370_v12  ;;  %v4391_v33 = vld.sshfl [vmem:[#allocation1 + $0x20] sm:$0xff pattern:$0x73625140] }
 0x401   : > { %v4381_v7 = vrot.slane %v4373_v11, 2  ;;  %v4382_v10 = vrot.slane %v4373_v11, 4  ;;  %4404 = vst.msk [vmem:[%s367_s30 + $0x4] sm:$0xf] %vm4402_vm3, %v4391_v33 }
 0x403   : > { %v4360_v19 = vpop.f32.mrf.mxu2  ;;  %v4394_v21 = vld.sshfl [vmem:[#allocation1] sm:$0xff pattern:$0x73625140]  ;;  %4395 = vst [vmem:[#allocation1 + $0x20] ss:$4 sm:$0xff] %v4381_v7 }
 0x404   : > { %4396 = vst [vmem:[#allocation1 + $0x21] ss:$4 sm:$0xff] %v4382_v10 }
 0x405   : > { %4405 = vst.msk [vmem:[%s367_s30 + $0x8] sm:$0xf] %vm4402_vm3, %v4394_v21 }
 0x40b   : > { %v4397_v56 = vld.sshfl [vmem:[#allocation1 + $0x20] sm:$0xff pattern:$0x73625140] }
 0x40c   : > { %4406 = vst.msk [vmem:[%s367_s30 + $0xc] sm:$0xf] %vm4402_vm3, %v4397_v56 }
 0x40d   : > { %5752 = shalt.err (!%p5749_p3)
}
 0x40e   : > { %s5790_s28 = smov 64   ;;  %s5791_s30 = smov 4  }
 0x40f   : > { %5680 = dma.vmem_to_hbm [thread:$0]  (%p5885_p5), %s4421_s21, 256, %s4423_s25, %s4408_s17, %s5790_s28, %s5790_s28, %s5791_s30  }
 0x410 PF: > { %p5686_p4 = scmp.ge.s32.totalorder %s5787_s16, 2  ;;  %s4437_s29 = sand.u32 1, %s5775_s13  }
 0x411   : > { %s4438_s11 = scalar_lea.sflag [#allocation3], %s4437_s29 }
 0x412   : > { %p5683_p7 = pnand %p5686_p4, %p5889_p6 }
 0x414   : > { %p5684_p8 = pneg %p5683_p7 }
 0x416   : > { %5770 = dma.done.wait (%p5684_p8), %s4438_s11, 256  }
 0x417   : > { %5772 = vsyncadd (%p5684_p8), %s4438_s11, 4294967040  ;;  %p20_p9 = scmp.ge.s32.totalorder %s5872_s19, 4   ;;  %s7476_s13 = smov %s5779_s14 }
 0x418   : > { %s7477_s14 = smov %s5783_s15  ;;  %s7478_s15 = smov %s5883_s22 }
 0x419   : > { %s7479_s16 = smov %s5872_s19  ;;  %22 = sbr.rel (!%p20_p9) target bundleno = 3 (0x3), region = 131 }
 0x41e   :  { %4444 = vsyncpa [#allocation3], 1 }
 0x41f   :  { %4446 = vsyncpa [#allocation3 + $0x1], 1 }

</bundles_post_ra>
